<compile_context>
chip_gen: v6e
topology: v6e:2x2x1
jax: 0.10.0
libtpu: 0.0.40
codegen_flags: <defaults>
</compile_context>

<pallas_src>
import numpy as np
import jax
import jax.numpy as jnp
from jax import lax
from jax.experimental import pallas as pl
from jax.experimental.pallas import tpu as pltpu

NUM_CLASSES = 10
K = 5                    # conv kernel size
LANES_PAD = 128          # every lane group padded to one full vreg width
LANES1_IN = 32 * 3       # valid input lanes (w*3 + c)
# conv1: 32x32x3 -> 28x28x6 -> pool -> 14x14x6   (valid half-lanes: 14*6 = 84)
# conv2: 14x14x6 -> 10x10x16 -> pool -> 5x5x16   (valid half-lanes: 5*16 = 80)
MAX_BT = 128             # batch tile; ~25 MB VMEM peak at 128 -> fits v5e/v6e/v7x.
                         # (v6e could go 256 with vmem_limit ~64 MiB; 128 is the safe all-gen pick.)


# ----------------------------------------------------------------------------
# Fused forward kernel for one batch tile of Bt images.
# ----------------------------------------------------------------------------
def _make_kernel(Bt):
    L1 = Bt * 32 - (K - 1)   # rows of the flat (Bt*32)-row space with a valid conv1 output
    L2 = Bt * 16 - (K - 1)   # same for conv2 in the pooled (Bt*16)-row space
    f32 = jnp.float32
    bf16 = jnp.bfloat16
    H = LANES_PAD

    def kernel(x_ref, wb1_ref, bc1_ref, wb2_ref, bc2_ref,
               w1_ref, b1_ref, w2_ref, b2_ref, w3_ref, b3_ref,
               o_ref, s1, sp1, s2, sp2):
        # ---- conv1 (5x5, 3->6): one K-stacked banded matmul, bias, ReLU,
        #      width 2x-pool folded into the weight's (parity, pooled-col, ch) lane order.
        xs = jnp.concatenate(
            [x_ref[pl.ds(kh, L1), :].astype(bf16) for kh in range(K)], axis=1)  # (L1, 640)
        acc = jnp.dot(xs, wb1_ref[...], preferred_element_type=f32)             # (L1, 256)
        acc = jnp.maximum(acc + bc1_ref[...], 0.0)
        # width pool = max of the two aligned 128-lane halves; lane-dense store
        s1[pl.ds(0, L1), :] = jnp.maximum(acc[:, :H], acc[:, H:])
        s1[pl.ds(L1, K - 1), :] = jnp.zeros((K - 1, H), f32)                    # define tail rows
        # height 2x pool via stride-2 row reads (image row stride 32 is even)
        sp1[...] = jnp.maximum(s1[pl.ds(0, Bt * 16, 2), :],
                               s1[pl.ds(1, Bt * 16, 2), :])                     # (Bt*16, 128)

        # ---- conv2 (5x5, 6->16): same structure
        ss = jnp.concatenate(
            [sp1[pl.ds(kh, L2), :].astype(bf16) for kh in range(K)], axis=1)    # (L2, 640)
        acc2 = jnp.dot(ss, wb2_ref[...], preferred_element_type=f32)            # (L2, 256)
        acc2 = jnp.maximum(acc2 + bc2_ref[...], 0.0)
        s2[pl.ds(0, L2), :] = jnp.maximum(acc2[:, :H], acc2[:, H:])
        s2[pl.ds(L2, K - 1), :] = jnp.zeros((K - 1, H), f32)
        sp2[...] = jnp.maximum(s2[pl.ds(0, Bt * 8, 2), :],
                               s2[pl.ds(1, Bt * 8, 2), :])                      # (Bt*8, 128)

        # ---- fc1 -> relu -> fc2 -> relu -> fc3 -> log_softmax
        # The (C,H,W) torch .view flatten is a single lane-concat of 5 stride-8 row
        # gathers (pooled height r -> lanes [r*128, r*128+80)), then one K=640 matmul.
        flat = jnp.concatenate(
            [sp2[pl.ds(r, Bt, 8), :].astype(bf16) for r in range(5)], axis=1)   # (Bt, 640)
        h = jnp.maximum(jnp.dot(flat, w1_ref[...], preferred_element_type=f32)
                        + b1_ref[...], 0.0)                                     # (Bt, 128)
        h = jnp.maximum(jnp.dot(h.astype(bf16), w2_ref[...],
                                preferred_element_type=f32) + b2_ref[...], 0.0)
        logits = jnp.dot(h.astype(bf16), w3_ref[...],
                         preferred_element_type=f32) + b3_ref[...]              # (Bt, 128)
        m = jnp.max(logits, axis=-1, keepdims=True)
        s = logits - m
        # padded classes carry bias -1e30 -> exp()==0, so the 10-class log_softmax is exact
        o_ref[...] = s - jnp.log(jnp.sum(jnp.exp(s), axis=-1, keepdims=True))

    return kernel


_WEIGHT_NAMES = ("wb1", "bc1", "wb2", "bc2", "w1", "b1", "w2", "b2", "w3", "b3")


@jax.jit
def cnn_cifar_forward(x_nchw, prep):
    B = x_nchw.shape[0]
    Bt = B if B <= MAX_BT else MAX_BT
    n_tiles = (B + Bt - 1) // Bt
    if n_tiles > 1 and n_tiles % 2 == 1:
        n_tiles += 1               # keep the 'parallel' batch axis even (v7x: 2 TCs)
    Bpad = n_tiles * Bt

    # NCHW -> NHWC -> flat 2-D row space: row = b*32 + h, lane = w*3 + c, pad lanes to 128
    x = jnp.transpose(x_nchw, (0, 2, 3, 1)).reshape(B * 32, LANES1_IN).astype(jnp.float32)
    x = jnp.pad(x, ((0, (Bpad - B) * 32), (0, LANES_PAD - LANES1_IN)))

    weights = [prep[k] for k in _WEIGHT_NAMES]
    in_specs = [pl.BlockSpec((Bt * 32, LANES_PAD), lambda i: (i, 0))]
    for wgt in weights:                       # resident weights: constant block index
        in_specs.append(pl.BlockSpec(wgt.shape, lambda i: (0, 0)))

    out = pl.pallas_call(
        _make_kernel(Bt),
        out_shape=jax.ShapeDtypeStruct((Bpad, LANES_PAD), jnp.float32),
        grid=(Bpad // Bt,),
        in_specs=in_specs,
        out_specs=pl.BlockSpec((Bt, LANES_PAD), lambda i: (i, 0)),
        scratch_shapes=[
            pltpu.VMEM((Bt * 32, LANES_PAD), jnp.float32),   # conv1 width-pooled rows
            pltpu.VMEM((Bt * 16, LANES_PAD), jnp.float32),   # pooled1 (conv2 input)
            pltpu.VMEM((Bt * 16, LANES_PAD), jnp.float32),   # conv2 width-pooled rows
            pltpu.VMEM((Bt * 8, LANES_PAD), jnp.float32),    # pooled2 (fc1 input)
        ],
        compiler_params=pltpu.CompilerParams(
            dimension_semantics=("parallel",),               # batch tiles independent
            vmem_limit_bytes=48 * 1024 * 1024),              # < 64 MiB physical on v7x
    )(x, *weights)
    return out[:B, :NUM_CLASSES]


# ----------------------------------------------------------------------------
# Parameter handling: PyTorch-layout params -> kernel layout (one-time, host side).
# ----------------------------------------------------------------------------
def init_params(key):
    """PyTorch-style U(-1/sqrt(fan_in), 1/sqrt(fan_in)) init, torch layouts."""
    ks = jax.random.split(key, 10)

    def u(k, shape, fan_in):
        b = 1.0 / np.sqrt(fan_in)
        return jax.random.uniform(k, shape, jnp.float32, -b, b)

    return {
        "conv1_w": u(ks[0], (6, 3, 5, 5), 3 * 25),      # OIHW
        "conv1_b": u(ks[1], (6,), 3 * 25),
        "conv2_w": u(ks[2], (16, 6, 5, 5), 6 * 25),
        "conv2_b": u(ks[3], (16,), 6 * 25),
        "fc1_w": u(ks[4], (120, 400), 400),             # (out, in), in-order = (c, h, w)
        "fc1_b": u(ks[5], (120,), 400),
        "fc2_w": u(ks[6], (100, 120), 120),
        "fc2_b": u(ks[7], (100,), 120),
        "fc3_w": u(ks[8], (NUM_CLASSES, 100), 100),
        "fc3_b": u(ks[9], (NUM_CLASSES,), 100),
    }


def prepare_params(p):
    """Build K-stacked banded conv matrices (bf16), tiled biases (f32), and
    permuted + 128-lane-padded fc weights (bf16)."""
    bf16 = jnp.bfloat16

    def banded_stacked(w, W):
        # w: (Cout, Cin, K, K) torch OIHW (VALID conv, stride 1), width 2x-pool fused.
        # rows: kh*128 + (w_in*Cin + ci)  (pad rows zero)
        # cols: parity*128 + (wp*Cout + co)  (pad cols zero)
        Cout, Cin, KK, _ = w.shape
        Wp = (W - KK + 1) // 2
        wn = np.asarray(w, np.float32)
        m = np.zeros((KK * LANES_PAD, 2 * LANES_PAD), np.float32)
        for kh in range(KK):
            for parity in range(2):
                for wp in range(Wp):
                    wo = 2 * wp + parity
                    c0 = parity * LANES_PAD + wp * Cout
                    for kw in range(KK):
                        r0 = kh * LANES_PAD + (wo + kw) * Cin
                        m[r0:r0 + Cin, c0:c0 + Cout] = wn[:, :, kh, kw].T
        return m

    def tiled_bias(b, Wp):
        bn = np.asarray(b, np.float32)
        Cout = bn.shape[0]
        v = np.zeros((1, 2 * LANES_PAD), np.float32)
        for parity in range(2):
            for wp in range(Wp):
                c0 = parity * LANES_PAD + wp * Cout
                v[0, c0:c0 + Cout] = bn
        return v

    # fc1: torch flat col = c*25 + r*5 + w ; kernel row = r*128 + w*16 + c (80 valid / block)
    fc1 = np.asarray(p["fc1_w"], np.float32).reshape(120, 16, 5, 5)
    w1 = np.zeros((5, LANES_PAD, LANES_PAD), np.float32)
    w1[:, :80, :120] = fc1.transpose(2, 3, 1, 0).reshape(5, 80, 120)
    w1 = w1.reshape(5 * LANES_PAD, LANES_PAD)
    b1 = np.zeros((1, LANES_PAD), np.float32)
    b1[0, :120] = np.asarray(p["fc1_b"], np.float32)

    w2 = np.zeros((LANES_PAD, LANES_PAD), np.float32)
    w2[:120, :100] = np.asarray(p["fc2_w"], np.float32).T
    b2 = np.zeros((1, LANES_PAD), np.float32)
    b2[0, :100] = np.asarray(p["fc2_b"], np.float32)

    w3 = np.zeros((LANES_PAD, LANES_PAD), np.float32)
    w3[:100, :NUM_CLASSES] = np.asarray(p["fc3_w"], np.float32).T
    b3 = np.full((1, LANES_PAD), -1e30, np.float32)      # pad classes -> prob 0, sliced off
    b3[0, :NUM_CLASSES] = np.asarray(p["fc3_b"], np.float32)

    return {
        "wb1": jnp.asarray(banded_stacked(np.asarray(p["conv1_w"]), 32), bf16),  # (640, 256)
        "bc1": jnp.asarray(tiled_bias(p["conv1_b"], 14)),                        # (1, 256)
        "wb2": jnp.asarray(banded_stacked(np.asarray(p["conv2_w"]), 14), bf16),  # (640, 256)
        "bc2": jnp.asarray(tiled_bias(p["conv2_b"], 5)),                         # (1, 256)
        "w1": jnp.asarray(w1, bf16), "b1": jnp.asarray(b1),
        "w2": jnp.asarray(w2, bf16), "b2": jnp.asarray(b2),
        "w3": jnp.asarray(w3, bf16), "b3": jnp.asarray(b3),
    }


# Pure-JAX reference mirroring the PyTorch module (NCHW/OIHW, f32), used as the check.
def reference_forward(x, p):
    dn = ("NCHW", "OIHW", "NCHW")
    y = lax.conv_general_dilated(x, p["conv1_w"], (1, 1), "VALID", dimension_numbers=dn)
    y = jnp.maximum(y + p["conv1_b"][None, :, None, None], 0.0)
    y = lax.reduce_window(y, -jnp.inf, lax.max, (1, 1, 2, 2), (1, 1, 2, 2), "VALID")
    y = lax.conv_general_dilated(y, p["conv2_w"], (1, 1), "VALID", dimension_numbers=dn)
    y = jnp.maximum(y + p["conv2_b"][None, :, None, None], 0.0)
    y = lax.reduce_window(y, -jnp.inf, lax.max, (1, 1, 2, 2), (1, 1, 2, 2), "VALID")
    flat = y.reshape(x.shape[0], 16 * 5 * 5)              # (C, H, W) order == torch .view
    h = jnp.maximum(flat @ p["fc1_w"].T + p["fc1_b"], 0.0)
    h = jnp.maximum(h @ p["fc2_w"].T + p["fc2_b"], 0.0)
    logits = h @ p["fc3_w"].T + p["fc3_b"]
    return jax.nn.log_softmax(logits, axis=1)


if __name__ == "__main__":
    key = jax.random.PRNGKey(0)
    pkey, xkey = jax.random.split(key)
    params = init_params(pkey)
    prep = prepare_params(params)

    # CIFAR-shaped input (32x32 spatial is required by fc1's view(16*5*5)); small batch.
    x = jax.random.normal(xkey, (8, 3, 32, 32), jnp.float32)

    out = jax.block_until_ready(cnn_cifar_forward(x, prep))

    assert out.shape == (8, NUM_CLASSES)
    assert bool(jnp.all(jnp.isfinite(out)))
    # log_softmax rows must exponentiate-sum to 1
    assert bool(jnp.allclose(jnp.sum(jnp.exp(out), axis=1), 1.0, atol=1e-3))
    # compare against the pure-JAX / PyTorch-semantics reference (bf16 MXU operands)
    ref = reference_forward(x, params)
    assert bool(jnp.allclose(out, ref, atol=3e-2, rtol=3e-2))

    print("KERNEL_OK")
</pallas_src>

<mosaic_0001>
module attributes {stable_mosaic.version = 11 : i64} {
  func.func @kernel(%arg0: i32, %arg1: memref<256x128xf32, #tpu.memory_space<vmem>>, %arg2: memref<640x256xbf16, #tpu.memory_space<vmem>>, %arg3: memref<1x256xf32, #tpu.memory_space<vmem>>, %arg4: memref<640x256xbf16, #tpu.memory_space<vmem>>, %arg5: memref<1x256xf32, #tpu.memory_space<vmem>>, %arg6: memref<640x128xbf16, #tpu.memory_space<vmem>>, %arg7: memref<1x128xf32, #tpu.memory_space<vmem>>, %arg8: memref<128x128xbf16, #tpu.memory_space<vmem>>, %arg9: memref<1x128xf32, #tpu.memory_space<vmem>>, %arg10: memref<128x128xbf16, #tpu.memory_space<vmem>>, %arg11: memref<1x128xf32, #tpu.memory_space<vmem>>, %arg12: memref<8x128xf32, #tpu.memory_space<vmem>>, %arg13: memref<256x128xf32, #tpu.memory_space<vmem>>, %arg14: memref<128x128xf32, #tpu.memory_space<vmem>>, %arg15: memref<128x128xf32, #tpu.memory_space<vmem>>, %arg16: memref<64x128xf32, #tpu.memory_space<vmem>>) attributes {dimension_semantics = [#tpu.dimension_semantics<parallel>], iteration_bounds = array<i64: 1>, scalar_prefetch = 0 : i64, scratch_operands = 4 : i64, tpu.core_type = #tpu.core_type<tc>, window_params = [{transform_indices = @transform_0, window_bounds = array<i64: 256, 128>}, {pipeline_mode = #tpu.pipeline_mode<synchronous>, transform_indices = @transform_1, window_bounds = array<i64: 640, 256>}, {pipeline_mode = #tpu.pipeline_mode<synchronous>, transform_indices = @transform_2, window_bounds = array<i64: 1, 256>}, {pipeline_mode = #tpu.pipeline_mode<synchronous>, transform_indices = @transform_3, window_bounds = array<i64: 640, 256>}, {pipeline_mode = #tpu.pipeline_mode<synchronous>, transform_indices = @transform_4, window_bounds = array<i64: 1, 256>}, {pipeline_mode = #tpu.pipeline_mode<synchronous>, transform_indices = @transform_5, window_bounds = array<i64: 640, 128>}, {pipeline_mode = #tpu.pipeline_mode<synchronous>, transform_indices = @transform_6, window_bounds = array<i64: 1, 128>}, {pipeline_mode = #tpu.pipeline_mode<synchronous>, transform_indices = @transform_7, window_bounds = array<i64: 128, 128>}, {pipeline_mode = #tpu.pipeline_mode<synchronous>, transform_indices = @transform_8, window_bounds = array<i64: 1, 128>}, {pipeline_mode = #tpu.pipeline_mode<synchronous>, transform_indices = @transform_9, window_bounds = array<i64: 128, 128>}, {pipeline_mode = #tpu.pipeline_mode<synchronous>, transform_indices = @transform_10, window_bounds = array<i64: 1, 128>}, {transform_indices = @transform_11, window_bounds = array<i64: 8, 128>}]} {
    %c0 = arith.constant 0 : index
    %c0_0 = arith.constant 0 : index
    %0 = vector.load %arg1[%c0, %c0_0] : memref<256x128xf32, #tpu.memory_space<vmem>>, vector<252x128xf32>
    %1 = arith.truncf %0 : vector<252x128xf32> to vector<252x128xbf16>
    %c1 = arith.constant 1 : index
    %c0_1 = arith.constant 0 : index
    %2 = vector.load %arg1[%c1, %c0_1] : memref<256x128xf32, #tpu.memory_space<vmem>>, vector<252x128xf32>
    %3 = arith.truncf %2 : vector<252x128xf32> to vector<252x128xbf16>
    %c2 = arith.constant 2 : index
    %c0_2 = arith.constant 0 : index
    %4 = vector.load %arg1[%c2, %c0_2] : memref<256x128xf32, #tpu.memory_space<vmem>>, vector<252x128xf32>
    %5 = arith.truncf %4 : vector<252x128xf32> to vector<252x128xbf16>
    %c3 = arith.constant 3 : index
    %c0_3 = arith.constant 0 : index
    %6 = vector.load %arg1[%c3, %c0_3] : memref<256x128xf32, #tpu.memory_space<vmem>>, vector<252x128xf32>
    %7 = arith.truncf %6 : vector<252x128xf32> to vector<252x128xbf16>
    %c4 = arith.constant 4 : index
    %c0_4 = arith.constant 0 : index
    %8 = vector.load %arg1[%c4, %c0_4] : memref<256x128xf32, #tpu.memory_space<vmem>>, vector<252x128xf32>
    %9 = arith.truncf %8 : vector<252x128xf32> to vector<252x128xbf16>
    %10 = tpu.concatenate %1, %3, %5, %7, %9 in 1 : vector<252x128xbf16>, vector<252x128xbf16>, vector<252x128xbf16>, vector<252x128xbf16>, vector<252x128xbf16> -> vector<252x640xbf16>
    %c0_5 = arith.constant 0 : index
    %c0_6 = arith.constant 0 : index
    %11 = vector.load %arg2[%c0_5, %c0_6] : memref<640x256xbf16, #tpu.memory_space<vmem>>, vector<640x256xbf16>
    %cst = arith.constant dense<0.000000e+00> : vector<252x256xf32>
    %12 = tpu.matmul %10, %11, %cst {dimension_numbers = #tpu.dot_dimension_numbers<[1], [0], [0], [1], [0, 0, 1, 1], [], []>} : vector<252x640xbf16>, vector<640x256xbf16>, vector<252x256xf32> -> vector<252x256xf32>
    %c0_7 = arith.constant 0 : index
    %c0_8 = arith.constant 0 : index
    %13 = vector.load %arg3[%c0_7, %c0_8] : memref<1x256xf32, #tpu.memory_space<vmem>>, vector<1x256xf32>
    %14 = vector.broadcast %13 : vector<1x256xf32> to vector<252x256xf32>
    %15 = arith.addf %12, %14 : vector<252x256xf32>
    %cst_9 = arith.constant 0.000000e+00 : f32
    %16 = vector.broadcast %cst_9 : f32 to vector<252x256xf32>
    %17 = arith.maximumf %15, %16 : vector<252x256xf32>
    %18 = vector.extract_strided_slice %17 {offsets = [0, 0], sizes = [252, 128], strides = [1, 1]} : vector<252x256xf32> to vector<252x128xf32>
    %19 = vector.extract_strided_slice %17 {offsets = [0, 128], sizes = [252, 128], strides = [1, 1]} : vector<252x256xf32> to vector<252x128xf32>
    %20 = arith.maximumf %18, %19 : vector<252x128xf32>
    %c0_10 = arith.constant 0 : index
    %c0_11 = arith.constant 0 : index
    %21 = vector.load %arg13[%c0_10, %c0_11] : memref<256x128xf32, #tpu.memory_space<vmem>>, vector<252x128xf32>
    tpu.vector_store %arg13[%c0_10, %c0_11], %20 {strides = array<i32>} : memref<256x128xf32, #tpu.memory_space<vmem>>, vector<252x128xf32>,
    %cst_12 = arith.constant 0.000000e+00 : f32
    %22 = vector.broadcast %cst_12 : f32 to vector<4x128xf32>
    %c252 = arith.constant 252 : index
    %c0_13 = arith.constant 0 : index
    %23 = vector.load %arg13[%c252, %c0_13] : memref<256x128xf32, #tpu.memory_space<vmem>>, vector<4x128xf32>
    tpu.vector_store %arg13[%c252, %c0_13], %22 {strides = array<i32>} : memref<256x128xf32, #tpu.memory_space<vmem>>, vector<4x128xf32>,
    %c0_14 = arith.constant 0 : index
    %c0_15 = arith.constant 0 : index
    %24 = tpu.strided_load %arg13[%c0_14, %c0_15] {strides = array<i32: 2, 1>} : memref<256x128xf32, #tpu.memory_space<vmem>>, vector<128x128xf32>
    %c1_16 = arith.constant 1 : index
    %c0_17 = arith.constant 0 : index
    %25 = tpu.strided_load %arg13[%c1_16, %c0_17] {strides = array<i32: 2, 1>} : memref<256x128xf32, #tpu.memory_space<vmem>>, vector<128x128xf32>
    %26 = arith.maximumf %24, %25 : vector<128x128xf32>
    %c0_18 = arith.constant 0 : index
    %c0_19 = arith.constant 0 : index
    %27 = vector.load %arg14[%c0_18, %c0_19] : memref<128x128xf32, #tpu.memory_space<vmem>>, vector<128x128xf32>
    tpu.vector_store %arg14[%c0_18, %c0_19], %26 {strides = array<i32>} : memref<128x128xf32, #tpu.memory_space<vmem>>, vector<128x128xf32>,
    %c0_20 = arith.constant 0 : index
    %c0_21 = arith.constant 0 : index
    %28 = vector.load %arg14[%c0_20, %c0_21] : memref<128x128xf32, #tpu.memory_space<vmem>>, vector<124x128xf32>
    %29 = arith.truncf %28 : vector<124x128xf32> to vector<124x128xbf16>
    %c1_22 = arith.constant 1 : index
    %c0_23 = arith.constant 0 : index
    %30 = vector.load %arg14[%c1_22, %c0_23] : memref<128x128xf32, #tpu.memory_space<vmem>>, vector<124x128xf32>
    %31 = arith.truncf %30 : vector<124x128xf32> to vector<124x128xbf16>
    %c2_24 = arith.constant 2 : index
    %c0_25 = arith.constant 0 : index
    %32 = vector.load %arg14[%c2_24, %c0_25] : memref<128x128xf32, #tpu.memory_space<vmem>>, vector<124x128xf32>
    %33 = arith.truncf %32 : vector<124x128xf32> to vector<124x128xbf16>
    %c3_26 = arith.constant 3 : index
    %c0_27 = arith.constant 0 : index
    %34 = vector.load %arg14[%c3_26, %c0_27] : memref<128x128xf32, #tpu.memory_space<vmem>>, vector<124x128xf32>
    %35 = arith.truncf %34 : vector<124x128xf32> to vector<124x128xbf16>
    %c4_28 = arith.constant 4 : index
    %c0_29 = arith.constant 0 : index
    %36 = vector.load %arg14[%c4_28, %c0_29] : memref<128x128xf32, #tpu.memory_space<vmem>>, vector<124x128xf32>
    %37 = arith.truncf %36 : vector<124x128xf32> to vector<124x128xbf16>
    %38 = tpu.concatenate %29, %31, %33, %35, %37 in 1 : vector<124x128xbf16>, vector<124x128xbf16>, vector<124x128xbf16>, vector<124x128xbf16>, vector<124x128xbf16> -> vector<124x640xbf16>
    %c0_30 = arith.constant 0 : index
    %c0_31 = arith.constant 0 : index
    %39 = vector.load %arg4[%c0_30, %c0_31] : memref<640x256xbf16, #tpu.memory_space<vmem>>, vector<640x256xbf16>
    %cst_32 = arith.constant dense<0.000000e+00> : vector<124x256xf32>
    %40 = tpu.matmul %38, %39, %cst_32 {dimension_numbers = #tpu.dot_dimension_numbers<[1], [0], [0], [1], [0, 0, 1, 1], [], []>} : vector<124x640xbf16>, vector<640x256xbf16>, vector<124x256xf32> -> vector<124x256xf32>
    %c0_33 = arith.constant 0 : index
    %c0_34 = arith.constant 0 : index
    %41 = vector.load %arg5[%c0_33, %c0_34] : memref<1x256xf32, #tpu.memory_space<vmem>>, vector<1x256xf32>
    %42 = vector.broadcast %41 : vector<1x256xf32> to vector<124x256xf32>
    %43 = arith.addf %40, %42 : vector<124x256xf32>
    %cst_35 = arith.constant 0.000000e+00 : f32
    %44 = vector.broadcast %cst_35 : f32 to vector<124x256xf32>
    %45 = arith.maximumf %43, %44 : vector<124x256xf32>
    %46 = vector.extract_strided_slice %45 {offsets = [0, 0], sizes = [124, 128], strides = [1, 1]} : vector<124x256xf32> to vector<124x128xf32>
    %47 = vector.extract_strided_slice %45 {offsets = [0, 128], sizes = [124, 128], strides = [1, 1]} : vector<124x256xf32> to vector<124x128xf32>
    %48 = arith.maximumf %46, %47 : vector<124x128xf32>
    %c0_36 = arith.constant 0 : index
    %c0_37 = arith.constant 0 : index
    %49 = vector.load %arg15[%c0_36, %c0_37] : memref<128x128xf32, #tpu.memory_space<vmem>>, vector<124x128xf32>
    tpu.vector_store %arg15[%c0_36, %c0_37], %48 {strides = array<i32>} : memref<128x128xf32, #tpu.memory_space<vmem>>, vector<124x128xf32>,
    %cst_38 = arith.constant 0.000000e+00 : f32
    %50 = vector.broadcast %cst_38 : f32 to vector<4x128xf32>
    %c124 = arith.constant 124 : index
    %c0_39 = arith.constant 0 : index
    %51 = vector.load %arg15[%c124, %c0_39] : memref<128x128xf32, #tpu.memory_space<vmem>>, vector<4x128xf32>
    tpu.vector_store %arg15[%c124, %c0_39], %50 {strides = array<i32>} : memref<128x128xf32, #tpu.memory_space<vmem>>, vector<4x128xf32>,
    %c0_40 = arith.constant 0 : index
    %c0_41 = arith.constant 0 : index
    %52 = tpu.strided_load %arg15[%c0_40, %c0_41] {strides = array<i32: 2, 1>} : memref<128x128xf32, #tpu.memory_space<vmem>>, vector<64x128xf32>
    %c1_42 = arith.constant 1 : index
    %c0_43 = arith.constant 0 : index
    %53 = tpu.strided_load %arg15[%c1_42, %c0_43] {strides = array<i32: 2, 1>} : memref<128x128xf32, #tpu.memory_space<vmem>>, vector<64x128xf32>
    %54 = arith.maximumf %52, %53 : vector<64x128xf32>
    %c0_44 = arith.constant 0 : index
    %c0_45 = arith.constant 0 : index
    %55 = vector.load %arg16[%c0_44, %c0_45] : memref<64x128xf32, #tpu.memory_space<vmem>>, vector<64x128xf32>
    tpu.vector_store %arg16[%c0_44, %c0_45], %54 {strides = array<i32>} : memref<64x128xf32, #tpu.memory_space<vmem>>, vector<64x128xf32>,
    %c0_46 = arith.constant 0 : index
    %c0_47 = arith.constant 0 : index
    %56 = tpu.strided_load %arg16[%c0_46, %c0_47] {strides = array<i32: 8, 1>} : memref<64x128xf32, #tpu.memory_space<vmem>>, vector<8x128xf32>
    %57 = arith.truncf %56 : vector<8x128xf32> to vector<8x128xbf16>
    %c1_48 = arith.constant 1 : index
    %c0_49 = arith.constant 0 : index
    %58 = tpu.strided_load %arg16[%c1_48, %c0_49] {strides = array<i32: 8, 1>} : memref<64x128xf32, #tpu.memory_space<vmem>>, vector<8x128xf32>
    %59 = arith.truncf %58 : vector<8x128xf32> to vector<8x128xbf16>
    %c2_50 = arith.constant 2 : index
    %c0_51 = arith.constant 0 : index
    %60 = tpu.strided_load %arg16[%c2_50, %c0_51] {strides = array<i32: 8, 1>} : memref<64x128xf32, #tpu.memory_space<vmem>>, vector<8x128xf32>
    %61 = arith.truncf %60 : vector<8x128xf32> to vector<8x128xbf16>
    %c3_52 = arith.constant 3 : index
    %c0_53 = arith.constant 0 : index
    %62 = tpu.strided_load %arg16[%c3_52, %c0_53] {strides = array<i32: 8, 1>} : memref<64x128xf32, #tpu.memory_space<vmem>>, vector<8x128xf32>
    %63 = arith.truncf %62 : vector<8x128xf32> to vector<8x128xbf16>
    %c4_54 = arith.constant 4 : index
    %c0_55 = arith.constant 0 : index
    %64 = tpu.strided_load %arg16[%c4_54, %c0_55] {strides = array<i32: 8, 1>} : memref<64x128xf32, #tpu.memory_space<vmem>>, vector<8x128xf32>
    %65 = arith.truncf %64 : vector<8x128xf32> to vector<8x128xbf16>
    %66 = tpu.concatenate %57, %59, %61, %63, %65 in 1 : vector<8x128xbf16>, vector<8x128xbf16>, vector<8x128xbf16>, vector<8x128xbf16>, vector<8x128xbf16> -> vector<8x640xbf16>
    %c0_56 = arith.constant 0 : index
    %c0_57 = arith.constant 0 : index
    %67 = vector.load %arg6[%c0_56, %c0_57] : memref<640x128xbf16, #tpu.memory_space<vmem>>, vector<640x128xbf16>
    %cst_58 = arith.constant dense<0.000000e+00> : vector<8x128xf32>
    %68 = tpu.matmul %66, %67, %cst_58 {dimension_numbers = #tpu.dot_dimension_numbers<[1], [0], [0], [1], [0, 0, 1, 1], [], []>} : vector<8x640xbf16>, vector<640x128xbf16>, vector<8x128xf32> -> vector<8x128xf32>
    %c0_59 = arith.constant 0 : index
    %c0_60 = arith.constant 0 : index
    %69 = vector.load %arg7[%c0_59, %c0_60] : memref<1x128xf32, #tpu.memory_space<vmem>>, vector<1x128xf32>
    %70 = vector.broadcast %69 : vector<1x128xf32> to vector<8x128xf32>
    %71 = arith.addf %68, %70 : vector<8x128xf32>
    %cst_61 = arith.constant 0.000000e+00 : f32
    %72 = vector.broadcast %cst_61 : f32 to vector<8x128xf32>
    %73 = arith.maximumf %71, %72 : vector<8x128xf32>
    %74 = arith.truncf %73 : vector<8x128xf32> to vector<8x128xbf16>
    %c0_62 = arith.constant 0 : index
    %c0_63 = arith.constant 0 : index
    %75 = vector.load %arg8[%c0_62, %c0_63] : memref<128x128xbf16, #tpu.memory_space<vmem>>, vector<128x128xbf16>
    %cst_64 = arith.constant dense<0.000000e+00> : vector<8x128xf32>
    %76 = tpu.matmul %74, %75, %cst_64 {dimension_numbers = #tpu.dot_dimension_numbers<[1], [0], [0], [1], [0, 0, 1, 1], [], []>} : vector<8x128xbf16>, vector<128x128xbf16>, vector<8x128xf32> -> vector<8x128xf32>
    %c0_65 = arith.constant 0 : index
    %c0_66 = arith.constant 0 : index
    %77 = vector.load %arg9[%c0_65, %c0_66] : memref<1x128xf32, #tpu.memory_space<vmem>>, vector<1x128xf32>
    %78 = vector.broadcast %77 : vector<1x128xf32> to vector<8x128xf32>
    %79 = arith.addf %76, %78 : vector<8x128xf32>
    %cst_67 = arith.constant 0.000000e+00 : f32
    %80 = vector.broadcast %cst_67 : f32 to vector<8x128xf32>
    %81 = arith.maximumf %79, %80 : vector<8x128xf32>
    %82 = arith.truncf %81 : vector<8x128xf32> to vector<8x128xbf16>
    %c0_68 = arith.constant 0 : index
    %c0_69 = arith.constant 0 : index
    %83 = vector.load %arg10[%c0_68, %c0_69] : memref<128x128xbf16, #tpu.memory_space<vmem>>, vector<128x128xbf16>
    %cst_70 = arith.constant dense<0.000000e+00> : vector<8x128xf32>
    %84 = tpu.matmul %82, %83, %cst_70 {dimension_numbers = #tpu.dot_dimension_numbers<[1], [0], [0], [1], [0, 0, 1, 1], [], []>} : vector<8x128xbf16>, vector<128x128xbf16>, vector<8x128xf32> -> vector<8x128xf32>
    %c0_71 = arith.constant 0 : index
    %c0_72 = arith.constant 0 : index
    %85 = vector.load %arg11[%c0_71, %c0_72] : memref<1x128xf32, #tpu.memory_space<vmem>>, vector<1x128xf32>
    %86 = vector.broadcast %85 : vector<1x128xf32> to vector<8x128xf32>
    %87 = arith.addf %84, %86 : vector<8x128xf32>
    %cst_73 = arith.constant dense<0xFF800000> : vector<8xf32>
    %88 = vector.multi_reduction <maximumf>, %87, %cst_73 [1] : vector<8x128xf32> to vector<8xf32>
    %89 = vector.shape_cast %88 : vector<8xf32> to vector<8x1xf32>
    %90 = vector.broadcast %89 : vector<8x1xf32> to vector<8x128xf32>
    %91 = arith.subf %87, %90 : vector<8x128xf32>
    %92 = math.exp %91 : vector<8x128xf32>
    %cst_74 = arith.constant dense<0.000000e+00> : vector<8xf32>
    %93 = vector.multi_reduction <add>, %92, %cst_74 [1] : vector<8x128xf32> to vector<8xf32>
    %94 = vector.shape_cast %93 : vector<8xf32> to vector<8x1xf32>
    %95 = math.log %94 : vector<8x1xf32>
    %96 = vector.broadcast %95 : vector<8x1xf32> to vector<8x128xf32>
    %97 = arith.subf %91, %96 : vector<8x128xf32>
    %c0_75 = arith.constant 0 : index
    %c0_76 = arith.constant 0 : index
    %98 = vector.load %arg12[%c0_75, %c0_76] : memref<8x128xf32, #tpu.memory_space<vmem>>, vector<8x128xf32>
    tpu.vector_store %arg12[%c0_75, %c0_76], %97 {strides = array<i32>} : memref<8x128xf32, #tpu.memory_space<vmem>>, vector<8x128xf32>,
    return
  }
  func.func @transform_0(%arg0: i32) -> (i32, i32) {
    %c0_i32 = arith.constant 0 : i32
    %c0_i32_0 = arith.constant 0 : i32
    return %arg0, %c0_i32 : i32, i32
  }
  func.func @transform_1(%arg0: i32) -> (i32, i32) {
    %c0_i32 = arith.constant 0 : i32
    %c0_i32_0 = arith.constant 0 : i32
    %c0_i32_1 = arith.constant 0 : i32
    return %c0_i32, %c0_i32_0 : i32, i32
  }
  func.func @transform_2(%arg0: i32) -> (i32, i32) {
    %c0_i32 = arith.constant 0 : i32
    %c0_i32_0 = arith.constant 0 : i32
    %c0_i32_1 = arith.constant 0 : i32
    return %c0_i32, %c0_i32_0 : i32, i32
  }
  func.func @transform_3(%arg0: i32) -> (i32, i32) {
    %c0_i32 = arith.constant 0 : i32
    %c0_i32_0 = arith.constant 0 : i32
    %c0_i32_1 = arith.constant 0 : i32
    return %c0_i32, %c0_i32_0 : i32, i32
  }
  func.func @transform_4(%arg0: i32) -> (i32, i32) {
    %c0_i32 = arith.constant 0 : i32
    %c0_i32_0 = arith.constant 0 : i32
    %c0_i32_1 = arith.constant 0 : i32
    return %c0_i32, %c0_i32_0 : i32, i32
  }
  func.func @transform_5(%arg0: i32) -> (i32, i32) {
    %c0_i32 = arith.constant 0 : i32
    %c0_i32_0 = arith.constant 0 : i32
    %c0_i32_1 = arith.constant 0 : i32
    return %c0_i32, %c0_i32_0 : i32, i32
  }
  func.func @transform_6(%arg0: i32) -> (i32, i32) {
    %c0_i32 = arith.constant 0 : i32
    %c0_i32_0 = arith.constant 0 : i32
    %c0_i32_1 = arith.constant 0 : i32
    return %c0_i32, %c0_i32_0 : i32, i32
  }
  func.func @transform_7(%arg0: i32) -> (i32, i32) {
    %c0_i32 = arith.constant 0 : i32
    %c0_i32_0 = arith.constant 0 : i32
    %c0_i32_1 = arith.constant 0 : i32
    return %c0_i32, %c0_i32_0 : i32, i32
  }
  func.func @transform_8(%arg0: i32) -> (i32, i32) {
    %c0_i32 = arith.constant 0 : i32
    %c0_i32_0 = arith.constant 0 : i32
    %c0_i32_1 = arith.constant 0 : i32
    return %c0_i32, %c0_i32_0 : i32, i32
  }
  func.func @transform_9(%arg0: i32) -> (i32, i32) {
    %c0_i32 = arith.constant 0 : i32
    %c0_i32_0 = arith.constant 0 : i32
    %c0_i32_1 = arith.constant 0 : i32
    return %c0_i32, %c0_i32_0 : i32, i32
  }
  func.func @transform_10(%arg0: i32) -> (i32, i32) {
    %c0_i32 = arith.constant 0 : i32
    %c0_i32_0 = arith.constant 0 : i32
    %c0_i32_1 = arith.constant 0 : i32
    return %c0_i32, %c0_i32_0 : i32, i32
  }
  func.func @transform_11(%arg0: i32) -> (i32, i32) {
    %c0_i32 = arith.constant 0 : i32
    %c0_i32_0 = arith.constant 0 : i32
    return %arg0, %c0_i32 : i32, i32
  }
}

</mosaic_0001>

<bundles_post_ra>
// kernel: cnn_cifar_forward.1
= control target key start
LH: loop header
LB: loop body
LE: loop exit
PB: predicated region body
PF: predicated region fallthrough
CT: control target
= control target key end

     0   :  { %s5989_s0 = inlined_call_operand.vmem [shape: f32[256,128], index: 0, kind: input, shape index: {}]   ;;  %s5990_s1 = inlined_call_operand.vmem [shape: bf16[640,256], index: 1, kind: input, shape index: {}]   ;;  %s5991_s2 = inlined_call_operand.vmem [shape: f32[1,256], index: 2, kind: input, shape index: {}]   ;;  %s5992_s3 = inlined_call_operand.vmem [shape: bf16[640,256], index: 3, kind: input, shape index: {}]   ;;  %s5993_s4 = inlined_call_operand.vmem [shape: f32[1,256], index: 4, kind: input, shape index: {}]   ;;  %s5994_s5 = inlined_call_operand.vmem [shape: bf16[640,128], index: 5, kind: input, shape index: {}]   ;;  %s5995_s6 = inlined_call_operand.vmem [shape: f32[1,128], index: 6, kind: input, shape index: {}]   ;;  %s5996_s7 = inlined_call_operand.vmem [shape: bf16[128,128], index: 7, kind: input, shape index: {}]   ;;  %s5997_s8 = inlined_call_operand.vmem [shape: f32[1,128], index: 8, kind: input, shape index: {}]   ;;  %s5998_s9 = inlined_call_operand.vmem [shape: bf16[128,128], index: 9, kind: input, shape index: {}]   ;;  %s5999_s10 = inlined_call_operand.vmem [shape: f32[1,128], index: 10, kind: input, shape index: {}]   ;;  %s6000_s11 = inlined_call_operand.hbm [shape: f32[8,128], index: 11, kind: output, shape index: {}]  }
   0x1   :  { %v3714_v0 = vld [vmem:[%s5990_s1 + $0x74] ss:$8 sps:$4 sm:$0xff]   ;;  %v3716_v1 = vld [vmem:[%s5990_s1 + $0x70] ss:$8 sps:$4 sm:$0xff]   ;;  %v3720_v4 = vld [vmem:[%s5990_s1 + $0x64] ss:$8 sps:$4 sm:$0xff]  }
   0x2   :  { %772 = vmatprep.subr.bf16.mxu0 %v3714_v0  ;;  %v3717_v2 = vld [vmem:[%s5990_s1 + $0x174] ss:$8 sps:$4 sm:$0xff]   ;;  %v3719_v3 = vld [vmem:[%s5990_s1 + $0x170] ss:$8 sps:$4 sm:$0xff]   ;;  %v3722_v5 = vld [vmem:[%s5990_s1 + $0x60] ss:$8 sps:$4 sm:$0xff]  }
   0x3   :  { %773 = vmatpush1.bf16.msra.mxu0 %v3716_v1  ;;  %965 = vmatprep.subr.bf16.mxu1 %v3717_v2  ;;  %v3723_v6 = vld [vmem:[%s5990_s1 + $0x164] ss:$8 sps:$4 sm:$0xff]   ;;  %v3725_v7 = vld [vmem:[%s5990_s1 + $0x160] ss:$8 sps:$4 sm:$0xff]   ;;  %v3726_v8 = vld [vmem:[%s5990_s1 + $0x54] ss:$8 sps:$4 sm:$0xff]  }
   0x4   :  { %966 = vmatpush1.bf16.msra.mxu1 %v3719_v3  ;;  %774 = vmatprep.subr.bf16.mxu0 %v3720_v4  ;;  %v3728_v9 = vld [vmem:[%s5990_s1 + $0x50] ss:$8 sps:$4 sm:$0xff]   ;;  %v3729_v10 = vld [vmem:[%s5990_s1 + $0x154] ss:$8 sps:$4 sm:$0xff]   ;;  %v3732_v11 = vld [vmem:[%s5990_s1 + $0x44] ss:$8 sps:$4 sm:$0xff]  }
   0x5   :  { %967 = vmatprep.subr.bf16.mxu1 %v3723_v6  ;;  %v3731_v12 = vld [vmem:[%s5990_s1 + $0x150] ss:$8 sps:$4 sm:$0xff]   ;;  %v3735_v13 = vld [vmem:[%s5990_s1 + $0x144] ss:$8 sps:$4 sm:$0xff]   ;;  %v3734_v14 = vld [vmem:[%s5990_s1 + $0x40] ss:$8 sps:$4 sm:$0xff]  }
   0x6   :  { %v3738_v15 = vld [vmem:[%s5990_s1 + $0x34] ss:$8 sps:$4 sm:$0xff]   ;;  %v3737_v16 = vld [vmem:[%s5990_s1 + $0x140] ss:$8 sps:$4 sm:$0xff]   ;;  %v3740_v18 = vld [vmem:[%s5990_s1 + $0x30] ss:$8 sps:$4 sm:$0xff]  }
   0x7   :  { %775 = vmatpush1.bf16.msra.mxu0 %v3722_v5  ;;  %v3741_v17 = vld [vmem:[%s5990_s1 + $0x134] ss:$8 sps:$4 sm:$0xff]   ;;  %v3744_v19 = vld [vmem:[%s5990_s1 + $0x24] ss:$8 sps:$4 sm:$0xff]   ;;  %v3743_v20 = vld [vmem:[%s5990_s1 + $0x130] ss:$8 sps:$4 sm:$0xff]  }
   0x8   :  { %776 = vmatprep.subr.bf16.mxu0 %v3726_v8  ;;  %968 = vmatpush1.bf16.msra.mxu1 %v3725_v7  ;;  %v3747_v21 = vld [vmem:[%s5990_s1 + $0x124] ss:$8 sps:$4 sm:$0xff]   ;;  %v3746_v22 = vld [vmem:[%s5990_s1 + $0x20] ss:$8 sps:$4 sm:$0xff]   ;;  %v3750_v23 = vld [vmem:[%s5990_s1 + $0x14] ss:$8 sps:$4 sm:$0xff]  }
   0x9   :  { %969 = vmatprep.subr.bf16.mxu1 %v3729_v10  ;;  %v3749_v24 = vld [vmem:[%s5990_s1 + $0x120] ss:$8 sps:$4 sm:$0xff]   ;;  %v3753_v25 = vld [vmem:[%s5990_s1 + $0x114] ss:$8 sps:$4 sm:$0xff]   ;;  %v3752_v26 = vld [vmem:[%s5990_s1 + $0x10] ss:$8 sps:$4 sm:$0xff]  }
   0xa   :  { %v3756_v27 = vld [vmem:[%s5990_s1 + $0x4] ss:$8 sps:$4 sm:$0xff]   ;;  %v3755_v28 = vld [vmem:[%s5990_s1 + $0x110] ss:$8 sps:$4 sm:$0xff]   ;;  %v3758_v30 = vld [vmem:[%s5990_s1] ss:$8 sps:$4 sm:$0xff]  }
   0xb   :  { %777 = vmatpush1.bf16.msra.mxu0 %v3728_v9  ;;  %v3759_v29 = vld [vmem:[%s5990_s1 + $0x104] ss:$8 sps:$4 sm:$0xff]   ;;  %v3762_v31 = vld [vmem:[%s5990_s1 + $0xf4] ss:$8 sps:$4 sm:$0xff]   ;;  %v3761_v32 = vld [vmem:[%s5990_s1 + $0x100] ss:$8 sps:$4 sm:$0xff]  }
   0xc   :  { %778 = vmatprep.subr.bf16.mxu0 %v3732_v11  ;;  %970 = vmatpush1.bf16.msra.mxu1 %v3731_v12  ;;  %v3765_v33 = vld [vmem:[%s5990_s1 + $0x1f4] ss:$8 sps:$4 sm:$0xff]   ;;  %v3764_v34 = vld [vmem:[%s5990_s1 + $0xf0] ss:$8 sps:$4 sm:$0xff]   ;;  %v3768_v35 = vld [vmem:[%s5990_s1 + $0xe4] ss:$8 sps:$4 sm:$0xff]  }
   0xd   :  { %971 = vmatprep.subr.bf16.mxu1 %v3735_v13  ;;  %v3767_v36 = vld [vmem:[%s5990_s1 + $0x1f0] ss:$8 sps:$4 sm:$0xff]   ;;  %v3771_v37 = vld [vmem:[%s5990_s1 + $0x1e4] ss:$8 sps:$4 sm:$0xff]   ;;  %v3770_v38 = vld [vmem:[%s5990_s1 + $0xe0] ss:$8 sps:$4 sm:$0xff]  }
   0xe   :  { %v3774_v39 = vld [vmem:[%s5990_s1 + $0xd4] ss:$8 sps:$4 sm:$0xff]   ;;  %v3773_v40 = vld [vmem:[%s5990_s1 + $0x1e0] ss:$8 sps:$4 sm:$0xff]   ;;  %v3776_v42 = vld [vmem:[%s5990_s1 + $0xd0] ss:$8 sps:$4 sm:$0xff]  }
   0xf   :  { %779 = vmatpush1.bf16.msra.mxu0 %v3734_v14  ;;  %v3777_v41 = vld [vmem:[%s5990_s1 + $0x1d4] ss:$8 sps:$4 sm:$0xff]   ;;  %v3780_v43 = vld [vmem:[%s5990_s1 + $0xc4] ss:$8 sps:$4 sm:$0xff]   ;;  %v3779_v44 = vld [vmem:[%s5990_s1 + $0x1d0] ss:$8 sps:$4 sm:$0xff]  }
  0x10   :  { %780 = vmatprep.subr.bf16.mxu0 %v3738_v15  ;;  %972 = vmatpush1.bf16.msra.mxu1 %v3737_v16  ;;  %v3783_v45 = vld [vmem:[%s5990_s1 + $0x1c4] ss:$8 sps:$4 sm:$0xff]   ;;  %v3782_v48 = vld [vmem:[%s5990_s1 + $0xc0] ss:$8 sps:$4 sm:$0xff]   ;;  %v3786_v50 = vld [vmem:[%s5990_s1 + $0xb4] ss:$8 sps:$4 sm:$0xff]  }
  0x11   :  { %973 = vmatprep.subr.bf16.mxu1 %v3741_v17  ;;  %v88_v46 = vld [vmem:[%s5989_s0 + $0x1] sm:$0xff]  ;;  %v89_v47 = vld [vmem:[%s5989_s0 + $0x9] sm:$0xff]  ;;  %v3789_v54 = vld [vmem:[%s5990_s1 + $0x1b4] ss:$8 sps:$4 sm:$0xff]  }
  0x12   :  { %v120_v49 = vpack.c.bf16 %v89_v47, %v88_v46  ;;  %v3785_v51 = vld [vmem:[%s5990_s1 + $0x1c0] ss:$8 sps:$4 sm:$0xff]   ;;  %v3788_v56 = vld [vmem:[%s5990_s1 + $0xb0] ss:$8 sps:$4 sm:$0xff]   ;;  %v3792_v57 = vld [vmem:[%s5990_s1 + $0xa4] ss:$8 sps:$4 sm:$0xff]  }
  0x13   :  { %781 = vmatpush1.bf16.msra.mxu0 %v3740_v18  ;;  %v184_v52 = vld [vmem:[%s5989_s0 + $0x3] sm:$0xff]  ;;  %v185_v53 = vld [vmem:[%s5989_s0 + $0xb] sm:$0xff]  ;;  %v3798_v61 = vld [vmem:[%s5990_s1 + $0x94] ss:$8 sps:$4 sm:$0xff]  }
  0x14   :  { %782 = vmatprep.subr.bf16.mxu0 %v3744_v19  ;;  %974 = vmatpush1.bf16.msra.mxu1 %v3743_v20  ;;  %v216_v55 = vpack.c.bf16 %v185_v53, %v184_v52  ;;  %v3791_v58 = vld [vmem:[%s5990_s1 + $0x1b0] ss:$8 sps:$4 sm:$0xff]   ;;  %v3795_v59 = vld [vmem:[%s5990_s1 + $0x1a4] ss:$8 sps:$4 sm:$0xff]   ;;  %v3794_v60 = vld [vmem:[%s5990_s1 + $0xa0] ss:$8 sps:$4 sm:$0xff]  }
  0x15   :  { %975 = vmatprep.subr.bf16.mxu1 %v3747_v21  ;;  %804 = vmatprep.mubr.bf16.mxu0 %v120_v49  ;;  %v3797_v62 = vld [vmem:[%s5990_s1 + $0x1a0] ss:$8 sps:$4 sm:$0xff]   ;;  %v3801_v63 = vld [vmem:[%s5990_s1 + $0x194] ss:$8 sps:$4 sm:$0xff]   ;;  %v3800_v0 = vld [vmem:[%s5990_s1 + $0x90] ss:$8 sps:$4 sm:$0xff]  }
  0x16   :  { %997 = vmatprep.mubr.bf16.mxu1 %v216_v55  ;;  %v3804_v1 = vld [vmem:[%s5990_s1 + $0x84] ss:$8 sps:$4 sm:$0xff]   ;;  %v3803_v2 = vld [vmem:[%s5990_s1 + $0x190] ss:$8 sps:$4 sm:$0xff]   ;;  %v3806_v4 = vld [vmem:[%s5990_s1 + $0x80] ss:$8 sps:$4 sm:$0xff]  }
  0x17   :  { %783 = vmatpush1.bf16.msra.mxu0 %v3746_v22  ;;  %v3807_v3 = vld [vmem:[%s5990_s1 + $0x184] ss:$8 sps:$4 sm:$0xff]   ;;  %v3812_v7 = vld [vmem:[%s5990_s1 + $0x274] ss:$8 sps:$4 sm:$0xff]   ;;  %v3809_v10 = vld [vmem:[%s5990_s1 + $0x180] ss:$8 sps:$4 sm:$0xff]  }
  0x18   :  { %784 = vmatprep.subr.bf16.mxu0 %v3750_v23  ;;  %976 = vmatpush1.bf16.msra.mxu1 %v3749_v24  ;;  %v40_v5 = vld [vmem:[%s5989_s0] sm:$0xff]  ;;  %v41_v6 = vld [vmem:[%s5989_s0 + $0x8] sm:$0xff]  ;;  %v90_v8 = vld [vmem:[%s5989_s0 + $0x11] sm:$0xff] }
  0x19   :  { %977 = vmatprep.subr.bf16.mxu1 %v3753_v25  ;;  %v91_v9 = vld [vmem:[%s5989_s0 + $0x19] sm:$0xff]  ;;  %v136_v11 = vld [vmem:[%s5989_s0 + $0x2] sm:$0xff]  ;;  %v137_v12 = vld [vmem:[%s5989_s0 + $0xa] sm:$0xff]  ;;  %v72_v13 = vpack.c.bf16 %v41_v6, %v40_v5 }
  0x1a   :  { %v186_v14 = vld [vmem:[%s5989_s0 + $0x13] sm:$0xff]  ;;  %v187_v15 = vld [vmem:[%s5989_s0 + $0x1b] sm:$0xff]  ;;  %v121_v17 = vpack.c.bf16 %v91_v9, %v90_v8  ;;  %v168_v18 = vpack.c.bf16 %v137_v12, %v136_v11  ;;  %v3815_v19 = vld [vmem:[%s5990_s1 + $0x264] ss:$8 sps:$4 sm:$0xff]  }
  0x1b   :  { %785 = vmatpush1.bf16.msra.mxu0 %v3752_v26  ;;  %v3810_v16 = vld [vmem:[%s5990_s1 + $0x270] ss:$8 sps:$4 sm:$0xff]   ;;  %v217_v20 = vpack.c.bf16 %v187_v15, %v186_v14  ;;  %v3813_v23 = vld [vmem:[%s5990_s1 + $0x260] ss:$8 sps:$4 sm:$0xff]   ;;  %v3818_v26 = vld [vmem:[%s5990_s1 + $0x254] ss:$8 sps:$4 sm:$0xff]  }
  0x1c   :  { %786 = vmatprep.subr.bf16.mxu0 %v3756_v27  ;;  %978 = vmatpush1.bf16.msra.mxu1 %v3755_v28  ;;  %v42_v21 = vld [vmem:[%s5989_s0 + $0x10] sm:$0xff]  ;;  %v43_v22 = vld [vmem:[%s5989_s0 + $0x18] sm:$0xff]  ;;  %v92_v24 = vld [vmem:[%s5989_s0 + $0x21] sm:$0xff] }
  0x1d   :  { %979 = vmatprep.subr.bf16.mxu1 %v3759_v29  ;;  %v93_v25 = vld [vmem:[%s5989_s0 + $0x29] sm:$0xff]  ;;  %v138_v27 = vld [vmem:[%s5989_s0 + $0x12] sm:$0xff]  ;;  %v139_v28 = vld [vmem:[%s5989_s0 + $0x1a] sm:$0xff]  ;;  %v73_v29 = vpack.c.bf16 %v43_v22, %v42_v21 }
  0x1e   :  { %v190_v46 = vld [vmem:[%s5989_s0 + $0x33] sm:$0xff]  ;;  %v191_v47 = vld [vmem:[%s5989_s0 + $0x3b] sm:$0xff]  ;;  %v49_v5 = vld [vmem:[%s5989_s0 + $0x48] sm:$0xff] }
  0x1f   :  { %787 = vmatpush1.bf16.msra.mxu0 %v3758_v30  ;;  %v188_v30 = vld [vmem:[%s5989_s0 + $0x23] sm:$0xff]  ;;  %v3822_v49 = vld [vmem:[%s5990_s1 + $0x230] ss:$8 sps:$4 sm:$0xff]   ;;  %v219_v52 = vpack.c.bf16 %v191_v47, %v190_v46 }
  0x20   :  { %788 = vmatprep.subr.bf16.mxu0 %v3762_v31  ;;  %980 = vmatpush1.bf16.msra.mxu1 %v3761_v32  ;;  %v189_v31 = vld [vmem:[%s5989_s0 + $0x2b] sm:$0xff]  ;;  %v122_v32 = vpack.c.bf16 %v93_v25, %v92_v24  ;;  %v96_v55 = vld [vmem:[%s5989_s0 + $0x41] sm:$0xff]  ;;  %v99_v9 = vld [vmem:[%s5989_s0 + $0x59] sm:$0xff] }
  0x21   :  { %981 = vmatprep.subr.bf16.mxu1 %v3765_v33  ;;  %v3816_v33 = vld [vmem:[%s5990_s1 + $0x250] ss:$8 sps:$4 sm:$0xff]   ;;  %v3831_v6 = vld [vmem:[%s5990_s1 + $0x200] ss:$8 sps:$4 sm:$0xff]  }
  0x22   :  { %v46_v53 = vld [vmem:[%s5989_s0 + $0x30] sm:$0xff]  ;;  %v195_v14 = vld [vmem:[%s5989_s0 + $0x5b] sm:$0xff]  ;;  %v196_v24 = vld [vmem:[%s5989_s0 + $0x63] sm:$0xff] }
  0x23   :  { %789 = vmatpush2.bf16.msra.mxu0 %v3764_v34  ;;  %v169_v34 = vpack.c.bf16 %v139_v28, %v138_v27  ;;  %v98_v8 = vld [vmem:[%s5989_s0 + $0x51] sm:$0xff]  ;;  %v147_v21 = vld [vmem:[%s5989_s0 + $0x5a] sm:$0xff]  ;;  %v105_v47 = vld [vmem:[%s5989_s0 + $0x89] sm:$0xff] }
  0x24   :  { %790 = vmatprep.subr.bf16.mxu0 %v3768_v35  ;;  %982 = vmatpush2.bf16.msra.mxu1 %v3767_v36  ;;  %v3821_v35 = vld [vmem:[%s5990_s1 + $0x244] ss:$8 sps:$4 sm:$0xff]   ;;  %v218_v36 = vpack.c.bf16 %v189_v31, %v188_v30  ;;  %v125_v15 = vpack.c.bf16 %v99_v9, %v98_v8 }
  0x25   :  { %983 = vmatprep.subr.bf16.mxu1 %v3771_v37  ;;  %v44_v37 = vld [vmem:[%s5989_s0 + $0x20] sm:$0xff]  ;;  %v145_v11 = vld [vmem:[%s5989_s0 + $0x4a] sm:$0xff] }
  0x26   :  { %v100_v22 = vld [vmem:[%s5989_s0 + $0x61] sm:$0xff]  ;;  %v197_v25 = vld [vmem:[%s5989_s0 + $0x6b] sm:$0xff] }
  0x27   :  { %791 = vmatpush2.bf16.msra.mxu0 %v3770_v38  ;;  %v45_v38 = vld [vmem:[%s5989_s0 + $0x28] sm:$0xff]  ;;  %v222_v31 = vpack.c.bf16 %v197_v25, %v196_v24  ;;  %v62_v25 = vld [vmem:[%s5989_s0 + $0xb0] sm:$0xff] }
  0x28   :  { %792 = vmatprep.subr.bf16.mxu0 %v3774_v39  ;;  %984 = vmatpush2.bf16.msra.mxu1 %v3773_v40  ;;  %v140_v39 = vld [vmem:[%s5989_s0 + $0x22] sm:$0xff]  ;;  %v205_v9 = vld [vmem:[%s5989_s0 + $0xab] sm:$0xff] }
  0x29   :  { %985 = vmatprep.subr.bf16.mxu1 %v3777_v41  ;;  %v3819_v40 = vld [vmem:[%s5990_s1 + $0x240] ss:$8 sps:$4 sm:$0xff]   ;;  %v94_v41 = vld [vmem:[%s5989_s0 + $0x31] sm:$0xff] }
  0x2a   :  { %v53_v30 = vld [vmem:[%s5989_s0 + $0x68] sm:$0xff] }
  0x2b   :  { %793 = vmatpush2.bf16.msra.mxu0 %v3776_v42  ;;  %v95_v42 = vld [vmem:[%s5989_s0 + $0x39] sm:$0xff]  ;;  %v104_v46 = vld [vmem:[%s5989_s0 + $0x81] sm:$0xff] }
  0x2c   :  { %794 = vmatprep.subr.bf16.mxu0 %v3780_v43  ;;  %986 = vmatpush2.bf16.msra.mxu1 %v3779_v44  ;;  %v3824_v43 = vld [vmem:[%s5990_s1 + $0x234] ss:$8 sps:$4 sm:$0xff]   ;;  %v141_v44 = vld [vmem:[%s5989_s0 + $0x2a] sm:$0xff] }
  0x2d   :  { %987 = vmatprep.subr.bf16.mxu1 %v3783_v45  ;;  %v74_v45 = vpack.c.bf16 %v45_v38, %v44_v37  ;;  %v199_v37 = vld [vmem:[%s5989_s0 + $0x7b] sm:$0xff]  ;;  %v204_v8 = vld [vmem:[%s5989_s0 + $0xa3] sm:$0xff] }
  0x2f   :  { %795 = vmatpush2.bf16.msra.mxu0 %v3782_v48  ;;  %v123_v48 = vpack.c.bf16 %v95_v42, %v94_v41  ;;  %v54_v41 = vld [vmem:[%s5989_s0 + $0x70] sm:$0xff]  ;;  %v55_v42 = vld [vmem:[%s5989_s0 + $0x78] sm:$0xff] }
  0x30   :  { %796 = vmatprep.subr.bf16.mxu0 %v3786_v50  ;;  %988 = vmatpush2.bf16.msra.mxu1 %v3785_v51  ;;  %v170_v50 = vpack.c.bf16 %v141_v44, %v140_v39  ;;  %v3827_v51 = vld [vmem:[%s5990_s1 + $0x224] ss:$8 sps:$4 sm:$0xff]   ;;  %v150_v44 = vld [vmem:[%s5989_s0 + $0x72] sm:$0xff] }
  0x31   :  { %989 = vmatprep.subr.bf16.mxu1 %v3789_v54  ;;  %v47_v54 = vld [vmem:[%s5989_s0 + $0x38] sm:$0xff] }
  0x33   :  { %797 = vmatpush2.bf16.msra.mxu0 %v3788_v56  ;;  %v3825_v56 = vld [vmem:[%s5990_s1 + $0x220] ss:$8 sps:$4 sm:$0xff]  }
  0x34   :  { %798 = vmatprep.subr.bf16.mxu0 %v3792_v57  ;;  %990 = vmatpush2.bf16.msra.mxu1 %v3791_v58  ;;  %v97_v57 = vld [vmem:[%s5989_s0 + $0x49] sm:$0xff]  ;;  %v142_v58 = vld [vmem:[%s5989_s0 + $0x32] sm:$0xff] }
  0x35   :  { %991 = vmatprep.subr.bf16.mxu1 %v3795_v59  ;;  %v143_v59 = vld [vmem:[%s5989_s0 + $0x3a] sm:$0xff] }
  0x37   :  { %799 = vmatpush2.bf16.msra.mxu0 %v3794_v60  ;;  %v3830_v60 = vld [vmem:[%s5990_s1 + $0x214] ss:$8 sps:$4 sm:$0xff]  }
  0x38   :  { %800 = vmatprep.subr.bf16.mxu0 %v3798_v61  ;;  %992 = vmatpush2.bf16.msra.mxu1 %v3797_v62  ;;  %v75_v61 = vpack.c.bf16 %v47_v54, %v46_v53  ;;  %v192_v62 = vld [vmem:[%s5989_s0 + $0x43] sm:$0xff] }
  0x39   :  { %993 = vmatprep.subr.bf16.mxu1 %v3801_v63  ;;  %v193_v63 = vld [vmem:[%s5989_s0 + $0x4b] sm:$0xff]  ;;  %v56_v53 = vld [vmem:[%s5989_s0 + $0x80] sm:$0xff] }
  0x3a   :  { %v57_v54 = vld [vmem:[%s5989_s0 + $0x88] sm:$0xff] }
  0x3b   :  { %801 = vmatpush2.bf16.msra.mxu0 %v3800_v0  ;;  %v124_v0 = vpack.c.bf16 %v97_v57, %v96_v55  ;;  %v152_v57 = vld [vmem:[%s5989_s0 + $0x82] sm:$0xff] }
  0x3c   :  { %802 = vmatprep.subr.bf16.mxu0 %v3804_v1  ;;  %994 = vmatpush2.bf16.msra.mxu1 %v3803_v2  ;;  %v3828_v1 = vld [vmem:[%s5990_s1 + $0x210] ss:$8 sps:$4 sm:$0xff]   ;;  %v171_v2 = vpack.c.bf16 %v143_v59, %v142_v58 }
  0x3d   :  { %995 = vmatprep.subr.bf16.mxu1 %v3807_v3  ;;  %v220_v3 = vpack.c.bf16 %v193_v63, %v192_v62  ;;  %v153_v58 = vld [vmem:[%s5989_s0 + $0x8a] sm:$0xff]  ;;  %v107_v59 = vld [vmem:[%s5989_s0 + $0x99] sm:$0xff]  ;;  %v80_v62 = vpack.c.bf16 %v57_v54, %v56_v53 }
  0x3e   :  { %v117_v53 = vld [vmem:[%s5989_s0 + $0xe9] sm:$0xff]  ;;  %v162_v54 = vld [vmem:[%s5989_s0 + $0xd2] sm:$0xff] }
  0x3f   :  { %803 = vmatpush2.bf16.msra.mxu0 %v3806_v4  ;;  %v48_v4 = vld [vmem:[%s5989_s0 + $0x40] sm:$0xff] }
  0x40   :  { %1158 = vmatprep.subr.bf16.mxu0 %v3812_v7  ;;  %996 = vmatpush2.bf16.msra.mxu1 %v3809_v10  ;;  %v3833_v7 = vld [vmem:[%s5990_s1 + $0x204] ss:$8 sps:$4 sm:$0xff]   ;;  %v76_v12 = vpack.c.bf16 %v49_v5, %v48_v4 }
  0x41   :  { %v144_v10 = vld [vmem:[%s5989_s0 + $0x42] sm:$0xff] }
  0x42   :  { %805 = vmatmul.mubr.bf16.vlgmr.msra.gmra.mxu0 %v72_v13  ;;  %v194_v13 = vld [vmem:[%s5989_s0 + $0x53] sm:$0xff]  ;;  %v108_v4 = vld [vmem:[%s5989_s0 + $0xa1] sm:$0xff]  ;;  %v109_v5 = vld [vmem:[%s5989_s0 + $0xa9] sm:$0xff] }
  0x43   :  { %1159 = vmatpush1.bf16.msra.mxu0 %v3810_v16  ;;  %814 = vmatprep.mubr.bf16.mxu0 %v121_v17  ;;  %v172_v16 = vpack.c.bf16 %v145_v11, %v144_v10  ;;  %v221_v17 = vpack.c.bf16 %v195_v14, %v194_v13  ;;  %v130_v11 = vpack.c.bf16 %v109_v5, %v108_v4  ;;  %v60_v13 = vld [vmem:[%s5989_s0 + $0xa0] sm:$0xff]  ;;  %v61_v14 = vld [vmem:[%s5989_s0 + $0xa8] sm:$0xff] }
  0x44   :  { %998 = vmatmul.mubr.bf16.vlgmr.msra.gmra.mxu1 %v168_v18  ;;  %1160 = vmatprep.subr.bf16.mxu0 %v3815_v19  ;;  %v50_v18 = vld [vmem:[%s5989_s0 + $0x50] sm:$0xff]  ;;  %v51_v19 = vld [vmem:[%s5989_s0 + $0x58] sm:$0xff] }
  0x45   :  { %1007 = vmatprep.mubr.bf16.mxu1 %v217_v20  ;;  %v146_v20 = vld [vmem:[%s5989_s0 + $0x52] sm:$0xff] }
  0x46   :  { %v173_v28 = vpack.c.bf16 %v147_v21, %v146_v20  ;;  %v206_v20 = vld [vmem:[%s5989_s0 + $0xb3] sm:$0xff]  ;;  %v207_v21 = vld [vmem:[%s5989_s0 + $0xbb] sm:$0xff] }
  0x47   :  { %1161 = vmatpush1.bf16.msra.mxu0 %v3813_v23  ;;  %v101_v23 = vld [vmem:[%s5989_s0 + $0x69] sm:$0xff] }
  0x48   :  { %1162 = vmatprep.subr.bf16.mxu0 %v3818_v26  ;;  %v77_v26 = vpack.c.bf16 %v51_v19, %v50_v18  ;;  %v126_v27 = vpack.c.bf16 %v101_v23, %v100_v22  ;;  %v156_v18 = vld [vmem:[%s5989_s0 + $0xa2] sm:$0xff]  ;;  %v157_v19 = vld [vmem:[%s5989_s0 + $0xaa] sm:$0xff]  ;;  %v82_v22 = vpack.c.bf16 %v61_v14, %v60_v13 }
  0x49   :  { %v178_v24 = vpack.c.bf16 %v157_v19, %v156_v18 }
  0x4a   :  { %815 = vmatmul.mubr.bf16.gmra.mxu0 %v73_v29  ;;  %v52_v29 = vld [vmem:[%s5989_s0 + $0x60] sm:$0xff] }
  0x4b   :  { %824 = vmatprep.mubr.bf16.mxu0 %v122_v32  ;;  %1163 = vmatpush1.bf16.msra.mxu0 %v3816_v33  ;;  %v148_v32 = vld [vmem:[%s5989_s0 + $0x62] sm:$0xff]  ;;  %v149_v33 = vld [vmem:[%s5989_s0 + $0x6a] sm:$0xff]  ;;  %v78_v38 = vpack.c.bf16 %v53_v30, %v52_v29  ;;  %v158_v30 = vld [vmem:[%s5989_s0 + $0xb2] sm:$0xff] }
  0x4c   :  { %1008 = vmatmul.mubr.bf16.gmra.mxu1 %v169_v34  ;;  %1164 = vmatprep.subr.bf16.mxu0 %v3821_v35  ;;  %v102_v34 = vld [vmem:[%s5989_s0 + $0x71] sm:$0xff]  ;;  %v103_v35 = vld [vmem:[%s5989_s0 + $0x79] sm:$0xff]  ;;  %v113_v29 = vld [vmem:[%s5989_s0 + $0xc9] sm:$0xff] }
  0x4d   :  { %1017 = vmatprep.mubr.bf16.mxu1 %v218_v36  ;;  %v198_v36 = vld [vmem:[%s5989_s0 + $0x73] sm:$0xff]  ;;  %v127_v39 = vpack.c.bf16 %v103_v35, %v102_v34 }
  0x4f   :  { %1165 = vmatpush1.bf16.msra.mxu0 %v3819_v40  ;;  %v174_v40 = vpack.c.bf16 %v149_v33, %v148_v32  ;;  %v208_v32 = vld [vmem:[%s5989_s0 + $0xc3] sm:$0xff]  ;;  %v209_v33 = vld [vmem:[%s5989_s0 + $0xcb] sm:$0xff] }
  0x50   :  { %1166 = vmatprep.subr.bf16.mxu0 %v3824_v43  ;;  %v223_v43 = vpack.c.bf16 %v199_v37, %v198_v36  ;;  %v64_v37 = vld [vmem:[%s5989_s0 + $0xc0] sm:$0xff] }
  0x52   :  { %825 = vmatmul.mubr.bf16.gmra.mxu0 %v74_v45  ;;  %v151_v45 = vld [vmem:[%s5989_s0 + $0x7a] sm:$0xff] }
  0x53   :  { %834 = vmatprep.mubr.bf16.mxu0 %v123_v48  ;;  %1167 = vmatpush1.bf16.msra.mxu0 %v3822_v49  ;;  %v200_v48 = vld [vmem:[%s5989_s0 + $0x83] sm:$0xff]  ;;  %v201_v49 = vld [vmem:[%s5989_s0 + $0x8b] sm:$0xff] }
  0x54   :  { %1018 = vmatmul.mubr.bf16.gmra.mxu1 %v170_v50  ;;  %1168 = vmatprep.subr.bf16.mxu0 %v3827_v51  ;;  %v79_v50 = vpack.c.bf16 %v55_v42, %v54_v41  ;;  %v128_v51 = vpack.c.bf16 %v105_v47, %v104_v46  ;;  %v224_v55 = vpack.c.bf16 %v201_v49, %v200_v48  ;;  %v115_v41 = vld [vmem:[%s5989_s0 + $0xd9] sm:$0xff]  ;;  %v160_v42 = vld [vmem:[%s5989_s0 + $0xc2] sm:$0xff]  ;;  %v66_v49 = vld [vmem:[%s5989_s0 + $0xd0] sm:$0xff] }
  0x55   :  { %1027 = vmatprep.mubr.bf16.mxu1 %v219_v52  ;;  %v175_v52 = vpack.c.bf16 %v151_v45, %v150_v44  ;;  %v210_v44 = vld [vmem:[%s5989_s0 + $0xd3] sm:$0xff]  ;;  %v211_v45 = vld [vmem:[%s5989_s0 + $0xdb] sm:$0xff] }
  0x57   :  { %1169 = vmatpush1.bf16.msra.mxu0 %v3825_v56  ;;  %v106_v56 = vld [vmem:[%s5989_s0 + $0x91] sm:$0xff] }
  0x58   :  { %1170 = vmatprep.subr.bf16.mxu0 %v3830_v60  ;;  %v202_v60 = vld [vmem:[%s5989_s0 + $0x93] sm:$0xff]  ;;  %v129_v63 = vpack.c.bf16 %v107_v59, %v106_v56  ;;  %v212_v56 = vld [vmem:[%s5989_s0 + $0xe3] sm:$0xff] }
  0x5a   :  { %835 = vmatmul.mubr.bf16.gmra.mxu0 %v75_v61  ;;  %v203_v61 = vld [vmem:[%s5989_s0 + $0x9b] sm:$0xff] }
  0x5b   :  { %844 = vmatprep.mubr.bf16.mxu0 %v124_v0  ;;  %1171 = vmatpush1.bf16.msra.mxu0 %v3828_v1  ;;  %v176_v0 = vpack.c.bf16 %v153_v58, %v152_v57  ;;  %v58_v1 = vld [vmem:[%s5989_s0 + $0x90] sm:$0xff] }
  0x5c   :  { %1028 = vmatmul.mubr.bf16.gmra.mxu1 %v171_v2  ;;  %1172 = vmatprep.subr.bf16.mxu0 %v3833_v7  ;;  %v59_v2 = vld [vmem:[%s5989_s0 + $0x98] sm:$0xff]  ;;  %v213_v57 = vld [vmem:[%s5989_s0 + $0xeb] sm:$0xff] }
  0x5d   :  { %1037 = vmatprep.mubr.bf16.mxu1 %v220_v3  ;;  %v225_v3 = vpack.c.bf16 %v203_v61, %v202_v60  ;;  %v155_v7 = vld [vmem:[%s5989_s0 + $0x9a] sm:$0xff]  ;;  %v81_v10 = vpack.c.bf16 %v59_v2, %v58_v1  ;;  %v230_v61 = vpack.c.bf16 %v213_v57, %v212_v56 }
  0x5f   :  { %1173 = vmatpush1.bf16.msra.mxu0 %v3831_v6  ;;  %v154_v6 = vld [vmem:[%s5989_s0 + $0x92] sm:$0xff] }
  0x62   :  { %845 = vmatmul.mubr.bf16.gmra.mxu0 %v76_v12  ;;  %v177_v12 = vpack.c.bf16 %v155_v7, %v154_v6 }
  0x63   :  { %854 = vmatprep.mubr.bf16.mxu0 %v125_v15  ;;  %v226_v15 = vpack.c.bf16 %v205_v9, %v204_v8 }
  0x64   :  { %1038 = vmatmul.mubr.bf16.gmra.mxu1 %v172_v16  ;;  %v110_v16 = vld [vmem:[%s5989_s0 + $0xb1] sm:$0xff] }
  0x65   :  { %1047 = vmatprep.mubr.bf16.mxu1 %v221_v17  ;;  %v111_v17 = vld [vmem:[%s5989_s0 + $0xb9] sm:$0xff] }
  0x66   :  { %v131_v23 = vpack.c.bf16 %v111_v17, %v110_v16 }
  0x6a   :  { %855 = vmatmul.mubr.bf16.gmra.mxu0 %v77_v26  ;;  %v63_v26 = vld [vmem:[%s5989_s0 + $0xb8] sm:$0xff] }
  0x6b   :  { %864 = vmatprep.mubr.bf16.mxu0 %v126_v27  ;;  %v227_v27 = vpack.c.bf16 %v207_v21, %v206_v20  ;;  %v83_v34 = vpack.c.bf16 %v63_v26, %v62_v25 }
  0x6c   :  { %1048 = vmatmul.mubr.bf16.gmra.mxu1 %v173_v28  ;;  %v112_v28 = vld [vmem:[%s5989_s0 + $0xc1] sm:$0xff] }
  0x6d   :  { %1057 = vmatprep.mubr.bf16.mxu1 %v222_v31  ;;  %v159_v31 = vld [vmem:[%s5989_s0 + $0xba] sm:$0xff]  ;;  %v132_v35 = vpack.c.bf16 %v113_v29, %v112_v28 }
  0x6e   :  { %v179_v36 = vpack.c.bf16 %v159_v31, %v158_v30 }
  0x72   :  { %865 = vmatmul.mubr.bf16.gmra.mxu0 %v78_v38  ;;  %v65_v38 = vld [vmem:[%s5989_s0 + $0xc8] sm:$0xff] }
  0x73   :  { %874 = vmatprep.mubr.bf16.mxu0 %v127_v39  ;;  %v228_v39 = vpack.c.bf16 %v209_v33, %v208_v32  ;;  %v84_v46 = vpack.c.bf16 %v65_v38, %v64_v37 }
  0x74   :  { %1058 = vmatmul.mubr.bf16.gmra.mxu1 %v174_v40  ;;  %v114_v40 = vld [vmem:[%s5989_s0 + $0xd1] sm:$0xff] }
  0x75   :  { %1067 = vmatprep.mubr.bf16.mxu1 %v223_v43  ;;  %v161_v43 = vld [vmem:[%s5989_s0 + $0xca] sm:$0xff]  ;;  %v133_v47 = vpack.c.bf16 %v115_v41, %v114_v40 }
  0x76   :  { %v180_v48 = vpack.c.bf16 %v161_v43, %v160_v42 }
  0x7a   :  { %875 = vmatmul.mubr.bf16.gmra.mxu0 %v79_v50  ;;  %v67_v50 = vld [vmem:[%s5989_s0 + $0xd8] sm:$0xff] }
  0x7b   :  { %884 = vmatprep.mubr.bf16.mxu0 %v128_v51  ;;  %v229_v51 = vpack.c.bf16 %v211_v45, %v210_v44  ;;  %v85_v58 = vpack.c.bf16 %v67_v50, %v66_v49 }
  0x7c   :  { %1068 = vmatmul.mubr.bf16.gmra.mxu1 %v175_v52  ;;  %v116_v52 = vld [vmem:[%s5989_s0 + $0xe1] sm:$0xff] }
  0x7d   :  { %1077 = vmatprep.mubr.bf16.mxu1 %v224_v55  ;;  %v163_v55 = vld [vmem:[%s5989_s0 + $0xda] sm:$0xff]  ;;  %v134_v59 = vpack.c.bf16 %v117_v53, %v116_v52 }
  0x7e   :  { %v181_v60 = vpack.c.bf16 %v163_v55, %v162_v54 }
  0x82   :  { %885 = vmatmul.mubr.bf16.gmra.mxu0 %v80_v62 }
  0x83   :  { %894 = vmatprep.mubr.bf16.mxu0 %v129_v63 }
  0x84   :  { %1078 = vmatmul.mubr.bf16.gmra.mxu1 %v176_v0 }
  0x85   :  { %1087 = vmatprep.mubr.bf16.mxu1 %v225_v3 }
  0x8a   :  { %895 = vmatmul.mubr.bf16.gmra.mxu0 %v81_v10 }
  0x8b   :  { %904 = vmatprep.mubr.bf16.mxu0 %v130_v11 }
  0x8c   :  { %1088 = vmatmul.mubr.bf16.gmra.mxu1 %v177_v12 }
  0x8d   :  { %1097 = vmatprep.mubr.bf16.mxu1 %v226_v15 }
  0x92   :  { %905 = vmatmul.mubr.bf16.gmra.mxu0 %v82_v22 }
  0x93   :  { %914 = vmatprep.mubr.bf16.mxu0 %v131_v23 }
  0x94   :  { %1098 = vmatmul.mubr.bf16.gmra.mxu1 %v178_v24 }
  0x95   :  { %1107 = vmatprep.mubr.bf16.mxu1 %v227_v27 }
  0x9a   :  { %915 = vmatmul.mubr.bf16.gmra.mxu0 %v83_v34 }
  0x9b   :  { %924 = vmatprep.mubr.bf16.mxu0 %v132_v35 }
  0x9c   :  { %1108 = vmatmul.mubr.bf16.gmra.mxu1 %v179_v36 }
  0x9d   :  { %1117 = vmatprep.mubr.bf16.mxu1 %v228_v39 }
  0xa2   :  { %925 = vmatmul.mubr.bf16.gmra.mxu0 %v84_v46 }
  0xa3   :  { %934 = vmatprep.mubr.bf16.mxu0 %v133_v47 }
  0xa4   :  { %1118 = vmatmul.mubr.bf16.gmra.mxu1 %v180_v48 }
  0xa5   :  { %1127 = vmatprep.mubr.bf16.mxu1 %v229_v51 }
  0xaa   :  { %935 = vmatmul.mubr.bf16.gmra.mxu0 %v85_v58 }
  0xab   :  { %16 = vsyncpa [#allocation7], 0  ;;  %944 = vmatprep.mubr.bf16.mxu0 %v134_v59  ;;  %v68_v62 = vld [vmem:[%s5989_s0 + $0xe0] sm:$0xff]  ;;  %v69_v63 = vld [vmem:[%s5989_s0 + $0xe8] sm:$0xff]  ;;  %v6001_v16 = vmov 0   ;;  %vm4038_vm0 = vmmov 0  }
  0xac   :  { %1128 = vmatmul.mubr.bf16.gmra.mxu1 %v181_v60  ;;  %v118_v0 = vld [vmem:[%s5989_s0 + $0xf1] sm:$0xff]  ;;  %v119_v1 = vld [vmem:[%s5989_s0 + $0xf9] sm:$0xf]  ;;  %v164_v2 = vld [vmem:[%s5989_s0 + $0xe2] sm:$0xff]  ;;  %v86_v4 = vpack.c.bf16 %v69_v63, %v68_v62 }
  0xad   :  { %1137 = vmatprep.mubr.bf16.mxu1 %v230_v61  ;;  %v165_v3 = vld [vmem:[%s5989_s0 + $0xea] sm:$0xff]  ;;  %v214_v5 = vld [vmem:[%s5989_s0 + $0xf3] sm:$0xff]  ;;  %v215_v6 = vld [vmem:[%s5989_s0 + $0xfb] sm:$0xf]  ;;  %v135_v7 = vpack.c.bf16 %v119_v1, %v118_v0 }
  0xae   :  { %v182_v8 = vpack.c.bf16 %v165_v3, %v164_v2  ;;  %v231_v9 = vpack.c.bf16 %v215_v6, %v214_v5  ;;  %v70_v10 = vld [vmem:[%s5989_s0 + $0xf0] sm:$0xff]  ;;  %v71_v11 = vld [vmem:[%s5989_s0 + $0xf8] sm:$0xf]  ;;  %v232_v17 = vld [vmem:[%s5989_s0 + $0x4] sm:$0xff] }
  0xaf   :  { %v166_v12 = vld [vmem:[%s5989_s0 + $0xf2] sm:$0xff]  ;;  %v167_v13 = vld [vmem:[%s5989_s0 + $0xfa] sm:$0xf]  ;;  %v87_v14 = vpack.c.bf16 %v71_v11, %v70_v10  ;;  %v236_v23 = vld [vmem:[%s5989_s0 + $0x24] sm:$0xff] }
  0xb0   :  { %v183_v15 = vpack.c.bf16 %v167_v13, %v166_v12  ;;  %v233_v18 = vld [vmem:[%s5989_s0 + $0xc] sm:$0xff]  ;;  %v234_v20 = vld [vmem:[%s5989_s0 + $0x14] sm:$0xff]  ;;  %v235_v21 = vld [vmem:[%s5989_s0 + $0x1c] sm:$0xff] }
  0xb1   :  { %v264_v19 = vpack.c.bf16 %v233_v18, %v232_v17  ;;  %v265_v22 = vpack.c.bf16 %v235_v21, %v234_v20  ;;  %v237_v24 = vld [vmem:[%s5989_s0 + $0x2c] sm:$0xff]  ;;  %v238_v26 = vld [vmem:[%s5989_s0 + $0x34] sm:$0xff]  ;;  %v239_v27 = vld [vmem:[%s5989_s0 + $0x3c] sm:$0xff] }
  0xb2   :  { %945 = vmatmul.mubr.bf16.gmra.mxu0 %v86_v4  ;;  %v266_v25 = vpack.c.bf16 %v237_v24, %v236_v23  ;;  %v267_v28 = vpack.c.bf16 %v239_v27, %v238_v26  ;;  %v240_v29 = vld [vmem:[%s5989_s0 + $0x44] sm:$0xff]  ;;  %v241_v30 = vld [vmem:[%s5989_s0 + $0x4c] sm:$0xff]  ;;  %v242_v32 = vld [vmem:[%s5989_s0 + $0x54] sm:$0xff] }
  0xb3   :  { %954 = vmatprep.mubr.bf16.mxu0 %v135_v7  ;;  %v268_v31 = vpack.c.bf16 %v241_v30, %v240_v29  ;;  %v243_v33 = vld [vmem:[%s5989_s0 + $0x5c] sm:$0xff]  ;;  %v3834_v34 = vld [vmem:[%s5992_s3 + $0x70] ss:$8 sps:$4 sm:$0xff]   ;;  %v244_v37 = vld [vmem:[%s5989_s0 + $0x64] sm:$0xff] }
  0xb4   :  { %1138 = vmatmul.mubr.bf16.gmra.mxu1 %v182_v8  ;;  %v3836_v35 = vld [vmem:[%s5992_s3 + $0x74] ss:$8 sps:$4 sm:$0xff]   ;;  %v269_v36 = vpack.c.bf16 %v243_v33, %v242_v32  ;;  %v245_v38 = vld [vmem:[%s5989_s0 + $0x6c] sm:$0xff]  ;;  %v3837_v39 = vld [vmem:[%s5992_s3 + $0x60] ss:$8 sps:$4 sm:$0xff]  }
  0xb5   :  { %1147 = vmatprep.mubr.bf16.mxu1 %v231_v9  ;;  %2187 = vmatprep.subr.bf16.mxu1 %v3836_v35  ;;  %v3839_v40 = vld [vmem:[%s5992_s3 + $0x64] ss:$8 sps:$4 sm:$0xff]   ;;  %v270_v41 = vpack.c.bf16 %v245_v38, %v244_v37  ;;  %v246_v42 = vld [vmem:[%s5989_s0 + $0x74] sm:$0xff]  ;;  %v247_v43 = vld [vmem:[%s5989_s0 + $0x7c] sm:$0xff] }
  0xb6   :  { %2188 = vmatpush1.bf16.msra.mxu1 %v3834_v34  ;;  %v3840_v44 = vld [vmem:[%s5992_s3 + $0x50] ss:$8 sps:$4 sm:$0xff]   ;;  %v3842_v45 = vld [vmem:[%s5992_s3 + $0x54] ss:$8 sps:$4 sm:$0xff]   ;;  %v271_v46 = vpack.c.bf16 %v247_v43, %v246_v42  ;;  %v248_v47 = vld [vmem:[%s5989_s0 + $0x84] sm:$0xff] }
  0xb7   :  { %2189 = vmatprep.subr.bf16.mxu1 %v3839_v40  ;;  %v249_v48 = vld [vmem:[%s5989_s0 + $0x8c] sm:$0xff]  ;;  %v3843_v49 = vld [vmem:[%s5992_s3 + $0x40] ss:$8 sps:$4 sm:$0xff]   ;;  %v3848_v53 = vld [vmem:[%s5992_s3 + $0x34] ss:$8 sps:$4 sm:$0xff]  }
  0xb8   :  { %v3845_v50 = vld [vmem:[%s5992_s3 + $0x44] ss:$8 sps:$4 sm:$0xff]   ;;  %v272_v51 = vpack.c.bf16 %v249_v48, %v248_v47  ;;  %v250_v54 = vld [vmem:[%s5989_s0 + $0x94] sm:$0xff]  ;;  %v251_v55 = vld [vmem:[%s5989_s0 + $0x9c] sm:$0xff] }
  0xb9   :  { %v3846_v56 = vld [vmem:[%s5992_s3 + $0x30] ss:$8 sps:$4 sm:$0xff]   ;;  %v273_v61 = vpack.c.bf16 %v251_v55, %v250_v54  ;;  %v3851_v62 = vld [vmem:[%s5992_s3 + $0x24] ss:$8 sps:$4 sm:$0xff]   ;;  %v3849_v63 = vld [vmem:[%s5992_s3 + $0x20] ss:$8 sps:$4 sm:$0xff]  }
  0xba   :  { %955 = vmatmul.mubr.bf16.gmra.mxu0 %v87_v14  ;;  %2190 = vmatpush1.bf16.msra.mxu1 %v3837_v39  ;;  %v3854_v3 = vld [vmem:[%s5992_s3 + $0x14] ss:$8 sps:$4 sm:$0xff]   ;;  %v252_v5 = vld [vmem:[%s5989_s0 + $0xa4] sm:$0xff]  ;;  %v253_v6 = vld [vmem:[%s5989_s0 + $0xac] sm:$0xff] }
  0xbb   :  { %1190 = vmatprep.mubr.bf16.mxu0 %v6001_v16  ;;  %2191 = vmatprep.subr.bf16.mxu1 %v3842_v45  ;;  %v3852_v7 = vld [vmem:[%s5992_s3 + $0x10] ss:$8 sps:$4 sm:$0xff]   ;;  %v274_v10 = vpack.c.bf16 %v253_v6, %v252_v5  ;;  %v3857_v11 = vld [vmem:[%s5992_s3 + $0x4] ss:$8 sps:$4 sm:$0xff]   ;;  %v3855_v13 = vld [vmem:[%s5992_s3] ss:$8 sps:$4 sm:$0xff]  }
  0xbc   :  { %1148 = vmatmul.mubr.bf16.gmra.mxu1 %v183_v15  ;;  %v3860_v15 = vld [vmem:[%s5992_s3 + $0x274] ss:$8 sps:$4 sm:$0xff]   ;;  %v3858_v18 = vld [vmem:[%s5992_s3 + $0x270] ss:$8 sps:$4 sm:$0xff]   ;;  %v3869_v29 = vld [vmem:[%s5992_s3 + $0xe4] ss:$8 sps:$4 sm:$0xff]  }
  0xbd   :  { %v254_v21 = vld [vmem:[%s5989_s0 + $0xb4] sm:$0xff]  ;;  %2413 = vmatprep.subr.bf16.mxu0 %v3860_v15  ;;  %v256_v38 = vld [vmem:[%s5989_s0 + $0xc4] sm:$0xff]  ;;  %v257_v39 = vld [vmem:[%s5989_s0 + $0xcc] sm:$0xff] }
  0xbe   :  { %2192 = vmatpush1.bf16.msra.mxu1 %v3840_v44  ;;  %v3861_v23 = vld [vmem:[%s5992_s3 + $0xf0] ss:$8 sps:$4 sm:$0xff]   ;;  %v3872_v33 = vld [vmem:[%s5992_s3 + $0x254] ss:$8 sps:$4 sm:$0xff]   ;;  %v3878_v42 = vld [vmem:[%s5992_s3 + $0x244] ss:$8 sps:$4 sm:$0xff]   ;;  %v276_v44 = vpack.c.bf16 %v257_v39, %v256_v38 }
  0xbf   :  { %2193 = vmatprep.subr.bf16.mxu1 %v3845_v50  ;;  %v3870_v35 = vld [vmem:[%s5992_s3 + $0x250] ss:$8 sps:$4 sm:$0xff]   ;;  %v3876_v45 = vld [vmem:[%s5992_s3 + $0x240] ss:$8 sps:$4 sm:$0xff]   ;;  %v3884_v50 = vld [vmem:[%s5992_s3 + $0x234] ss:$8 sps:$4 sm:$0xff]  }
  0xc0   :  { %v3873_v40 = vld [vmem:[%s5992_s3 + $0xd0] ss:$8 sps:$4 sm:$0xff]   ;;  %v3879_v48 = vld [vmem:[%s5992_s3 + $0xc0] ss:$8 sps:$4 sm:$0xff]   ;;  %v3887_v54 = vld [vmem:[%s5992_s3 + $0xb4] ss:$8 sps:$4 sm:$0xff]  }
  0xc1   :  { %v3905_v38 = vld [vmem:[%s5992_s3 + $0x84] ss:$8 sps:$4 sm:$0xff]  }
  0xc2   :  { %1191 = vmatmul.mubr.bf16.vlgmr.msra.gmra.mxu0 %v264_v19  ;;  %2194 = vmatpush1.bf16.msra.mxu1 %v3843_v49  ;;  %v3863_v19 = vld [vmem:[%s5992_s3 + $0xf4] ss:$8 sps:$4 sm:$0xff]  }
  0xc3   :  { %1200 = vmatprep.mubr.bf16.mxu0 %v6001_v16  ;;  %2195 = vmatprep.subr.bf16.mxu1 %v3848_v53  ;;  %v3882_v53 = vld [vmem:[%s5992_s3 + $0x230] ss:$8 sps:$4 sm:$0xff]  }
  0xc4   :  { %2414 = vmatpush1.bf16.msra.mxu0 %v3858_v18  ;;  %v3896_v18 = vld [vmem:[%s5992_s3 + $0x214] ss:$8 sps:$4 sm:$0xff]  }
  0xc6   :  { %2196 = vmatpush1.bf16.msra.mxu1 %v3846_v56  ;;  %v258_v56 = vld [vmem:[%s5989_s0 + $0xd4] sm:$0xff] }
  0xc7   :  { %2197 = vmatprep.subr.bf16.mxu1 %v3851_v62  ;;  %v3885_v62 = vld [vmem:[%s5992_s3 + $0xb0] ss:$8 sps:$4 sm:$0xff]  }
  0xca   :  { %1201 = vmatmul.mubr.bf16.gmra.mxu0 %v265_v22  ;;  %2198 = vmatpush1.bf16.msra.mxu1 %v3849_v63  ;;  %v255_v22 = vld [vmem:[%s5989_s0 + $0xbc] sm:$0xff] }
  0xcb   :  { %1210 = vmatprep.mubr.bf16.mxu0 %v6001_v16  ;;  %2199 = vmatprep.subr.bf16.mxu1 %v3854_v3  ;;  %v275_v27 = vpack.c.bf16 %v255_v22, %v254_v21  ;;  %v3890_v3 = vld [vmem:[%s5992_s3 + $0x224] ss:$8 sps:$4 sm:$0xff]   ;;  %v3894_v21 = vld [vmem:[%s5992_s3 + $0x210] ss:$8 sps:$4 sm:$0xff]   ;;  %v3899_v22 = vld [vmem:[%s5992_s3 + $0x94] ss:$8 sps:$4 sm:$0xff]  }
  0xce   :  { %2200 = vmatpush1.bf16.msra.mxu1 %v3852_v7  ;;  %v3888_v7 = vld [vmem:[%s5992_s3 + $0x220] ss:$8 sps:$4 sm:$0xff]  }
  0xcf   :  { %2201 = vmatprep.subr.bf16.mxu1 %v3857_v11 }
  0xd2   :  { %1211 = vmatmul.mubr.bf16.gmra.mxu0 %v266_v25  ;;  %2202 = vmatpush1.bf16.msra.mxu1 %v3855_v13  ;;  %v3866_v25 = vld [vmem:[%s5992_s3 + $0x264] ss:$8 sps:$4 sm:$0xff]   ;;  %v3891_v13 = vld [vmem:[%s5992_s3 + $0xa0] ss:$8 sps:$4 sm:$0xff]  }
  0xd3   :  { %1220 = vmatprep.mubr.bf16.mxu0 %v6001_v16  ;;  %2203 = vmatprep.subr.bf16.mxu1 %v3863_v19 }
  0xd4   :  { %2415 = vmatprep.subr.bf16.mxu0 %v3866_v25  ;;  %v260_v25 = vld [vmem:[%s5989_s0 + $0xe4] sm:$0xff] }
  0xd6   :  { %2204 = vmatpush2.bf16.msra.mxu1 %v3861_v23 }
  0xd7   :  { %2205 = vmatprep.subr.bf16.mxu1 %v3869_v29 }
  0xda   :  { %1221 = vmatmul.mubr.bf16.gmra.mxu0 %v267_v28  ;;  %v3864_v28 = vld [vmem:[%s5992_s3 + $0x260] ss:$8 sps:$4 sm:$0xff]  }
  0xdb   :  { %1230 = vmatprep.mubr.bf16.mxu0 %v6001_v16  ;;  %2416 = vmatpush1.bf16.msra.mxu0 %v3864_v28  ;;  %v3897_v28 = vld [vmem:[%s5992_s3 + $0x90] ss:$8 sps:$4 sm:$0xff]  }
  0xdc   :  { %2417 = vmatprep.subr.bf16.mxu0 %v3872_v33 }
  0xdf   :  { %2418 = vmatpush1.bf16.msra.mxu0 %v3870_v35 }
  0xe0   :  { %2419 = vmatprep.subr.bf16.mxu0 %v3878_v42 }
  0xe2   :  { %1231 = vmatmul.mubr.bf16.gmra.mxu0 %v268_v31  ;;  %v3867_v31 = vld [vmem:[%s5992_s3 + $0xe0] ss:$8 sps:$4 sm:$0xff]  }
  0xe3   :  { %1240 = vmatprep.mubr.bf16.mxu0 %v6001_v16  ;;  %2206 = vmatpush2.bf16.msra.mxu1 %v3867_v31  ;;  %v3902_v31 = vld [vmem:[%s5992_s3 + $0x204] ss:$8 sps:$4 sm:$0xff]  }
  0xe4   :  { %2420 = vmatpush1.bf16.msra.mxu0 %v3876_v45 }
  0xe5   :  { %2421 = vmatprep.subr.bf16.mxu0 %v3884_v50 }
  0xe8   :  { %2422 = vmatpush1.bf16.msra.mxu0 %v3882_v53 }
  0xe9   :  { %2423 = vmatprep.subr.bf16.mxu0 %v3890_v3 }
  0xea   :  { %1241 = vmatmul.mubr.bf16.gmra.mxu0 %v269_v36  ;;  %v3875_v36 = vld [vmem:[%s5992_s3 + $0xd4] ss:$8 sps:$4 sm:$0xff]  }
  0xeb   :  { %1250 = vmatprep.mubr.bf16.mxu0 %v6001_v16  ;;  %2207 = vmatprep.subr.bf16.mxu1 %v3875_v36  ;;  %v3900_v36 = vld [vmem:[%s5992_s3 + $0x200] ss:$8 sps:$4 sm:$0xff]  }
  0xec   :  { %2208 = vmatpush2.bf16.msra.mxu1 %v3873_v40  ;;  %2424 = vmatpush1.bf16.msra.mxu0 %v3888_v7  ;;  %v3903_v40 = vld [vmem:[%s5992_s3 + $0x80] ss:$8 sps:$4 sm:$0xff]  }
  0xed   :  { %2425 = vmatprep.subr.bf16.mxu0 %v3896_v18 }
  0xf0   :  { %2426 = vmatpush1.bf16.msra.mxu0 %v3894_v21 }
  0xf1   :  { %2427 = vmatprep.subr.bf16.mxu0 %v3902_v31 }
  0xf2   :  { %1251 = vmatmul.mubr.bf16.gmra.mxu0 %v270_v41 }
  0xf3   :  { %1260 = vmatprep.mubr.bf16.mxu0 %v6001_v16 }
  0xf4   :  { %2428 = vmatpush1.bf16.msra.mxu0 %v3900_v36 }
  0xfa   :  { %1261 = vmatmul.mubr.bf16.gmra.mxu0 %v271_v46  ;;  %v3881_v46 = vld [vmem:[%s5992_s3 + $0xc4] ss:$8 sps:$4 sm:$0xff]  }
  0xfb   :  { %1270 = vmatprep.mubr.bf16.mxu0 %v6001_v16  ;;  %2209 = vmatprep.subr.bf16.mxu1 %v3881_v46  ;;  %v262_v46 = vld [vmem:[%s5989_s0 + $0xf4] sm:$0xff] }
  0xfc   :  { %2210 = vmatpush2.bf16.msra.mxu1 %v3879_v48  ;;  %v263_v48 = vld [vmem:[%s5989_s0 + $0xfc] sm:$0xf] }
  0xfd   :  { %2211 = vmatprep.subr.bf16.mxu1 %v3887_v54  ;;  %v279_v54 = vpack.c.bf16 %v263_v48, %v262_v46 }
 0x100   :  { %2212 = vmatpush2.bf16.msra.mxu1 %v3885_v62 }
 0x102   :  { %v4811_v52 = vpop.f32.mrf.mxu0  ;;  %1271 = vmatmul.mubr.bf16.gmra.mxu0 %v272_v51 }
 0x103   :  { %1280 = vmatprep.mubr.bf16.mxu0 %v6001_v16 }
 0x104   :  { %v4826_v57 = vpop.f32.mrf.mxu0  ;;  %v4828_v58 = vpop.f32.mrf.mxu1 }
 0x106   :  { %v4830_v59 = vpop.f32.mrf.mxu0  ;;  %v4832_v60 = vpop.f32.mrf.mxu1 }
 0x108   :  { %v4840_v0 = vpop.f32.mrf.mxu0  ;;  %v4842_v1 = vpop.f32.mrf.mxu1 }
 0x10a   :  { %v4844_v2 = vpop.f32.mrf.mxu0  ;;  %1281 = vmatmul.mubr.bf16.gmra.mxu0 %v273_v61  ;;  %v4849_v4 = vpop.f32.mrf.mxu1  ;;  %v259_v61 = vld [vmem:[%s5989_s0 + $0xdc] sm:$0xff] }
 0x10b   :  { %1290 = vmatprep.mubr.bf16.mxu0 %v6001_v16  ;;  %v277_v6 = vpack.c.bf16 %v259_v61, %v258_v56 }
 0x10c   :  { %v4861_v8 = vpop.f32.mrf.mxu0  ;;  %v4868_v12 = vpop.f32.mrf.mxu1 }
 0x10e   :  { %v4863_v9 = vpop.f32.mrf.mxu0  ;;  %v4886_v20 = vpop.f32.mrf.mxu1 }
 0x110   :  { %v4873_v14 = vpop.f32.mrf.mxu0  ;;  %v4911_v30 = vpop.f32.mrf.mxu1 }
 0x112   :  { %v4878_v17 = vpop.f32.mrf.mxu0  ;;  %1291 = vmatmul.mubr.bf16.gmra.mxu0 %v274_v10  ;;  %v4929_v37 = vpop.f32.mrf.mxu1  ;;  %v3893_v10 = vld [vmem:[%s5992_s3 + $0xa4] ss:$8 sps:$4 sm:$0xff]  }
 0x113   :  { %1300 = vmatprep.mubr.bf16.mxu0 %v6001_v16  ;;  %2213 = vmatprep.subr.bf16.mxu1 %v3893_v10 }
 0x114   :  { %v4898_v24 = vpop.f32.mrf.mxu0  ;;  %v4954_v47 = vpop.f32.mrf.mxu1  ;;  %2214 = vmatpush2.bf16.msra.mxu1 %v3891_v13 }
 0x115   :  { %2215 = vmatprep.subr.bf16.mxu1 %v3899_v22 }
 0x116   :  { %v4903_v26 = vpop.f32.mrf.mxu0  ;;  %v4972_v55 = vpop.f32.mrf.mxu1 }
 0x118   :  { %v4916_v32 = vpop.f32.mrf.mxu0  ;;  %v4997_v11 = vpop.f32.mrf.mxu1  ;;  %2216 = vmatpush2.bf16.msra.mxu1 %v3897_v28 }
 0x119   :  { %2217 = vmatprep.subr.bf16.mxu1 %v3905_v38 }
 0x11a   :  { %v4921_v34 = vpop.f32.mrf.mxu0  ;;  %1301 = vmatmul.mubr.bf16.gmra.mxu0 %v275_v27  ;;  %v5015_v23 = vpop.f32.mrf.mxu1  ;;  %v261_v27 = vld [vmem:[%s5989_s0 + $0xec] sm:$0xff] }
 0x11b   :  { %1310 = vmatprep.mubr.bf16.mxu0 %v6001_v16  ;;  %v278_v35 = vpack.c.bf16 %v261_v27, %v260_v25 }
 0x11c   :  { %v4941_v41 = vpop.f32.mrf.mxu0  ;;  %v5040_v39 = vpop.f32.mrf.mxu1  ;;  %2218 = vmatpush2.bf16.msra.mxu1 %v3903_v40 }
 0x11e   :  { %v4946_v43 = vpop.f32.mrf.mxu0  ;;  %v5049_v45 = vpop.f32.mrf.mxu1 }
 0x120   :  { %v4959_v49 = vpop.f32.mrf.mxu0  ;;  %v5062_v56 = vpop.f32.mrf.mxu1 }
 0x122   :  { %v4964_v51 = vpop.f32.mrf.mxu0  ;;  %1311 = vmatmul.mubr.bf16.gmra.mxu0 %v276_v44  ;;  %v5068_v3 = vpop.f32.mrf.mxu1 }
 0x123   :  { %1320 = vmatprep.mubr.bf16.mxu0 %v6001_v16 }
 0x124   :  { %v4984_v63 = vpop.f32.mrf.mxu0  ;;  %v5075_v10 = vpop.f32.mrf.mxu1 }
 0x126   :  { %v4989_v5 = vpop.f32.mrf.mxu0  ;;  %v5081_v21 = vpop.f32.mrf.mxu1 }
 0x128   :  { %v5002_v15 = vpop.f32.mrf.mxu0  ;;  %v5087_v27 = vpop.f32.mrf.mxu1 }
 0x12a   :  { %v5007_v19 = vpop.f32.mrf.mxu0  ;;  %1321 = vmatmul.mubr.bf16.gmra.mxu0 %v277_v6 }
 0x12b   :  { %1330 = vmatprep.mubr.bf16.mxu0 %v6001_v16 }
 0x12c   :  { %v5027_v29 = vpop.f32.mrf.mxu0 }
 0x12e   :  { %v5032_v33 = vpop.f32.mrf.mxu0 }
 0x130   :  { %v5045_v42 = vpop.f32.mrf.mxu0 }
 0x132   :  { %v5047_v44 = vpop.f32.mrf.mxu0  ;;  %1331 = vmatmul.mubr.bf16.gmra.mxu0 %v278_v35  ;;  %v5093_v35 = vpop.f32.mrf.mxu1 }
 0x133   :  { %1340 = vmatprep.mubr.bf16.mxu0 %v6001_v16 }
 0x134   :  { %v5058_v50 = vpop.f32.mrf.mxu0  ;;  %v5099_v40 = vpop.f32.mrf.mxu1 }
 0x136   :  { %v5060_v53 = vpop.f32.mrf.mxu0 }
 0x137   :  { %6009 = vst [vmem:[#allocation9_spill] sm:$0xff] %v5060_v53 }
 0x138   :  { %v5064_v61 = vpop.f32.mrf.mxu0 }
 0x139   :  { %6010 = vst [vmem:[#allocation10_spill] sm:$0xff] %v5064_v61 }
 0x13a   :  { %v5066_v62 = vpop.f32.mrf.mxu0  ;;  %1341 = vmatmul.mubr.bf16.gmra.mxu0 %v279_v54  ;;  %v5105_v54 = vpop.f32.mrf.mxu1 }
 0x13b   :  { %6011 = vst [vmem:[#allocation11_spill] sm:$0xff] %v5066_v62  ;;  %2445 = vmatprep.mubr.bf16.mxu0 %v6001_v16 }
 0x13c   :  { %v5071_v6 = vpop.f32.mrf.mxu0 }
 0x13d   :  { %6012 = vst [vmem:[#allocation12_spill] sm:$0xff] %v5071_v6  ;;  %v362_v6 = vlaneseq }
 0x13e   :  { %v5073_v7 = vpop.f32.mrf.mxu0 }
 0x13f   :  { %6013 = vst [vmem:[#allocation13_spill] sm:$0xff] %v5073_v7 }
 0x140   :  { %v5077_v13 = vpop.f32.mrf.mxu0 }
 0x141   :  { %6014 = vst [vmem:[#allocation14_spill] sm:$0xff] %v5077_v13 }
 0x142   :  { %v5079_v18 = vpop.f32.mrf.mxu0 }
 0x143   :  { %6015 = vst [vmem:[#allocation15_spill] sm:$0xff] %v5079_v18 }
 0x144   :  { %v5083_v22 = vpop.f32.mrf.mxu0 }
 0x145   :  { %6016 = vst [vmem:[#allocation16_spill] sm:$0xff] %v5083_v22 }
 0x146   :  { %v5085_v25 = vpop.f32.mrf.mxu0 }
 0x147   :  { %6017 = vst [vmem:[#allocation17_spill] sm:$0xff] %v5085_v25 }
 0x148   :  { %v5089_v28 = vpop.f32.mrf.mxu0 }
 0x149   :  { %6018 = vst [vmem:[#allocation18_spill] sm:$0xff] %v5089_v28  ;;  %v5111_v28 = vpop.f32.mrf.mxu1 }
 0x14a   :  { %v5091_v31 = vpop.f32.mrf.mxu0 }
 0x14b   :  { %6019 = vst [vmem:[#allocation19_spill] sm:$0xff] %v5091_v31 }
 0x14c   :  { %v5095_v36 = vpop.f32.mrf.mxu0 }
 0x14d   :  { %6020 = vst [vmem:[#allocation20_spill] sm:$0xff] %v5095_v36  ;;  %v5117_v36 = vpop.f32.mrf.mxu1 }
 0x14e   :  { %v5097_v38 = vpop.f32.mrf.mxu0 }
 0x14f   :  { %6021 = vst [vmem:[#allocation21_spill] sm:$0xff] %v5097_v38 }
 0x150   :  { %v5101_v46 = vpop.f32.mrf.mxu0 }
 0x151   :  { %6022 = vst [vmem:[#allocation22_spill] sm:$0xff] %v5101_v46  ;;  %v5123_v46 = vpop.f32.mrf.mxu1 }
 0x152   :  { %v5103_v48 = vpop.f32.mrf.mxu0  ;;  %6030 = vst [vmem:[#allocation30_spill] sm:$0xff] %v5123_v46 }
 0x153   :  { %6023 = vst [vmem:[#allocation23_spill] sm:$0xff] %v5103_v48 }
 0x154   :  { %v5107_v16 = vpop.f32.mrf.mxu0 }
 0x155   :  { %6024 = vst [vmem:[#allocation24_spill] sm:$0xff] %v5107_v16  ;;  %v5129_v16 = vpop.f32.mrf.mxu1 }
 0x156   :  { %v5109_v25 = vpop.f32.mrf.mxu0  ;;  %6033 = vst [vmem:[#allocation33_spill] sm:$0xff] %v5129_v16 }
 0x157   :  { %6025 = vst [vmem:[#allocation25_spill] sm:$0xff] %v5109_v25 }
 0x158   :  { %v5113_v31 = vpop.f32.mrf.mxu0 }
 0x159   :  { %6026 = vst [vmem:[#allocation26_spill] sm:$0xff] %v5113_v31  ;;  %v3908_v31 = vld [vmem:[%s5992_s3 + $0x174] ss:$8 sps:$4 sm:$0xff]  }
 0x15a   :  { %v5115_v22 = vpop.f32.mrf.mxu0  ;;  %2300 = vmatprep.subr.bf16.mxu1 %v3908_v31  ;;  %v5154_v31 = vshrl.u32 %v362_v6, 7 }
 0x15b   :  { %6027 = vst [vmem:[#allocation27_spill] sm:$0xff] %v5115_v22 }
 0x15c   :  { %v5119_v38 = vpop.f32.mrf.mxu0  ;;  %6044 = vst [vmem:[#allocation44_spill] sm:$0xff] %v5154_v31 }
 0x15d   :  { %6028 = vst [vmem:[#allocation28_spill] sm:$0xff] %v5119_v38  ;;  %v5138_v38 = vpop.f32.mrf.mxu1 }
 0x15e   :  { %v5121_v18 = vpop.f32.mrf.mxu0  ;;  %6036 = vst [vmem:[#allocation36_spill] sm:$0xff] %v5138_v38 }
 0x15f   :  { %6029 = vst [vmem:[#allocation29_spill] sm:$0xff] %v5121_v18 }
 0x160   :  { %v5125_v48 = vpop.f32.mrf.mxu0 }
 0x161   :  { %6031 = vst [vmem:[#allocation31_spill] sm:$0xff] %v5125_v48  ;;  %v5144_v48 = vpop.f32.mrf.mxu1 }
 0x162   :  { %v5127_v13 = vpop.f32.mrf.mxu0  ;;  %6039 = vst [vmem:[#allocation39_spill] sm:$0xff] %v5144_v48 }
 0x163   :  { %6032 = vst [vmem:[#allocation32_spill] sm:$0xff] %v5127_v13  ;;  %v5150_v16 = vpop.f32.mrf.mxu1 }
 0x164   :  { %v5134_v25 = vpop.f32.mrf.mxu0  ;;  %6042 = vst [vmem:[#allocation42_spill] sm:$0xff] %v5150_v16 }
 0x165   :  { %6034 = vst [vmem:[#allocation34_spill] sm:$0xff] %v5134_v25  ;;  %v5158_v25 = vpop.f32.mrf.mxu1 }
 0x166   :  { %v5136_v22 = vpop.f32.mrf.mxu0  ;;  %6046 = vst [vmem:[#allocation46_spill] sm:$0xff] %v5158_v25 }
 0x167   :  { %6035 = vst [vmem:[#allocation35_spill] sm:$0xff] %v5136_v22  ;;  %v5169_v16 = vpop.f32.mrf.mxu1 }
 0x168   :  { %v5140_v18 = vpop.f32.mrf.mxu0  ;;  %6049 = vst [vmem:[#allocation49_spill] sm:$0xff] %v5169_v16 }
 0x169   :  { %6037 = vst [vmem:[#allocation37_spill] sm:$0xff] %v5140_v18  ;;  %v5183_v25 = vpop.f32.mrf.mxu1 }
 0x16a   :  { %v5142_v7 = vpop.f32.mrf.mxu0  ;;  %6052 = vst [vmem:[#allocation52_spill] sm:$0xff] %v5183_v25 }
 0x16b   :  { %6038 = vst [vmem:[#allocation38_spill] sm:$0xff] %v5142_v7  ;;  %v6003_v7 = vsub.s32 0, %v5154_v31 }
 0x16c   :  { %v5146_v13 = vpop.f32.mrf.mxu0 }
 0x16d   :  { %6040 = vst [vmem:[#allocation40_spill] sm:$0xff] %v5146_v13  ;;  %v360_v13 = vld [vmem:[%s5991_s2] sm:$0x3] }
 0x16e   :  { %v5148_v62 = vpop.f32.mrf.mxu0 }
 0x16f   :  { %6041 = vst [vmem:[#allocation41_spill] sm:$0xff] %v5148_v62  ;;  %v6006_v62 = vsub.s32 1, %v5154_v31 }
 0x170   :  { %v5152_v61 = vpop.f32.mrf.mxu0 }
 0x171   :  { %6043 = vst [vmem:[#allocation43_spill] sm:$0xff] %v5152_v61 }
 0x172   :  { %v5156_v22 = vpop.f32.mrf.mxu0 }
 0x173   :  { %6045 = vst [vmem:[#allocation45_spill] sm:$0xff] %v5156_v22  ;;  %v5175_v22 = vrot.slane %v360_v13, %v6003_v7  ;;  %v5193_v7 = vpop.f32.mrf.mxu1 }
 0x174   :  { %v5160_v18 = vpop.f32.mrf.mxu0  ;;  %6055 = vst [vmem:[#allocation55_spill] sm:$0xff] %v5193_v7 }
 0x175   :  { %6047 = vst [vmem:[#allocation47_spill] sm:$0xff] %v5160_v18  ;;  %v5181_v18 = vrot.slane %v360_v13, %v6006_v62  ;;  %v811_v13 = vadd.f32 %v4830_v59, %v5175_v22 }
 0x176   :  { %v5166_v48 = vpop.f32.mrf.mxu0 }
 0x177   :  { %6048 = vst [vmem:[#allocation48_spill] sm:$0xff] %v5166_v48  ;;  %v807_v48 = vadd.f32 %v4811_v52, %v5175_v22  ;;  %v813_v62 = vadd.f32 %v4840_v0, %v5181_v18  ;;  %v819_v59 = vadd.f32 %v4861_v8, %v5181_v18 }
 0x178   :  { %v5171_v6 = vpop.f32.mrf.mxu0 }
 0x179   :  { %6050 = vst [vmem:[#allocation50_spill] sm:$0xff] %v5171_v6  ;;  %v809_v6 = vadd.f32 %v4826_v57, %v5181_v18  ;;  %v1000_v31 = vadd.f32 %v4828_v58, %v807_v48  ;;  %v1004_v57 = vadd.f32 %v4842_v1, %v811_v13  ;;  %v1006_v58 = vadd.f32 %v4849_v4, %v813_v62 }
 0x17a   :  { %v5177_v61 = vpop.f32.mrf.mxu0 }
 0x17b   :  { %6051 = vst [vmem:[#allocation51_spill] sm:$0xff] %v5177_v61  ;;  %v1002_v52 = vadd.f32 %v4832_v60, %v809_v6  ;;  %v5203_v61 = vpop.f32.mrf.mxu1 }
 0x17c   :  { %v5185_v38 = vpop.f32.mrf.mxu0  ;;  %6057 = vst [vmem:[#allocation57_spill] sm:$0xff] %v5203_v61 }
 0x17d   :  { %6053 = vst [vmem:[#allocation53_spill] sm:$0xff] %v5185_v38  ;;  %v5211_v0 = vpop.f32.mrf.mxu1 }
 0x17e   :  { %v5189_v16 = vpop.f32.mrf.mxu0 }
 0x17f   :  { %6054 = vst [vmem:[#allocation54_spill] sm:$0xff] %v5189_v16 }
 0x180   :  { %v5195_v46 = vpop.f32.mrf.mxu0 }
 0x181   :  { %6056 = vst [vmem:[#allocation56_spill] sm:$0xff] %v5195_v46  ;;  %v817_v46 = vadd.f32 %v4844_v2, %v5175_v22  ;;  %v821_v2 = vadd.f32 %v4863_v9, %v5175_v22  ;;  %v827_v9 = vadd.f32 %v4878_v17, %v5175_v22  ;;  %v831_v17 = vadd.f32 %v4903_v26, %v5175_v22 }
 0x182   :  { %v1192_v38 = vpop.f32.mrf.mxu0  ;;  %v837_v26 = vadd.f32 %v4921_v34, %v5175_v22 }
 0x183   :  { %v1193_v16 = vadd.f32 %v1192_v38, %v1000_v31  ;;  %v6007_v38 = vmov 0.0   ;;  %v1010_v1 = vadd.f32 %v4868_v12, %v817_v46  ;;  %v1014_v12 = vadd.f32 %v4911_v30, %v821_v2 }
 0x184   :  { %v1194_v25 = vpop.f32.mrf.mxu0  ;;  %1479 = vst [vmem:[#allocation2 + $0xfc] sm:$0xf] %v6007_v38  ;;  %2590 = vst [vmem:[#allocation4 + $0x7c] sm:$0xf] %v6007_v38  ;;  %3650 = vmatprep.subr.bf16.mxu0 %v6007_v38  ;;  %v1020_v30 = vadd.f32 %v4954_v47, %v827_v9  ;;  %v1024_v47 = vadd.f32 %v4997_v11, %v831_v17  ;;  %v1030_v34 = vadd.f32 %v5040_v39, %v837_v26 }
 0x185   :  { %v1195_v7 = vadd.f32 %v1194_v25, %v1002_v52  ;;  %v1351_v53 = vmax.f32 %v1193_v16, 0.0  ;;  %v823_v16 = vadd.f32 %v4873_v14, %v5181_v18  ;;  %v5222_v25 = vpop.f32.mrf.mxu1 }
 0x186   :  { %v1196_v48 = vpop.f32.mrf.mxu0 }
 0x187   :  { %v1352_v60 = vmax.f32 %v1195_v7, 0.0  ;;  %v1197_v6 = vadd.f32 %v1196_v48, %v1004_v57  ;;  %v1012_v7 = vadd.f32 %v4886_v20, %v819_v59  ;;  %v1016_v46 = vadd.f32 %v4929_v37, %v823_v16 }
 0x188   :  { %v1198_v61 = vpop.f32.mrf.mxu0  ;;  %v829_v20 = vadd.f32 %v4898_v24, %v5181_v18  ;;  %v833_v37 = vadd.f32 %v4916_v32, %v5181_v18  ;;  %v839_v32 = vadd.f32 %v4941_v41, %v5181_v18 }
 0x189   :  { %v1415_v4 = vmax.f32 %v1351_v53, %v1352_v60  ;;  %v1199_v8 = vadd.f32 %v1198_v61, %v1006_v58  ;;  %v1353_v31 = vmax.f32 %v1197_v6, 0.0  ;;  %v5230_v58 = vpop.f32.mrf.mxu1 }
 0x18a   :  { %v1202_v62 = vpop.f32.mrf.mxu0  ;;  %v1022_v24 = vadd.f32 %v4972_v55, %v829_v20 }
 0x18b   :  { %1447 = vst [vmem:[#allocation2] sm:$0xff] %v1415_v4  ;;  %v1354_v13 = vmax.f32 %v1199_v8, 0.0  ;;  %v1203_v52 = vadd.f32 %v1202_v62, %v1010_v1  ;;  %v5238_v8 = vpop.f32.mrf.mxu1 }
 0x18c   :  { %v1204_v57 = vpop.f32.mrf.mxu0 }
 0x18d   :  { %v1416_v53 = vmax.f32 %v1353_v31, %v1354_v13  ;;  %v1205_v61 = vadd.f32 %v1204_v57, %v1012_v7  ;;  %v1355_v59 = vmax.f32 %v1203_v52, 0.0  ;;  %v1026_v57 = vadd.f32 %v5015_v23, %v833_v37 }
 0x18e   :  { %v1206_v14 = vpop.f32.mrf.mxu0  ;;  %v841_v23 = vadd.f32 %v4946_v43, %v5175_v22  ;;  %v847_v43 = vadd.f32 %v4964_v51, %v5175_v22 }
 0x18f   :  { %1448 = vst [vmem:[#allocation2 + $0x8] sm:$0xff] %v1416_v53  ;;  %v1356_v48 = vmax.f32 %v1205_v61, 0.0  ;;  %v1207_v60 = vadd.f32 %v1206_v14, %v1014_v12  ;;  %v5246_v53 = vpop.f32.mrf.mxu1 }
 0x190   :  { %v1208_v6 = vpop.f32.mrf.mxu0  ;;  %v1034_v37 = vadd.f32 %v5062_v56, %v841_v23  ;;  %v1040_v51 = vadd.f32 %v5075_v10, %v847_v43 }
 0x191   :  { %v1417_v1 = vmax.f32 %v1355_v59, %v1356_v48  ;;  %v1209_v2 = vadd.f32 %v1208_v6, %v1016_v46  ;;  %v1357_v16 = vmax.f32 %v1207_v60, 0.0  ;;  %v843_v48 = vadd.f32 %v4959_v49, %v5181_v18 }
 0x192   :  { %v1212_v4 = vpop.f32.mrf.mxu0  ;;  %v1032_v6 = vadd.f32 %v5049_v45, %v839_v32  ;;  %v849_v49 = vadd.f32 %v4984_v63, %v5181_v18  ;;  %v853_v32 = vadd.f32 %v5002_v15, %v5181_v18  ;;  %v859_v15 = vadd.f32 %v5027_v29, %v5181_v18 }
 0x193   :  { %1449 = vst [vmem:[#allocation2 + $0x10] sm:$0xff] %v1417_v1  ;;  %v1358_v62 = vmax.f32 %v1209_v2, 0.0  ;;  %v1213_v7 = vadd.f32 %v1212_v4, %v1020_v30  ;;  %v5257_v30 = vpop.f32.mrf.mxu1 }
 0x194   :  { %v1214_v31 = vpop.f32.mrf.mxu0 }
 0x195   :  { %v1418_v13 = vmax.f32 %v1357_v16, %v1358_v62  ;;  %v1215_v52 = vadd.f32 %v1214_v31, %v1022_v24  ;;  %v1359_v46 = vmax.f32 %v1213_v7, 0.0  ;;  %v1036_v16 = vadd.f32 %v5068_v3, %v843_v48  ;;  %v5265_v31 = vpop.f32.mrf.mxu1 }
 0x196   :  { %v1480_v55 = vld [vmem:[#allocation2] ss:$2 sm:$0xff]  ;;  %v1512_v12 = vld [vmem:[#allocation2 + $0x1] ss:$2 sm:$0xff]  ;;  %v1216_v9 = vpop.f32.mrf.mxu0  ;;  %v851_v3 = vadd.f32 %v4989_v5, %v5175_v22  ;;  %v857_v5 = vadd.f32 %v5007_v19, %v5175_v22 }
 0x197   :  { %v5248_v61 = vmax.f32 %v1480_v55, %v1512_v12  ;;  %1450 = vst [vmem:[#allocation2 + $0x18] sm:$0xff] %v1418_v13  ;;  %v1360_v11 = vmax.f32 %v1215_v52, 0.0  ;;  %v1217_v14 = vadd.f32 %v1216_v9, %v1024_v47  ;;  %v1042_v12 = vadd.f32 %v5081_v21, %v849_v49  ;;  %v5276_v9 = vpop.f32.mrf.mxu1 }
 0x198   :  { %v1218_v20 = vpop.f32.mrf.mxu0  ;;  %v1050_v19 = vadd.f32 %v5099_v40, %v857_v5 }
 0x199   :  { %1559 = vst [vmem:[#allocation3] sm:$0xff] %v5248_v61  ;;  %v1419_v41 = vmax.f32 %v1359_v46, %v1360_v11  ;;  %v1219_v59 = vadd.f32 %v1218_v20, %v1026_v57  ;;  %v1361_v17 = vmax.f32 %v1217_v14, 0.0  ;;  %v1044_v20 = vadd.f32 %v5087_v27, %v851_v3 }
 0x19a   :  { %v1222_v60 = vpop.f32.mrf.mxu0 }
 0x19b   :  { %1451 = vst [vmem:[#allocation2 + $0x20] sm:$0xff] %v1419_v41  ;;  %v1362_v1 = vmax.f32 %v1219_v59, 0.0  ;;  %v1223_v2 = vadd.f32 %v1222_v60, %v1030_v34  ;;  %v1046_v41 = vadd.f32 %v5093_v35, %v853_v32  ;;  %v5284_v60 = vpop.f32.mrf.mxu1  ;;  %v861_v35 = vadd.f32 %v5032_v33, %v5175_v22 }
 0x19c   :  { %v1224_v39 = vpop.f32.mrf.mxu0  ;;  %v867_v33 = vadd.f32 %v5047_v44, %v5175_v22  ;;  %v6058_v44 = vld [vmem:[#allocation9_spill] sm:$0xff] }
 0x19d   :  { %v1420_v4 = vmax.f32 %v1361_v17, %v1362_v1  ;;  %v1225_v24 = vadd.f32 %v1224_v39, %v1032_v6  ;;  %v1363_v26 = vmax.f32 %v1223_v2, 0.0  ;;  %v871_v32 = vadd.f32 %v6058_v44, %v5175_v22  ;;  %v6067_v44 = vld [vmem:[#allocation42_spill] sm:$0xff] }
 0x19e   :  { %v1482_v45 = vld [vmem:[#allocation2 + $0x10] ss:$2 sm:$0xff]  ;;  %v1514_v62 = vld [vmem:[#allocation2 + $0x11] ss:$2 sm:$0xff]  ;;  %v1226_v7 = vpop.f32.mrf.mxu0 }
 0x19f   :  { %v5267_v47 = vmax.f32 %v1482_v45, %v1514_v62  ;;  %1452 = vst [vmem:[#allocation2 + $0x28] sm:$0xff] %v1420_v4  ;;  %v1364_v56 = vmax.f32 %v1225_v24, 0.0  ;;  %v1227_v13 = vadd.f32 %v1226_v7, %v1034_v37  ;;  %v863_v37 = vadd.f32 %v5045_v42, %v5181_v18  ;;  %v5295_v24 = vpop.f32.mrf.mxu1 }
 0x1a0   :  { %v1228_v52 = vpop.f32.mrf.mxu0  ;;  %v1052_v4 = vadd.f32 %v5105_v54, %v859_v15  ;;  %v1054_v62 = vadd.f32 %v5111_v28, %v861_v35  ;;  %v869_v42 = vadd.f32 %v5058_v50, %v5181_v18 }
 0x1a1   :  { %1560 = vst [vmem:[#allocation3 + $0x8] sm:$0xff] %v5267_v47  ;;  %v1421_v63 = vmax.f32 %v1363_v26, %v1364_v56  ;;  %v1229_v57 = vadd.f32 %v1228_v52, %v1036_v16  ;;  %v1365_v46 = vmax.f32 %v1227_v13, 0.0  ;;  %v1056_v56 = vadd.f32 %v5117_v36, %v863_v37 }
 0x1a2   :  { %v1232_v55 = vpop.f32.mrf.mxu0 }
 0x1a3   :  { %1453 = vst [vmem:[#allocation2 + $0x30] sm:$0xff] %v1421_v63  ;;  %v1366_v11 = vmax.f32 %v1229_v57, 0.0  ;;  %v1233_v14 = vadd.f32 %v1232_v55, %v1040_v51  ;;  %v5303_v51 = vpop.f32.mrf.mxu1 }
 0x1a4   :  { %v1234_v10 = vpop.f32.mrf.mxu0 }
 0x1a5   :  { %v1422_v34 = vmax.f32 %v1365_v46, %v1366_v11  ;;  %v1235_v23 = vadd.f32 %v1234_v10, %v1042_v12  ;;  %v1367_v17 = vmax.f32 %v1233_v14, 0.0  ;;  %v6059_v11 = vld [vmem:[#allocation30_spill] sm:$0xff] }
 0x1a6   :  { %v1484_v21 = vld [vmem:[#allocation2 + $0x20] ss:$2 sm:$0xff]  ;;  %v1516_v59 = vld [vmem:[#allocation2 + $0x21] ss:$2 sm:$0xff]  ;;  %v1236_v48 = vpop.f32.mrf.mxu0  ;;  %v1060_v50 = vadd.f32 %v6059_v11, %v867_v33  ;;  %v3912_v11 = vld [vmem:[%s5992_s3 + $0x150] ss:$8 sps:$4 sm:$0xff]  }
 0x1a7   :  { %v5286_v6 = vmax.f32 %v1484_v21, %v1516_v59  ;;  %1454 = vst [vmem:[#allocation2 + $0x38] sm:$0xff] %v1422_v34  ;;  %v1368_v27 = vmax.f32 %v1235_v23, 0.0  ;;  %v1237_v1 = vadd.f32 %v1236_v48, %v1044_v20  ;;  %v3906_v34 = vld [vmem:[%s5992_s3 + $0x170] ss:$8 sps:$4 sm:$0xff]   ;;  %v1591_v59 = vpack.c.bf16 %v5267_v47, %v5248_v61  ;;  %v3911_v48 = vld [vmem:[%s5992_s3 + $0x164] ss:$8 sps:$4 sm:$0xff]  }
 0x1a8   :  { %v1238_v2 = vpop.f32.mrf.mxu0  ;;  %v1599_v12 = vld [vmem:[#allocation3 + $0x1] sm:$0xff]  ;;  %v6060_v23 = vld [vmem:[#allocation10_spill] sm:$0xff]  ;;  %v6063_v61 = vld [vmem:[#allocation11_spill] sm:$0xff] }
 0x1a9   :  { %1561 = vst [vmem:[#allocation3 + $0x10] sm:$0xff] %v5286_v6  ;;  %v1423_v29 = vmax.f32 %v1367_v17, %v1368_v27  ;;  %v1239_v39 = vadd.f32 %v1238_v2, %v1046_v41  ;;  %v1369_v16 = vmax.f32 %v1237_v1, 0.0  ;;  %v1671_v5 = vld [vmem:[#allocation3 + $0x4] sm:$0xff]  ;;  %v873_v41 = vadd.f32 %v6060_v23, %v5181_v18  ;;  %v5322_v1 = vpop.f32.mrf.mxu1 }
 0x1aa   :  { %v1242_v43 = vpop.f32.mrf.mxu0  ;;  %v6061_v17 = vld [vmem:[#allocation33_spill] sm:$0xff]  ;;  %v877_v47 = vadd.f32 %v6063_v61, %v5175_v22  ;;  %v6074_v61 = vld [vmem:[#allocation16_spill] sm:$0xff] }
 0x1ab   :  { %1455 = vst [vmem:[#allocation2 + $0x40] sm:$0xff] %v1423_v29  ;;  %v1370_v49 = vmax.f32 %v1239_v39, 0.0  ;;  %v1243_v45 = vadd.f32 %v1242_v43, %v1050_v19  ;;  %v1062_v27 = vadd.f32 %v6061_v17, %v869_v42  ;;  %v6062_v29 = vld [vmem:[#allocation36_spill] sm:$0xff]  ;;  %v3914_v42 = vld [vmem:[%s5992_s3 + $0x154] ss:$8 sps:$4 sm:$0xff]  }
 0x1ac   :  { %v1244_v40 = vpop.f32.mrf.mxu0  ;;  %v1064_v39 = vadd.f32 %v6062_v29, %v871_v32  ;;  %v1070_v32 = vadd.f32 %v6067_v44, %v877_v47  ;;  %v3915_v29 = vld [vmem:[%s5992_s3 + $0x140] ss:$8 sps:$4 sm:$0xff]   ;;  %v889_v47 = vadd.f32 %v6074_v61, %v5181_v18  ;;  %v6076_v44 = vld [vmem:[#allocation55_spill] sm:$0xff] }
 0x1ad   :  { %v1424_v7 = vmax.f32 %v1369_v16, %v1370_v49  ;;  %v1245_v26 = vadd.f32 %v1244_v40, %v1052_v4  ;;  %v1371_v63 = vmax.f32 %v1243_v45, 0.0  ;;  %v6064_v16 = vmov 0   ;;  %v3909_v49 = vld [vmem:[%s5992_s3 + $0x160] ss:$8 sps:$4 sm:$0xff]   ;;  %v6065_v45 = vld [vmem:[#allocation39_spill] sm:$0xff] }
 0x1ae   :  { %v1486_v54 = vld [vmem:[#allocation2 + $0x30] ss:$2 sm:$0xff]  ;;  %v1518_v13 = vld [vmem:[#allocation2 + $0x31] ss:$2 sm:$0xff]  ;;  %v1246_v52 = vpop.f32.mrf.mxu0  ;;  %v1066_v40 = vadd.f32 %v6065_v45, %v873_v41 }
 0x1af   :  { %v5305_v3 = vmax.f32 %v1486_v54, %v1518_v13  ;;  %1456 = vst [vmem:[#allocation2 + $0x48] sm:$0xff] %v1424_v7  ;;  %v1372_v28 = vmax.f32 %v1245_v26, 0.0  ;;  %v1247_v57 = vadd.f32 %v1246_v52, %v1054_v62  ;;  %v6066_v62 = vld [vmem:[#allocation12_spill] sm:$0xff]  ;;  %v5337_v54 = vpop.f32.mrf.mxu1  ;;  %v3920_v45 = vld [vmem:[%s5992_s3 + $0x134] ss:$8 sps:$4 sm:$0xff]  }
 0x1b0   :  { %v1248_v55 = vpop.f32.mrf.mxu0  ;;  %v1600_v36 = vld [vmem:[#allocation3 + $0x9] sm:$0xff]  ;;  %v879_v33 = vadd.f32 %v6066_v62, %v5181_v18 }
 0x1b1   :  { %v1672_v46 = vld [vmem:[#allocation3 + $0xc] sm:$0xff]  ;;  %1562 = vst [vmem:[#allocation3 + $0x18] sm:$0xff] %v5305_v3  ;;  %v1425_v14 = vmax.f32 %v1371_v63, %v1372_v28  ;;  %v1249_v10 = vadd.f32 %v1248_v55, %v1056_v56  ;;  %v1615_v20 = vpack.c.bf16 %v1600_v36, %v1599_v12  ;;  %v1373_v2 = vmax.f32 %v1247_v57, 0.0  ;;  %v5354_v23 = vpop.f32.mrf.mxu1 }
 0x1b2   :  { %v1252_v15 = vpop.f32.mrf.mxu0  ;;  %v1687_v21 = vpack.c.bf16 %v1672_v46, %v1671_v5  ;;  %v6068_v55 = vld [vmem:[#allocation13_spill] sm:$0xff]  ;;  %v6070_v5 = vld [vmem:[#allocation46_spill] sm:$0xff] }
 0x1b3   :  { %1457 = vst [vmem:[#allocation2 + $0x50] sm:$0xff] %v1425_v14  ;;  %v1374_v19 = vmax.f32 %v1249_v10, 0.0  ;;  %v1253_v35 = vadd.f32 %v1252_v15, %v1060_v50  ;;  %2219 = vmatprep.mubr.bf16.mxu1 %v1615_v20  ;;  %v881_v12 = vadd.f32 %v6068_v55, %v5175_v22  ;;  %v6069_v50 = vld [vmem:[#allocation14_spill] sm:$0xff]  ;;  %v3917_v20 = vld [vmem:[%s5992_s3 + $0x144] ss:$8 sps:$4 sm:$0xff]  }
 0x1b4   :  { %2446 = vmatmul.mubr.bf16.vlgmr.msra.gmra.mxu0 %v1687_v21  ;;  %v1254_v37 = vpop.f32.mrf.mxu0  ;;  %2220 = vmatmul.mubr.bf16.vlgmr.msra.gmra.mxu1 %v1591_v59  ;;  %v883_v14 = vadd.f32 %v6069_v50, %v5181_v18  ;;  %v6077_v50 = vld [vmem:[#allocation18_spill] sm:$0xff] }
 0x1b5   :  { %v1426_v43 = vmax.f32 %v1373_v2, %v1374_v19  ;;  %v1255_v4 = vadd.f32 %v1254_v37, %v1062_v27  ;;  %2455 = vmatprep.mubr.bf16.mxu0 %v6064_v16  ;;  %2301 = vmatpush1.bf16.msra.mxu1 %v3906_v34  ;;  %v1375_v52 = vmax.f32 %v1253_v35, 0.0  ;;  %v1072_v34 = vadd.f32 %v6070_v5, %v879_v33  ;;  %v6072_v27 = vld [vmem:[#allocation15_spill] sm:$0xff] }
 0x1b6   :  { %v1488_v7 = vld [vmem:[#allocation2 + $0x40] ss:$2 sm:$0xff]  ;;  %v1520_v26 = vld [vmem:[#allocation2 + $0x41] ss:$2 sm:$0xff]  ;;  %v1256_v56 = vpop.f32.mrf.mxu0  ;;  %2302 = vmatprep.subr.bf16.mxu1 %v3911_v48  ;;  %v887_v2 = vadd.f32 %v6072_v27, %v5175_v22  ;;  %v1592_v5 = vpack.c.bf16 %v5305_v3, %v5286_v6  ;;  %v6079_v6 = vld [vmem:[#allocation19_spill] sm:$0xff] }
 0x1b7   :  { %v5339_v13 = vmax.f32 %v1488_v7, %v1520_v26  ;;  %1458 = vst [vmem:[#allocation2 + $0x58] sm:$0xff] %v1426_v43  ;;  %v1376_v63 = vmax.f32 %v1255_v4, 0.0  ;;  %v1257_v28 = vadd.f32 %v1256_v56, %v1064_v39  ;;  %v6071_v48 = vld [vmem:[#allocation49_spill] sm:$0xff]  ;;  %v6073_v39 = vld [vmem:[#allocation52_spill] sm:$0xff]  ;;  %v897_v3 = vadd.f32 %v6079_v6, %v5175_v22 }
 0x1b8   :  { %v1258_v57 = vpop.f32.mrf.mxu0  ;;  %v1074_v17 = vadd.f32 %v6071_v48, %v881_v12  ;;  %v1076_v37 = vadd.f32 %v6073_v39, %v883_v14  ;;  %v6075_v56 = vld [vmem:[#allocation17_spill] sm:$0xff]  ;;  %v893_v14 = vadd.f32 %v6077_v50, %v5181_v18 }
 0x1b9   :  { %1563 = vst [vmem:[#allocation3 + $0x20] sm:$0xff] %v5339_v13  ;;  %v1427_v36 = vmax.f32 %v1375_v52, %v1376_v63  ;;  %v1259_v46 = vadd.f32 %v1258_v57, %v1066_v40  ;;  %2303 = vmatpush1.bf16.msra.mxu1 %v3909_v49  ;;  %v1377_v41 = vmax.f32 %v1257_v28, 0.0  ;;  %v5368_v40 = vpop.f32.mrf.mxu1  ;;  %v1601_v63 = vld [vmem:[#allocation3 + $0x11] sm:$0xff] }
 0x1ba   :  { %v1262_v10 = vpop.f32.mrf.mxu0  ;;  %2304 = vmatprep.subr.bf16.mxu1 %v3914_v42  ;;  %v891_v42 = vadd.f32 %v6075_v56, %v5175_v22  ;;  %v1086_v39 = vadd.f32 %v5222_v25, %v893_v14  ;;  %v1090_v56 = vadd.f32 %v5230_v58, %v897_v3  ;;  %v3929_v58 = vld [vmem:[%s5992_s3 + $0x104] ss:$8 sps:$4 sm:$0xff]  }
 0x1bb   :  { %1459 = vst [vmem:[#allocation2 + $0x60] sm:$0xff] %v1427_v36  ;;  %v1378_v15 = vmax.f32 %v1259_v46, 0.0  ;;  %v1263_v21 = vadd.f32 %v1262_v10, %v1070_v32  ;;  %v1080_v32 = vadd.f32 %v6076_v44, %v887_v2  ;;  %v1673_v46 = vld [vmem:[#allocation3 + $0x14] sm:$0xff] }
 0x1bc   :  { %v1264_v59 = vpop.f32.mrf.mxu0  ;;  %v1084_v27 = vadd.f32 %v5211_v0, %v891_v42  ;;  %v6081_v42 = vld [vmem:[#allocation21_spill] sm:$0xff]  ;;  %v6082_v44 = vld [vmem:[#allocation22_spill] sm:$0xff] }
 0x1bd   :  { %v1428_v19 = vmax.f32 %v1377_v41, %v1378_v15  ;;  %v1265_v35 = vadd.f32 %v1264_v59, %v1072_v34  ;;  %2305 = vmatpush1.bf16.msra.mxu1 %v3912_v11  ;;  %v1379_v33 = vmax.f32 %v1263_v21, 0.0  ;;  %v3918_v11 = vld [vmem:[%s5992_s3 + $0x130] ss:$8 sps:$4 sm:$0xff]   ;;  %v3923_v34 = vld [vmem:[%s5992_s3 + $0x124] ss:$8 sps:$4 sm:$0xff]   ;;  %v5387_v21 = vpop.f32.mrf.mxu1 }
 0x1be   :  { %v1490_v43 = vld [vmem:[#allocation2 + $0x50] ss:$2 sm:$0xff]  ;;  %v1522_v4 = vld [vmem:[#allocation2 + $0x51] ss:$2 sm:$0xff]  ;;  %v1266_v49 = vpop.f32.mrf.mxu0  ;;  %2306 = vmatprep.subr.bf16.mxu1 %v3917_v20  ;;  %v6078_v41 = vld [vmem:[#allocation57_spill] sm:$0xff] }
 0x1bf   :  { %v5370_v62 = vmax.f32 %v1490_v43, %v1522_v4  ;;  %1460 = vst [vmem:[#allocation2 + $0x68] sm:$0xff] %v1428_v19  ;;  %v1380_v7 = vmax.f32 %v1265_v35, 0.0  ;;  %v1267_v26 = vadd.f32 %v1266_v49, %v1074_v17  ;;  %v1082_v15 = vadd.f32 %v6078_v41, %v889_v47  ;;  %v3926_v4 = vld [vmem:[%s5992_s3 + $0x114] ss:$8 sps:$4 sm:$0xff]   ;;  %v5402_v49 = vpop.f32.mrf.mxu1 }
 0x1c0   :  { %v1268_v52 = vpop.f32.mrf.mxu0  ;;  %v1602_v28 = vld [vmem:[#allocation3 + $0x19] sm:$0xff] }
 0x1c1   :  { %v1674_v57 = vld [vmem:[#allocation3 + $0x1c] sm:$0xff]  ;;  %1564 = vst [vmem:[#allocation3 + $0x28] sm:$0xff] %v5370_v62  ;;  %v1429_v55 = vmax.f32 %v1379_v33, %v1380_v7  ;;  %v1269_v12 = vadd.f32 %v1268_v52, %v1076_v37  ;;  %v1616_v36 = vpack.c.bf16 %v1602_v28, %v1601_v63  ;;  %2307 = vmatpush1.bf16.msra.mxu1 %v3915_v29  ;;  %v1381_v59 = vmax.f32 %v1267_v26, 0.0 }
 0x1c2   :  { %v1272_v10 = vpop.f32.mrf.mxu0  ;;  %v1688_v20 = vpack.c.bf16 %v1674_v57, %v1673_v46  ;;  %2308 = vmatprep.subr.bf16.mxu1 %v3920_v45  ;;  %v3921_v29 = vld [vmem:[%s5992_s3 + $0x120] ss:$8 sps:$4 sm:$0xff]   ;;  %v901_v52 = vadd.f32 %v6081_v42, %v5175_v22  ;;  %v3924_v57 = vld [vmem:[%s5992_s3 + $0x110] ss:$8 sps:$4 sm:$0xff]  }
 0x1c3   :  { %1461 = vst [vmem:[#allocation2 + $0x70] sm:$0xff] %v1429_v55  ;;  %v1382_v48 = vmax.f32 %v1269_v12, 0.0  ;;  %v1273_v17 = vadd.f32 %v1272_v10, %v1080_v32  ;;  %2229 = vmatprep.mubr.bf16.mxu1 %v1616_v36  ;;  %v6080_v37 = vld [vmem:[#allocation20_spill] sm:$0xff]  ;;  %v903_v32 = vadd.f32 %v6082_v44, %v5181_v18  ;;  %v5419_v36 = vpop.f32.mrf.mxu1 }
 0x1c4   :  { %2456 = vmatmul.mubr.bf16.gmra.mxu0 %v1688_v20  ;;  %v1274_v2 = vpop.f32.mrf.mxu0  ;;  %2230 = vmatmul.mubr.bf16.gmra.mxu1 %v1592_v5  ;;  %v899_v0 = vadd.f32 %v6080_v37, %v5181_v18  ;;  %v1094_v10 = vadd.f32 %v5246_v53, %v901_v52  ;;  %v6083_v20 = vld [vmem:[#allocation23_spill] sm:$0xff] }
 0x1c5   :  { %v1430_v19 = vmax.f32 %v1381_v59, %v1382_v48  ;;  %v1275_v35 = vadd.f32 %v1274_v2, %v1082_v15  ;;  %2465 = vmatprep.mubr.bf16.mxu0 %v6064_v16  ;;  %2309 = vmatpush1.bf16.msra.mxu1 %v3918_v11  ;;  %v1383_v33 = vmax.f32 %v1273_v17, 0.0  ;;  %v907_v5 = vadd.f32 %v6083_v20, %v5175_v22  ;;  %v3927_v15 = vld [vmem:[%s5992_s3 + $0x100] ss:$8 sps:$4 sm:$0xff]   ;;  %v3932_v53 = vld [vmem:[%s5992_s3 + $0x1f4] ss:$8 sps:$4 sm:$0xff]   ;;  %v5433_v6 = vpop.f32.mrf.mxu1 }
 0x1c6   :  { %v1492_v61 = vld [vmem:[#allocation2 + $0x60] ss:$2 sm:$0xff]  ;;  %v1524_v47 = vld [vmem:[#allocation2 + $0x61] ss:$2 sm:$0xff]  ;;  %v1276_v43 = vpop.f32.mrf.mxu0  ;;  %2310 = vmatprep.subr.bf16.mxu1 %v3923_v34  ;;  %v1092_v12 = vadd.f32 %v5238_v8, %v899_v0  ;;  %v1096_v8 = vadd.f32 %v5257_v30, %v903_v32 }
 0x1c7   :  { %v5404_v45 = vmax.f32 %v1492_v61, %v1524_v47  ;;  %1462 = vst [vmem:[#allocation2 + $0x78] sm:$0xff] %v1430_v19  ;;  %v1384_v7 = vmax.f32 %v1275_v35, 0.0  ;;  %v1277_v26 = vadd.f32 %v1276_v43, %v1084_v27  ;;  %v6084_v59 = vld [vmem:[#allocation24_spill] sm:$0xff]  ;;  %v6085_v30 = vld [vmem:[#allocation25_spill] sm:$0xff]  ;;  %v1100_v43 = vadd.f32 %v5265_v31, %v907_v5  ;;  %v5452_v44 = vpop.f32.mrf.mxu1 }
 0x1c8   :  { %v1278_v25 = vpop.f32.mrf.mxu0  ;;  %v909_v48 = vadd.f32 %v6084_v59, %v5181_v18  ;;  %v1603_v0 = vld [vmem:[#allocation3 + $0x21] sm:$0xff] }
 0x1c9   :  { %1565 = vst [vmem:[#allocation3 + $0x30] sm:$0xff] %v5404_v45  ;;  %v1431_v63 = vmax.f32 %v1383_v33, %v1384_v7  ;;  %v1279_v28 = vadd.f32 %v1278_v25, %v1086_v39  ;;  %2311 = vmatpush1.bf16.msra.mxu1 %v3921_v29  ;;  %v1385_v46 = vmax.f32 %v1277_v26, 0.0  ;;  %v911_v39 = vadd.f32 %v6085_v30, %v5175_v22  ;;  %v1675_v26 = vld [vmem:[#allocation3 + $0x24] sm:$0xff]  ;;  %v3930_v25 = vld [vmem:[%s5992_s3 + $0x1f0] ss:$8 sps:$4 sm:$0xff]  }
 0x1ca   :  { %v1282_v55 = vpop.f32.mrf.mxu0  ;;  %2312 = vmatprep.subr.bf16.mxu1 %v3926_v4  ;;  %v3935_v31 = vld [vmem:[%s5992_s3 + $0x1e4] ss:$8 sps:$4 sm:$0xff]   ;;  %v6090_v30 = vld [vmem:[#allocation31_spill] sm:$0xff] }
 0x1cb   :  { %1463 = vst [vmem:[#allocation2 + $0x80] sm:$0xff] %v1431_v63  ;;  %v1386_v11 = vmax.f32 %v1279_v28, 0.0  ;;  %v1283_v50 = vadd.f32 %v1282_v55, %v1090_v56  ;;  %v6086_v56 = vld [vmem:[#allocation26_spill] sm:$0xff]  ;;  %v1593_v28 = vpack.c.bf16 %v5370_v62, %v5339_v13  ;;  %v6087_v13 = vld [vmem:[#allocation27_spill] sm:$0xff] }
 0x1cc   :  { %v1284_v14 = vpop.f32.mrf.mxu0  ;;  %v913_v42 = vadd.f32 %v6086_v56, %v5181_v18  ;;  %v917_v62 = vadd.f32 %v6087_v13, %v5175_v22 }
 0x1cd   :  { %v1432_v34 = vmax.f32 %v1385_v46, %v1386_v11  ;;  %v1285_v41 = vadd.f32 %v1284_v14, %v1092_v12  ;;  %2313 = vmatpush1.bf16.msra.mxu1 %v3924_v57  ;;  %v1387_v19 = vmax.f32 %v1283_v50, 0.0  ;;  %v1102_v57 = vadd.f32 %v5276_v9, %v909_v48  ;;  %v3933_v9 = vld [vmem:[%s5992_s3 + $0x1e0] ss:$8 sps:$4 sm:$0xff]  }
 0x1ce   :  { %v1494_v17 = vld [vmem:[#allocation2 + $0x70] ss:$2 sm:$0xff]  ;;  %v1526_v27 = vld [vmem:[#allocation2 + $0x71] ss:$2 sm:$0xff]  ;;  %v1286_v2 = vpop.f32.mrf.mxu0  ;;  %2314 = vmatprep.subr.bf16.mxu1 %v3929_v58  ;;  %v1104_v12 = vadd.f32 %v5284_v60, %v911_v39  ;;  %v1106_v14 = vadd.f32 %v5295_v24, %v913_v42  ;;  %v923_v39 = vadd.f32 %v6090_v30, %v5181_v18 }
 0x1cf   :  { %v5435_v3 = vmax.f32 %v1494_v17, %v1526_v27  ;;  %1464 = vst [vmem:[#allocation2 + $0x88] sm:$0xff] %v1432_v34  ;;  %v1388_v35 = vmax.f32 %v1285_v41, 0.0  ;;  %v1287_v29 = vadd.f32 %v1286_v2, %v1094_v10  ;;  %v6088_v10 = vld [vmem:[#allocation28_spill] sm:$0xff]  ;;  %v3938_v41 = vld [vmem:[%s5992_s3 + $0x1d4] ss:$8 sps:$4 sm:$0xff]   ;;  %v1110_v27 = vadd.f32 %v5303_v51, %v917_v62  ;;  %v6089_v2 = vld [vmem:[#allocation29_spill] sm:$0xff] }
 0x1d0   :  { %v1288_v37 = vpop.f32.mrf.mxu0  ;;  %v1604_v61 = vld [vmem:[#allocation3 + $0x29] sm:$0xff]  ;;  %v919_v60 = vadd.f32 %v6088_v10, %v5181_v18 }
 0x1d1   :  { %v1676_v47 = vld [vmem:[#allocation3 + $0x2c] sm:$0xff]  ;;  %1566 = vst [vmem:[#allocation3 + $0x38] sm:$0xff] %v5435_v3  ;;  %v1433_v4 = vmax.f32 %v1387_v19, %v1388_v35  ;;  %v1289_v33 = vadd.f32 %v1288_v37, %v1096_v8  ;;  %v1617_v7 = vpack.c.bf16 %v1604_v61, %v1603_v0  ;;  %2315 = vmatpush1.bf16.msra.mxu1 %v3927_v15  ;;  %v1389_v32 = vmax.f32 %v1287_v29, 0.0  ;;  %v5467_v15 = vpop.f32.mrf.mxu1 }
 0x1d2   :  { %v1292_v52 = vpop.f32.mrf.mxu0  ;;  %v1689_v63 = vpack.c.bf16 %v1676_v47, %v1675_v26  ;;  %2316 = vmatprep.subr.bf16.mxu1 %v3932_v53  ;;  %v921_v53 = vadd.f32 %v6089_v2, %v5175_v22  ;;  %v3936_v29 = vld [vmem:[%s5992_s3 + $0x1d0] ss:$8 sps:$4 sm:$0xff]   ;;  %v3941_v51 = vld [vmem:[%s5992_s3 + $0x1c4] ss:$8 sps:$4 sm:$0xff]   ;;  %v1112_v0 = vadd.f32 %v5322_v1, %v919_v60  ;;  %v1116_v1 = vadd.f32 %v5354_v23, %v923_v39 }
 0x1d3   :  { %1465 = vst [vmem:[#allocation2 + $0x90] sm:$0xff] %v1433_v4  ;;  %v1390_v55 = vmax.f32 %v1289_v33, 0.0  ;;  %v1293_v58 = vadd.f32 %v1292_v52, %v1100_v43  ;;  %2239 = vmatprep.mubr.bf16.mxu1 %v1617_v7  ;;  %v5484_v61 = vpop.f32.mrf.mxu1  ;;  %v6091_v26 = vld [vmem:[#allocation32_spill] sm:$0xff]  ;;  %v6093_v23 = vld [vmem:[#allocation35_spill] sm:$0xff] }
 0x1d4   :  { %2466 = vmatmul.mubr.bf16.gmra.mxu0 %v1689_v63  ;;  %v1294_v46 = vpop.f32.mrf.mxu0  ;;  %2240 = vmatmul.mubr.bf16.gmra.mxu1 %v1593_v28  ;;  %v1114_v7 = vadd.f32 %v5337_v54, %v921_v53  ;;  %v3939_v52 = vld [vmem:[%s5992_s3 + $0x1c0] ss:$8 sps:$4 sm:$0xff]   ;;  %v6092_v63 = vld [vmem:[#allocation34_spill] sm:$0xff]  ;;  %v931_v62 = vadd.f32 %v6093_v23, %v5175_v22 }
 0x1d5   :  { %v1434_v11 = vmax.f32 %v1389_v32, %v1390_v55  ;;  %v1295_v50 = vadd.f32 %v1294_v46, %v1102_v57  ;;  %2475 = vmatprep.mubr.bf16.mxu0 %v6064_v16  ;;  %2317 = vmatpush2.bf16.msra.mxu1 %v3930_v25  ;;  %v1391_v59 = vmax.f32 %v1293_v58, 0.0  ;;  %v927_v25 = vadd.f32 %v6091_v26, %v5175_v22  ;;  %v3944_v54 = vld [vmem:[%s5992_s3 + $0x1b4] ss:$8 sps:$4 sm:$0xff]   ;;  %v5498_v55 = vpop.f32.mrf.mxu1 }
 0x1d6   :  { %v1496_v20 = vld [vmem:[#allocation2 + $0x80] ss:$2 sm:$0xff]  ;;  %v1528_v5 = vld [vmem:[#allocation2 + $0x81] ss:$2 sm:$0xff]  ;;  %v1296_v34 = vpop.f32.mrf.mxu0  ;;  %2318 = vmatprep.subr.bf16.mxu1 %v3935_v31  ;;  %v929_v28 = vadd.f32 %v6092_v63, %v5181_v18  ;;  %v1124_v30 = vadd.f32 %v5402_v49, %v931_v62 }
 0x1d7   :  { %v5469_v8 = vmax.f32 %v1496_v20, %v1528_v5  ;;  %1466 = vst [vmem:[#allocation2 + $0x98] sm:$0xff] %v1434_v11  ;;  %v1392_v48 = vmax.f32 %v1295_v50, 0.0  ;;  %v1297_v17 = vadd.f32 %v1296_v34, %v1104_v12  ;;  %v1120_v10 = vadd.f32 %v5368_v40, %v927_v25  ;;  %v3947_v40 = vld [vmem:[%s5992_s3 + $0x1a4] ss:$8 sps:$4 sm:$0xff]   ;;  %v5517_v53 = vpop.f32.mrf.mxu1 }
 0x1d8   :  { %v1298_v24 = vpop.f32.mrf.mxu0  ;;  %v1605_v50 = vld [vmem:[#allocation3 + $0x31] sm:$0xff]  ;;  %v1122_v2 = vadd.f32 %v5387_v21, %v929_v28  ;;  %v3945_v21 = vld [vmem:[%s5992_s3 + $0x1a0] ss:$8 sps:$4 sm:$0xff]  }
 0x1d9   :  { %1567 = vst [vmem:[#allocation3 + $0x40] sm:$0xff] %v5469_v8  ;;  %v1435_v19 = vmax.f32 %v1391_v59, %v1392_v48  ;;  %v1299_v35 = vadd.f32 %v1298_v24, %v1106_v14  ;;  %2319 = vmatpush2.bf16.msra.mxu1 %v3933_v9  ;;  %v1393_v47 = vmax.f32 %v1297_v17, 0.0  ;;  %v1677_v34 = vld [vmem:[#allocation3 + $0x34] sm:$0xff]  ;;  %v6094_v59 = vld [vmem:[#allocation37_spill] sm:$0xff]  ;;  %v5532_v26 = vpop.f32.mrf.mxu1 }
 0x1da   :  { %v1302_v37 = vpop.f32.mrf.mxu0  ;;  %2320 = vmatprep.subr.bf16.mxu1 %v3938_v41  ;;  %v3942_v41 = vld [vmem:[%s5992_s3 + $0x1b0] ss:$8 sps:$4 sm:$0xff]   ;;  %v933_v48 = vadd.f32 %v6094_v59, %v5181_v18  ;;  %v6097_v63 = vld [vmem:[#allocation41_spill] sm:$0xff] }
 0x1db   :  { %1467 = vst [vmem:[#allocation2 + $0xa0] sm:$0xff] %v1435_v19  ;;  %v1394_v43 = vmax.f32 %v1299_v35, 0.0  ;;  %v1303_v4 = vadd.f32 %v1302_v37, %v1110_v27  ;;  %v1594_v27 = vpack.c.bf16 %v5435_v3, %v5404_v45  ;;  %v6095_v45 = vld [vmem:[#allocation38_spill] sm:$0xff]  ;;  %v941_v28 = vadd.f32 %v6097_v63, %v5175_v22  ;;  %v1145_v23 = vpop.f32.mrf.mxu1  ;;  %v6103_v63 = vld [vmem:[#allocation51_spill] sm:$0xff] }
 0x1dc   :  { %v1304_v33 = vpop.f32.mrf.mxu0  ;;  %v937_v3 = vadd.f32 %v6095_v45, %v5175_v22  ;;  %v6101_v45 = vld [vmem:[#allocation48_spill] sm:$0xff] }
 0x1dd   :  { %v1436_v56 = vmax.f32 %v1393_v47, %v1394_v43  ;;  %v1305_v42 = vadd.f32 %v1304_v33, %v1112_v0  ;;  %2321 = vmatpush2.bf16.msra.mxu1 %v3936_v29  ;;  %v1395_v12 = vmax.f32 %v1303_v4, 0.0  ;;  %v1126_v0 = vadd.f32 %v5419_v36, %v933_v48  ;;  %v6096_v47 = vld [vmem:[#allocation40_spill] sm:$0xff] }
 0x1de   :  { %v1498_v31 = vld [vmem:[#allocation2 + $0x90] ss:$2 sm:$0xff]  ;;  %v1530_v57 = vld [vmem:[#allocation2 + $0x91] ss:$2 sm:$0xff]  ;;  %v1306_v32 = vpop.f32.mrf.mxu0  ;;  %2322 = vmatprep.subr.bf16.mxu1 %v3941_v51  ;;  %v939_v49 = vadd.f32 %v6096_v47, %v5181_v18 }
 0x1df   :  { %v5500_v58 = vmax.f32 %v1498_v31, %v1530_v57  ;;  %1468 = vst [vmem:[#allocation2 + $0xa8] sm:$0xff] %v1436_v56  ;;  %v1396_v46 = vmax.f32 %v1305_v42, 0.0  ;;  %v1307_v13 = vadd.f32 %v1306_v32, %v1114_v7  ;;  %v3950_v7 = vld [vmem:[%s5992_s3 + $0x194] ss:$8 sps:$4 sm:$0xff]   ;;  %v3948_v32 = vld [vmem:[%s5992_s3 + $0x190] ss:$8 sps:$4 sm:$0xff]  }
 0x1e0   :  { %v1308_v11 = vpop.f32.mrf.mxu0  ;;  %v1606_v9 = vld [vmem:[#allocation3 + $0x39] sm:$0xff]  ;;  %v6102_v47 = vld [vmem:[#allocation50_spill] sm:$0xff] }
 0x1e1   :  { %v1678_v14 = vld [vmem:[#allocation3 + $0x3c] sm:$0xff]  ;;  %1568 = vst [vmem:[#allocation3 + $0x48] sm:$0xff] %v5500_v58  ;;  %v1437_v60 = vmax.f32 %v1395_v12, %v1396_v46  ;;  %v1309_v20 = vadd.f32 %v1308_v11, %v1116_v1  ;;  %v1618_v5 = vpack.c.bf16 %v1606_v9, %v1605_v50  ;;  %2323 = vmatpush2.bf16.msra.mxu1 %v3939_v52  ;;  %v1397_v19 = vmax.f32 %v1307_v13, 0.0  ;;  %v6099_v9 = vld [vmem:[#allocation45_spill] sm:$0xff] }
 0x1e2   :  { %v1312_v17 = vpop.f32.mrf.mxu0  ;;  %v1690_v24 = vpack.c.bf16 %v1678_v14, %v1677_v34  ;;  %2324 = vmatprep.subr.bf16.mxu1 %v3944_v54  ;;  %v1130_v1 = vadd.f32 %v5433_v6, %v937_v3  ;;  %v6098_v54 = vld [vmem:[#allocation43_spill] sm:$0xff]  ;;  %v3953_v6 = vld [vmem:[%s5992_s3 + $0x184] ss:$8 sps:$4 sm:$0xff]   ;;  %v1132_v13 = vadd.f32 %v5452_v44, %v939_v49  ;;  %v947_v14 = vadd.f32 %v6099_v9, %v5175_v22  ;;  %v3951_v34 = vld [vmem:[%s5992_s3 + $0x180] ss:$8 sps:$4 sm:$0xff]  }
 0x1e3   :  { %1469 = vst [vmem:[#allocation2 + $0xb0] sm:$0xff] %v1437_v60  ;;  %v1398_v35 = vmax.f32 %v1309_v20, 0.0  ;;  %v1313_v29 = vadd.f32 %v1312_v17, %v1120_v10  ;;  %2249 = vmatprep.mubr.bf16.mxu1 %v1618_v5  ;;  %v943_v12 = vadd.f32 %v6098_v54, %v5181_v18  ;;  %v1134_v60 = vadd.f32 %v5467_v15, %v941_v28  ;;  %v6105_v9 = vld [vmem:[#allocation54_spill] sm:$0xff] }
 0x1e4   :  { %2476 = vmatmul.mubr.bf16.gmra.mxu0 %v1690_v24  ;;  %v1314_v39 = vpop.f32.mrf.mxu0  ;;  %2250 = vmatmul.mubr.bf16.gmra.mxu1 %v1594_v27  ;;  %v1149_v27 = vpop.f32.mrf.mxu1  ;;  %v951_v3 = vadd.f32 %v6101_v45, %v5175_v22  ;;  %v953_v49 = vadd.f32 %v6102_v47, %v5181_v18  ;;  %v957_v28 = vadd.f32 %v6103_v63, %v5175_v22 }
 0x1e5   :  { %v1438_v37 = vmax.f32 %v1397_v19, %v1398_v35  ;;  %v1315_v51 = vadd.f32 %v1314_v39, %v1122_v2  ;;  %2485 = vmatprep.mubr.bf16.mxu0 %v6064_v16  ;;  %2325 = vmatpush2.bf16.msra.mxu1 %v3942_v41  ;;  %v1399_v56 = vmax.f32 %v1313_v29, 0.0  ;;  %v1136_v44 = vadd.f32 %v5484_v61, %v943_v12  ;;  %v6100_v41 = vld [vmem:[#allocation47_spill] sm:$0xff] }
 0x1e6   :  { %v1500_v43 = vld [vmem:[#allocation2 + $0xa0] ss:$2 sm:$0xff]  ;;  %v1532_v4 = vld [vmem:[#allocation2 + $0xa1] ss:$2 sm:$0xff]  ;;  %v1316_v33 = vpop.f32.mrf.mxu0  ;;  %2326 = vmatprep.subr.bf16.mxu1 %v3947_v40  ;;  %v949_v59 = vadd.f32 %v6100_v41, %v5181_v18  ;;  %v1140_v35 = vadd.f32 %v5498_v55, %v947_v14  ;;  %v1595_v55 = vpack.c.bf16 %v5500_v58, %v5469_v8  ;;  %v1146_v8 = vadd.f32 %v1145_v23, %v953_v49 }
 0x1e7   :  { %v5534_v25 = vmax.f32 %v1500_v43, %v1532_v4  ;;  %1470 = vst [vmem:[#allocation2 + $0xb8] sm:$0xff] %v1438_v37  ;;  %v1400_v42 = vmax.f32 %v1315_v51, 0.0  ;;  %v1317_v52 = vadd.f32 %v1316_v33, %v1124_v30  ;;  %v6104_v58 = vld [vmem:[#allocation53_spill] sm:$0xff]  ;;  %v961_v14 = vadd.f32 %v6105_v9, %v5175_v22  ;;  %v1650_v9 = vld [vmem:[#allocation3 + $0x1b] sm:$0xff] }
 0x1e8   :  { %v1318_v36 = vpop.f32.mrf.mxu0  ;;  %v1607_v30 = vld [vmem:[#allocation3 + $0x41] sm:$0xff]  ;;  %v1142_v33 = vadd.f32 %v5517_v53, %v949_v59  ;;  %v959_v53 = vadd.f32 %v6104_v58, %v5181_v18  ;;  %v1648_v58 = vld [vmem:[#allocation3 + $0xb] sm:$0xff] }
 0x1e9   :  { %1569 = vst [vmem:[#allocation3 + $0x50] sm:$0xff] %v5534_v25  ;;  %v1439_v31 = vmax.f32 %v1399_v56, %v1400_v42  ;;  %v1319_v57 = vadd.f32 %v1318_v36, %v1126_v0  ;;  %2327 = vmatpush2.bf16.msra.mxu1 %v3945_v21  ;;  %v1401_v62 = vmax.f32 %v1317_v52, 0.0  ;;  %v1679_v0 = vld [vmem:[#allocation3 + $0x44] sm:$0xff] }
 0x1ea   :  { %v1322_v46 = vpop.f32.mrf.mxu0  ;;  %2328 = vmatprep.subr.bf16.mxu1 %v3950_v7  ;;  %v1151_v7 = vpop.f32.mrf.mxu1 }
 0x1eb   :  { %1471 = vst [vmem:[#allocation2 + $0xc0] sm:$0xff] %v1439_v31  ;;  %v1402_v11 = vmax.f32 %v1319_v57, 0.0  ;;  %v1323_v50 = vadd.f32 %v1322_v46, %v1130_v1  ;;  %v1144_v1 = vadd.f32 %v5532_v26, %v951_v3 }
 0x1ec   :  { %v1324_v10 = vpop.f32.mrf.mxu0  ;;  %v1153_v46 = vpop.f32.mrf.mxu1 }
 0x1ed   :  { %v1440_v20 = vmax.f32 %v1401_v62, %v1402_v11  ;;  %v1325_v5 = vadd.f32 %v1324_v10, %v1132_v13  ;;  %2329 = vmatpush2.bf16.msra.mxu1 %v3948_v32  ;;  %v1403_v15 = vmax.f32 %v1323_v50, 0.0  ;;  %v1150_v50 = vadd.f32 %v1149_v27, %v957_v28 }
 0x1ee   :  { %v1502_v48 = vld [vmem:[#allocation2 + $0xb0] ss:$2 sm:$0xff]  ;;  %v1534_v17 = vld [vmem:[#allocation2 + $0xb1] ss:$2 sm:$0xff]  ;;  %v1326_v24 = vpop.f32.mrf.mxu0  ;;  %2330 = vmatprep.subr.bf16.mxu1 %v3953_v6 }
 0x1ef   :  { %v5558_v40 = vmax.f32 %v1502_v48, %v1534_v17  ;;  %1472 = vst [vmem:[#allocation2 + $0xc8] sm:$0xff] %v1440_v20  ;;  %v1404_v2 = vmax.f32 %v1325_v5, 0.0  ;;  %v1327_v19 = vadd.f32 %v1326_v24, %v1134_v60  ;;  %v6106_v60 = vld [vmem:[#allocation56_spill] sm:$0xff]  ;;  %v1154_v24 = vadd.f32 %v1153_v46, %v961_v14 }
 0x1f0   :  { %v1328_v29 = vpop.f32.mrf.mxu0  ;;  %v1608_v39 = vld [vmem:[#allocation3 + $0x49] sm:$0xff]  ;;  %v963_v20 = vadd.f32 %v6106_v60, %v5181_v18  ;;  %v1626_v60 = vld [vmem:[#allocation3 + $0x1a] sm:$0xff] }
 0x1f1   :  { %v1680_v61 = vld [vmem:[#allocation3 + $0x4c] sm:$0xff]  ;;  %1570 = vst [vmem:[#allocation3 + $0x58] sm:$0xff] %v5558_v40  ;;  %v1441_v37 = vmax.f32 %v1403_v15, %v1404_v2  ;;  %v1329_v51 = vadd.f32 %v1328_v29, %v1136_v44  ;;  %v1619_v21 = vpack.c.bf16 %v1608_v39, %v1607_v30  ;;  %2331 = vmatpush2.bf16.msra.mxu1 %v3951_v34  ;;  %v1405_v56 = vmax.f32 %v1327_v19, 0.0  ;;  %v1155_v44 = vpop.f32.mrf.mxu1  ;;  %v1623_v14 = vld [vmem:[#allocation3 + $0x2] sm:$0xff] }
 0x1f2   :  { %v1332_v43 = vpop.f32.mrf.mxu0  ;;  %v1691_v4 = vpack.c.bf16 %v1680_v61, %v1679_v0  ;;  %v1152_v34 = vadd.f32 %v1151_v7, %v959_v53  ;;  %v1156_v2 = vadd.f32 %v1155_v44, %v963_v20  ;;  %v1652_v20 = vld [vmem:[#allocation3 + $0x2b] sm:$0xff]  ;;  %v1651_v44 = vld [vmem:[#allocation3 + $0x23] sm:$0xff] }
 0x1f3   :  { %1473 = vst [vmem:[#allocation2 + $0xd0] sm:$0xff] %v1441_v37  ;;  %v1406_v42 = vmax.f32 %v1329_v51, 0.0  ;;  %v1333_v52 = vadd.f32 %v1332_v43, %v1140_v35  ;;  %2259 = vmatprep.mubr.bf16.mxu1 %v1619_v21  ;;  %v1596_v43 = vpack.c.bf16 %v5558_v40, %v5534_v25 }
 0x1f4   :  { %2486 = vmatmul.mubr.bf16.gmra.mxu0 %v1691_v4  ;;  %v1334_v36 = vpop.f32.mrf.mxu0  ;;  %2260 = vmatmul.mubr.bf16.gmra.mxu1 %v1595_v55 }
 0x1f5   :  { %v1442_v31 = vmax.f32 %v1405_v56, %v1406_v42  ;;  %v1335_v57 = vadd.f32 %v1334_v36, %v1142_v33  ;;  %2495 = vmatprep.mubr.bf16.mxu0 %v6064_v16  ;;  %v1407_v13 = vmax.f32 %v1333_v52, 0.0 }
 0x1f6   :  { %v1504_v32 = vld [vmem:[#allocation2 + $0xc0] ss:$2 sm:$0xff]  ;;  %v1536_v54 = vld [vmem:[#allocation2 + $0xc1] ss:$2 sm:$0xff]  ;;  %v1336_v12 = vpop.f32.mrf.mxu0 }
 0x1f7   :  { %v5575_v6 = vmax.f32 %v1504_v32, %v1536_v54  ;;  %1474 = vst [vmem:[#allocation2 + $0xd8] sm:$0xff] %v1442_v31  ;;  %v1408_v26 = vmax.f32 %v1335_v57, 0.0  ;;  %v1337_v62 = vadd.f32 %v1336_v12, %v1144_v1 }
 0x1f8   :  { %v1338_v11 = vpop.f32.mrf.mxu0  ;;  %v1609_v45 = vld [vmem:[#allocation3 + $0x51] sm:$0xff] }
 0x1f9   :  { %1571 = vst [vmem:[#allocation3 + $0x60] sm:$0xff] %v5575_v6  ;;  %v1443_v23 = vmax.f32 %v1407_v13, %v1408_v26  ;;  %v1339_v10 = vadd.f32 %v1338_v11, %v1146_v8  ;;  %v1409_v41 = vmax.f32 %v1337_v62, 0.0  ;;  %v1681_v47 = vld [vmem:[#allocation3 + $0x54] sm:$0xff]  ;;  %v1647_v11 = vld [vmem:[#allocation3 + $0x3] sm:$0xff] }
 0x1fa   :  { %v1342_v5 = vpop.f32.mrf.mxu0 }
 0x1fb   :  { %1475 = vst [vmem:[#allocation2 + $0xe0] sm:$0xff] %v1443_v23  ;;  %v1410_v59 = vmax.f32 %v1339_v10, 0.0  ;;  %v1343_v48 = vadd.f32 %v1342_v5, %v1150_v50  ;;  %v1663_v50 = vpack.c.bf16 %v1648_v58, %v1647_v11  ;;  %v1625_v5 = vld [vmem:[#allocation3 + $0x12] sm:$0xff] }
 0x1fc   :  { %v1344_v17 = vpop.f32.mrf.mxu0  ;;  %v3955_v58 = vld [vmem:[%s5994_s5 + $0x38] sm:$0xff]  }
 0x1fd   :  { %v1444_v27 = vmax.f32 %v1409_v41, %v1410_v59  ;;  %v1345_v15 = vadd.f32 %v1344_v17, %v1152_v34  ;;  %v1411_v30 = vmax.f32 %v1343_v48, 0.0  ;;  %v1640_v34 = vpack.c.bf16 %v1626_v60, %v1625_v5  ;;  %v1628_v59 = vld [vmem:[#allocation3 + $0x2a] sm:$0xff]  ;;  %v1654_v48 = vld [vmem:[#allocation3 + $0x3b] sm:$0xff] }
 0x1fe   :  { %v1506_v22 = vld [vmem:[#allocation2 + $0xd0] ss:$2 sm:$0xff]  ;;  %v1538_v19 = vld [vmem:[#allocation2 + $0xd1] ss:$2 sm:$0xff]  ;;  %v1346_v35 = vpop.f32.mrf.mxu0  ;;  %v1665_v41 = vpack.c.bf16 %v1652_v20, %v1651_v44  ;;  %v1627_v17 = vld [vmem:[#allocation3 + $0x22] sm:$0xff] }
 0x1ff   :  { %v1556_v29 = vmax.f32 %v1506_v22, %v1538_v19  ;;  %1476 = vst [vmem:[#allocation2 + $0xe8] sm:$0xff] %v1444_v27  ;;  %v1412_v39 = vmax.f32 %v1345_v15, 0.0  ;;  %v1347_v18 = vadd.f32 %v1346_v35, %v1154_v24  ;;  %v1641_v24 = vpack.c.bf16 %v1628_v59, %v1627_v17  ;;  %v1653_v27 = vld [vmem:[#allocation3 + $0x33] sm:$0xff]  ;;  %v1656_v22 = vld [vmem:[#allocation3 + $0x4b] sm:$0xff]  ;;  %v3969_v20 = vld [vmem:[%s5994_s5 + $0x120] sm:$0xff]  }
 0x200   :  { %v1348_v61 = vpop.f32.mrf.mxu0  ;;  %v1610_v3 = vld [vmem:[#allocation3 + $0x59] sm:$0xff]  ;;  %v1666_v15 = vpack.c.bf16 %v1654_v48, %v1653_v27  ;;  %v3968_v17 = vld [vmem:[%s5994_s5 + $0x10] sm:$0xff]  }
 0x201   :  { %v1682_v37 = vld [vmem:[#allocation3 + $0x5c] sm:$0xff]  ;;  %1572 = vst [vmem:[#allocation3 + $0x68] sm:$0xff] %v1556_v29  ;;  %v1445_v51 = vmax.f32 %v1411_v30, %v1412_v39  ;;  %v1349_v21 = vadd.f32 %v1348_v61, %v1156_v2  ;;  %v1620_v0 = vpack.c.bf16 %v1610_v3, %v1609_v45  ;;  %v1413_v4 = vmax.f32 %v1347_v18, 0.0  ;;  %v1629_v19 = vld [vmem:[#allocation3 + $0x32] sm:$0xff]  ;;  %v1632_v39 = vld [vmem:[#allocation3 + $0x4a] sm:$0xff] }
 0x202   :  { %v1692_v49 = vpack.c.bf16 %v1682_v37, %v1681_v47  ;;  %v1597_v8 = vpack.c.bf16 %v1556_v29, %v5575_v6  ;;  %v1624_v6 = vld [vmem:[#allocation3 + $0xa] sm:$0xff]  ;;  %v1630_v2 = vld [vmem:[#allocation3 + $0x3a] sm:$0xff]  ;;  %v1631_v61 = vld [vmem:[#allocation3 + $0x42] sm:$0xff] }
 0x203   :  { %1477 = vst [vmem:[#allocation2 + $0xf0] sm:$0xff] %v1445_v51  ;;  %v1414_v55 = vmax.f32 %v1349_v21, 0.0  ;;  %2269 = vmatprep.mubr.bf16.mxu1 %v1620_v0  ;;  %v1639_v23 = vpack.c.bf16 %v1624_v6, %v1623_v14  ;;  %v1642_v35 = vpack.c.bf16 %v1630_v2, %v1629_v19  ;;  %v1655_v29 = vld [vmem:[#allocation3 + $0x43] sm:$0xff]  ;;  %v1658_v18 = vld [vmem:[#allocation3 + $0x5b] sm:$0xff]  ;;  %v1643_v45 = vpack.c.bf16 %v1632_v39, %v1631_v61  ;;  %v1657_v3 = vld [vmem:[#allocation3 + $0x53] sm:$0xff] }
 0x204   :  { %2496 = vmatmul.mubr.bf16.gmra.mxu0 %v1692_v49  ;;  %2270 = vmatmul.mubr.bf16.gmra.mxu1 %v1596_v43  ;;  %v1667_v30 = vpack.c.bf16 %v1656_v22, %v1655_v29  ;;  %v1668_v37 = vpack.c.bf16 %v1658_v18, %v1657_v3  ;;  %v1634_v51 = vld [vmem:[#allocation3 + $0x5a] sm:$0xff]  ;;  %v1633_v0 = vld [vmem:[#allocation3 + $0x52] sm:$0xff]  ;;  %v3972_v19 = vld [vmem:[%s5994_s5 + $0x8] sm:$0xff]  }
 0x205   :  { %v1446_v33 = vmax.f32 %v1413_v4, %v1414_v55  ;;  %2505 = vmatprep.mubr.bf16.mxu0 %v6064_v16  ;;  %v1644_v47 = vpack.c.bf16 %v1634_v51, %v1633_v0  ;;  %v3963_v11 = vld [vmem:[%s5994_s5 + $0x138] sm:$0xff]   ;;  %v3965_v6 = vld [vmem:[%s5994_s5 + $0x130] sm:$0xff]   ;;  %v3975_v29 = vld [vmem:[%s5994_s5 + $0x108] sm:$0xff]  }
 0x206   :  { %v1508_v7 = vld [vmem:[#allocation2 + $0xe0] ss:$2 sm:$0xff]  ;;  %v1540_v56 = vld [vmem:[#allocation2 + $0xe1] ss:$2 sm:$0xff]  ;;  %3651 = vmatpush3.bf16.msra.mxu0 %v3963_v11  ;;  %v3962_v5 = vld [vmem:[%s5994_s5 + $0x58] sm:$0xff]  }
 0x207   :  { %v1557_v42 = vmax.f32 %v1508_v7, %v1540_v56  ;;  %1478 = vst [vmem:[#allocation2 + $0xf8] sm:$0xf] %v1446_v33  ;;  %3652 = vmatprep.subr.bf16.mxu0 %v6007_v38  ;;  %v3964_v44 = vld [vmem:[%s5994_s5 + $0x18] sm:$0xff]   ;;  %v3973_v27 = vld [vmem:[%s5994_s5 + $0x110] sm:$0xff]   ;;  %v3976_v18 = vld [vmem:[%s5994_s5] sm:$0xff]  }
 0x208   :  { %v1611_v63 = vld [vmem:[#allocation3 + $0x61] sm:$0xff]  ;;  %v3971_v59 = vld [vmem:[%s5994_s5 + $0x118] sm:$0xff]  }
 0x209   :  { %1573 = vst [vmem:[#allocation3 + $0x70] sm:$0xff] %v1557_v42  ;;  %v1683_v25 = vld [vmem:[#allocation3 + $0x64] sm:$0xff] }
 0x20a   :  { %v1659_v49 = vld [vmem:[#allocation3 + $0x63] sm:$0xff]  ;;  %3653 = vmatpush3.bf16.msra.mxu0 %v3965_v6 }
 0x20b   :  { %v1635_v7 = vld [vmem:[#allocation3 + $0x62] sm:$0xff]  ;;  %3654 = vmatprep.subr.bf16.mxu0 %v6007_v38 }
 0x20c   :  { %v3977_v61 = vld [vmem:[%s5994_s5 + $0x100] sm:$0xff]  }
 0x20d   :  { %v6107_v11 = vld [vmem:[#allocation44_spill] sm:$0xff] }
 0x20e   :  { %v1510_v52 = vld [vmem:[#allocation2 + $0xf0] ss:$2 sm:$0xff]  ;;  %v1542_v36 = vld [vmem:[#allocation2 + $0xf1] ss:$2 sm:$0xff]  ;;  %v6108_v6 = vsub.s32 0, %v6107_v11 }
 0x20f   :  { %v1558_v1 = vmax.f32 %v1510_v52, %v1542_v36 }
 0x210   :  { %v1612_v28 = vld [vmem:[#allocation3 + $0x69] sm:$0xff] }
 0x211   :  { %v1684_v40 = vld [vmem:[#allocation3 + $0x6c] sm:$0xff]  ;;  %1574 = vst [vmem:[#allocation3 + $0x78] sm:$0xff] %v1558_v1  ;;  %v1621_v31 = vpack.c.bf16 %v1612_v28, %v1611_v63 }
 0x212   :  { %v1693_v57 = vpack.c.bf16 %v1684_v40, %v1683_v25  ;;  %v1660_v21 = vld [vmem:[#allocation3 + $0x6b] sm:$0xff] }
 0x213   :  { %2279 = vmatprep.mubr.bf16.mxu1 %v1621_v31  ;;  %v1669_v43 = vpack.c.bf16 %v1660_v21, %v1659_v49  ;;  %v1636_v4 = vld [vmem:[#allocation3 + $0x6a] sm:$0xff] }
 0x214   :  { %2506 = vmatmul.mubr.bf16.gmra.mxu0 %v1693_v57  ;;  %2280 = vmatmul.mubr.bf16.gmra.mxu1 %v1597_v8  ;;  %v1645_v56 = vpack.c.bf16 %v1636_v4, %v1635_v7  ;;  %v3954_v8 = vld [vmem:[%s5994_s5 + $0x78] sm:$0xff]  }
 0x215   :  { %2515 = vmatprep.mubr.bf16.mxu0 %v6064_v16  ;;  %v1649_v16 = vld [vmem:[#allocation3 + $0x13] sm:$0xff]  ;;  %3579 = vmatprep.subr.bf16.mxu1 %v3954_v8 }
 0x216   :  { %v1664_v10 = vpack.c.bf16 %v1650_v9, %v1649_v16  ;;  %v3961_v16 = vld [vmem:[%s5994_s5 + $0x20] sm:$0xff]  }
 0x218   :  { %v1613_v53 = vld [vmem:[#allocation3 + $0x71] sm:$0xff]  ;;  %v1614_v32 = vld [vmem:[#allocation3 + $0x79] sm:$0xf] }
 0x219   :  { %v1685_v54 = vld [vmem:[#allocation3 + $0x74] sm:$0xff]  ;;  %v1622_v12 = vpack.c.bf16 %v1614_v32, %v1613_v53  ;;  %v1686_v46 = vld [vmem:[#allocation3 + $0x7c] sm:$0xf] }
 0x21a   :  { %v1590_v13 = vld [vmem:[#allocation3 + $0x78] sm:$0xf]  ;;  %v1694_v26 = vpack.c.bf16 %v1686_v46, %v1685_v54  ;;  %v3956_v54 = vld [vmem:[%s5994_s5 + $0x70] sm:$0xff]  }
 0x21b   :  { %v1598_v62 = vpack.c.bf16 %v1590_v13, %v1557_v42  ;;  %2289 = vmatprep.mubr.bf16.mxu1 %v1622_v12  ;;  %v1661_v55 = vld [vmem:[#allocation3 + $0x73] sm:$0xff]  ;;  %v1662_v33 = vld [vmem:[#allocation3 + $0x7b] sm:$0xf] }
 0x21c   :  { %2516 = vmatmul.mubr.bf16.gmra.mxu0 %v1694_v26  ;;  %v1670_v42 = vpack.c.bf16 %v1662_v33, %v1661_v55  ;;  %v1637_v52 = vld [vmem:[#allocation3 + $0x72] sm:$0xff]  ;;  %v1638_v36 = vld [vmem:[#allocation3 + $0x7a] sm:$0xf]  ;;  %v3958_v26 = vld [vmem:[%s5994_s5 + $0x68] sm:$0xff]  }
 0x21d   :  { %2290 = vmatmul.mubr.bf16.gmra.mxu1 %v1598_v62  ;;  %v1646_v1 = vpack.c.bf16 %v1638_v36, %v1637_v52  ;;  %v3957_v12 = vld [vmem:[%s5994_s5 + $0x30] sm:$0xff]   ;;  %v3959_v62 = vld [vmem:[%s5994_s5 + $0x28] sm:$0xff]   ;;  %3666 = vmatprep.mubr.msk.bf16.mxu0 %vm4038_vm0, %v6007_v38 }
 0x21e   :  { %2332 = vmatprep.mubr.bf16.mxu1 %v1663_v50 }
 0x225   :  { %2333 = vmatmul.mubr.bf16.vlgmr.msra.gmra.mxu1 %v1639_v23  ;;  %v3960_v23 = vld [vmem:[%s5994_s5 + $0x60] sm:$0xff]  }
 0x226   :  { %2342 = vmatprep.mubr.bf16.mxu1 %v1664_v10  ;;  %3580 = vmatpush3.bf16.msra.mxu1 %v3955_v58  ;;  %v3967_v10 = vld [vmem:[%s5994_s5 + $0x128] sm:$0xff]   ;;  %v1775_v58 = vld [vmem:[%s5993_s4] sm:$0x3] }
 0x227   :  { %3581 = vmatprep.subr.bf16.mxu1 %v3956_v54  ;;  %3655 = vmatpush3.bf16.msra.mxu0 %v3967_v10  ;;  %v6109_v10 = vsub.s32 1, %v6107_v11 }
 0x228   :  { %3656 = vmatprep.subr.bf16.mxu0 %v6007_v38 }
 0x22a   :  { %3582 = vmatpush3.bf16.msra.mxu1 %v3957_v12 }
 0x22b   :  { %3583 = vmatprep.subr.bf16.mxu1 %v3958_v26  ;;  %3657 = vmatpush3.bf16.msra.mxu0 %v3969_v20  ;;  %v5759_v20 = vrot.slane %v1775_v58, %v6109_v10 }
 0x22c   :  { %3658 = vmatprep.subr.bf16.mxu0 %v6007_v38 }
 0x22d   :  { %2343 = vmatmul.mubr.bf16.gmra.mxu1 %v1640_v34 }
 0x22e   :  { %2352 = vmatprep.mubr.bf16.mxu1 %v1665_v41  ;;  %3584 = vmatpush3.bf16.msra.mxu1 %v3959_v62  ;;  %v3966_v41 = vld [vmem:[%s5994_s5 + $0x50] sm:$0xff]  }
 0x22f   :  { %3585 = vmatprep.subr.bf16.mxu1 %v3960_v23  ;;  %3659 = vmatpush3.bf16.msra.mxu0 %v3971_v59  ;;  %v5753_v23 = vrot.slane %v1775_v58, %v6108_v6 }
 0x230   :  { %3660 = vmatprep.subr.bf16.mxu0 %v6007_v38 }
 0x232   :  { %3586 = vmatpush3.bf16.msra.mxu1 %v3961_v16 }
 0x233   :  { %3587 = vmatprep.subr.bf16.mxu1 %v3962_v5  ;;  %3661 = vmatpush3.bf16.msra.mxu0 %v3973_v27 }
 0x234   :  { %3662 = vmatprep.subr.bf16.mxu0 %v6007_v38 }
 0x235   :  { %2353 = vmatmul.mubr.bf16.gmra.mxu1 %v1641_v24  ;;  %v3970_v24 = vld [vmem:[%s5994_s5 + $0x48] sm:$0xff]  }
 0x236   :  { %2362 = vmatprep.mubr.bf16.mxu1 %v1666_v15  ;;  %3588 = vmatpush3.bf16.msra.mxu1 %v3964_v44 }
 0x237   :  { %3589 = vmatprep.subr.bf16.mxu1 %v3966_v41  ;;  %3663 = vmatpush3.bf16.msra.mxu0 %v3975_v29 }
 0x238   :  { %3664 = vmatprep.subr.bf16.mxu0 %v6007_v38 }
 0x23a   :  { %3590 = vmatpush3.bf16.msra.mxu1 %v3968_v17 }
 0x23b   :  { %3591 = vmatprep.subr.bf16.mxu1 %v3970_v24  ;;  %3665 = vmatpush3.bf16.msra.mxu0 %v3977_v61 }
 0x23c   :  { %3690 = vmatprep.subr.bf16.mxu0 %v6007_v38 }
 0x23d   :  { %2363 = vmatmul.mubr.bf16.gmra.mxu1 %v1642_v35  ;;  %v3974_v35 = vld [vmem:[%s5994_s5 + $0x40] sm:$0xff]  }
 0x23e   :  { %2372 = vmatprep.mubr.bf16.mxu1 %v1667_v30  ;;  %3592 = vmatpush3.bf16.msra.mxu1 %v3972_v19 }
 0x23f   :  { %3593 = vmatprep.subr.bf16.mxu1 %v3974_v35 }
 0x242   :  { %3594 = vmatpush3.bf16.msra.mxu1 %v3976_v18 }
 0x245   :  { %2373 = vmatmul.mubr.bf16.gmra.mxu1 %v1643_v45 }
 0x246   :  { %2382 = vmatprep.mubr.bf16.mxu1 %v1668_v37  ;;  %v3978_v37 = vld [vmem:[%s5994_s5 + $0xf8] sm:$0xff]  }
 0x247   :  { %3601 = vmatprep.subr.bf16.mxu1 %v3978_v37 }
 0x24d   :  { %2383 = vmatmul.mubr.bf16.gmra.mxu1 %v1644_v47 }
 0x24e   :  { %2392 = vmatprep.mubr.bf16.mxu1 %v1669_v43 }
 0x255   :  { %2393 = vmatmul.mubr.bf16.gmra.mxu1 %v1645_v56 }
 0x256   :  { %2402 = vmatprep.mubr.bf16.mxu1 %v1670_v42 }
 0x25d   :  { %2403 = vmatmul.mubr.bf16.gmra.mxu1 %v1646_v1 }
 0x274   :  { %v5587_v63 = vpop.f32.mrf.mxu1  ;;  %v5671_v48 = vpop.f32.mrf.mxu0 }
 0x275   :  { %v2222_v41 = vadd.f32 %v5587_v63, %v5753_v23 }
 0x276   :  { %v5589_v28 = vpop.f32.mrf.mxu1  ;;  %v2449_v2 = vpop.f32.mrf.mxu0 }
 0x277   :  { %v2224_v17 = vadd.f32 %v5589_v28, %v5759_v20 }
 0x278   :  { %v5591_v25 = vpop.f32.mrf.mxu1  ;;  %v2451_v30 = vpop.f32.mrf.mxu0 }
 0x279   :  { %v2226_v35 = vadd.f32 %v5591_v25, %v5753_v23 }
 0x27a   :  { %v5593_v40 = vpop.f32.mrf.mxu1  ;;  %v2453_v45 = vpop.f32.mrf.mxu0 }
 0x27b   :  { %v2228_v37 = vadd.f32 %v5593_v40, %v5759_v20 }
 0x284   :  { %v5595_v31 = vpop.f32.mrf.mxu1  ;;  %v2457_v51 = vpop.f32.mrf.mxu0 }
 0x285   :  { %v2232_v11 = vadd.f32 %v5595_v31, %v5753_v23 }
 0x286   :  { %v5597_v57 = vpop.f32.mrf.mxu1  ;;  %v2459_v0 = vpop.f32.mrf.mxu0 }
 0x288   :  { %v5605_v53 = vpop.f32.mrf.mxu1  ;;  %v5716_v49 = vpop.f32.mrf.mxu0 }
 0x28a   :  { %v5607_v32 = vpop.f32.mrf.mxu1  ;;  %v5720_v4 = vpop.f32.mrf.mxu0 }
 0x294   :  { %v5615_v46 = vpop.f32.mrf.mxu1  ;;  %v5724_v33 = vpop.f32.mrf.mxu0 }
 0x296   :  { %v5617_v13 = vpop.f32.mrf.mxu1  ;;  %v5728_v56 = vpop.f32.mrf.mxu0 }
 0x298   :  { %v5628_v50 = vpop.f32.mrf.mxu1  ;;  %v5734_v36 = vpop.f32.mrf.mxu0 }
 0x29a   :  { %v5634_v9 = vpop.f32.mrf.mxu1  ;;  %v5743_v54 = vpop.f32.mrf.mxu0 }
 0x2a4   :  { %v5637_v14 = vpop.f32.mrf.mxu1  ;;  %v5747_v26 = vpop.f32.mrf.mxu0 }
 0x2a6   :  { %v5649_v60 = vpop.f32.mrf.mxu1  ;;  %v5761_v5 = vpop.f32.mrf.mxu0 }
 0x2a8   :  { %v5658_v34 = vpop.f32.mrf.mxu1  ;;  %v5769_v27 = vpop.f32.mrf.mxu0 }
 0x2aa   :  { %v5682_v15 = vpop.f32.mrf.mxu1  ;;  %v5778_v28 = vpop.f32.mrf.mxu0 }
 0x2b4   :  { %v5685_v22 = vpop.f32.mrf.mxu1  ;;  %v5780_v25 = vpop.f32.mrf.mxu0 }
 0x2b6   :  { %v5697_v39 = vpop.f32.mrf.mxu1 }
 0x2b8   :  { %v5706_v3 = vpop.f32.mrf.mxu1 }
 0x2ba   :  { %v5712_v21 = vpop.f32.mrf.mxu1 }
 0x2c4   :  { %v5714_v47 = vpop.f32.mrf.mxu1 }
 0x2c6   :  { %v5718_v43 = vpop.f32.mrf.mxu1 }
 0x2c8   :  { %v5722_v55 = vpop.f32.mrf.mxu1 }
 0x2ca   :  { %v5726_v7 = vpop.f32.mrf.mxu1 }
 0x2d4   :  { %v5730_v42 = vpop.f32.mrf.mxu1 }
 0x2d6   :  { %v5732_v52 = vpop.f32.mrf.mxu1 }
 0x2d8   :  { %v5736_v1 = vpop.f32.mrf.mxu1 }
 0x2da   :  { %v5738_v8 = vpop.f32.mrf.mxu1 }
 0x2dd   :  { %v5745_v12 = vpop.f32.mrf.mxu1 }
 0x2df   :  { %v5749_v62 = vpop.f32.mrf.mxu1 }
 0x2e1   :  { %v5755_v16 = vpop.f32.mrf.mxu1 }
 0x2e3   :  { %v5763_v44 = vpop.f32.mrf.mxu1 }
 0x2e5   :  { %v2334_v59 = vpop.f32.mrf.mxu1 }
 0x2e6   :  { %v2335_v24 = vadd.f32 %v2334_v59, %v2222_v41 }
 0x2e7   :  { %v2336_v19 = vpop.f32.mrf.mxu1 }
 0x2e8   :  { %v2448_v29 = vadd.f32 %v5671_v48, %v2335_v24  ;;  %v2337_v18 = vadd.f32 %v2336_v19, %v2224_v17  ;;  %v2234_v17 = vadd.f32 %v5597_v57, %v5759_v20  ;;  %v2236_v19 = vadd.f32 %v5605_v53, %v5753_v23 }
 0x2e9   :  { %v2338_v61 = vpop.f32.mrf.mxu1 }
 0x2ea   :  { %v2450_v58 = vadd.f32 %v2449_v2, %v2337_v18  ;;  %v2339_v63 = vadd.f32 %v2338_v61, %v2226_v35  ;;  %v2526_v10 = vmax.f32 %v2448_v29, 0.0 }
 0x2eb   :  { %v2340_v6 = vpop.f32.mrf.mxu1 }
 0x2ec   :  { %v2527_v41 = vmax.f32 %v2450_v58, 0.0  ;;  %v2452_v59 = vadd.f32 %v2451_v30, %v2339_v63  ;;  %v2341_v38 = vadd.f32 %v2340_v6, %v2228_v37  ;;  %v5786_v30 = vpop.f32.mrf.mxu0  ;;  %v2238_v58 = vadd.f32 %v5607_v32, %v5759_v20 }
 0x2ed   :  { %v2344_v48 = vpop.f32.mrf.mxu1 }
 0x2ee   :  { %v2558_v24 = vmax.f32 %v2526_v10, %v2527_v41  ;;  %v2454_v40 = vadd.f32 %v2453_v45, %v2341_v38  ;;  %v2345_v2 = vadd.f32 %v2344_v48, %v2232_v11  ;;  %v2528_v35 = vmax.f32 %v2452_v59, 0.0  ;;  %v5793_v41 = vpop.f32.mrf.mxu0 }
 0x2ef   :  { %v2346_v31 = vpop.f32.mrf.mxu1  ;;  %v2242_v38 = vadd.f32 %v5615_v46, %v5753_v23  ;;  %v2244_v48 = vadd.f32 %v5617_v13, %v5759_v20  ;;  %v2246_v46 = vadd.f32 %v5628_v50, %v5753_v23  ;;  %v2248_v13 = vadd.f32 %v5634_v9, %v5759_v20 }
 0x2f0   :  { %2574 = vst [vmem:[#allocation4] sm:$0xff] %v2558_v24  ;;  %v2529_v18 = vmax.f32 %v2454_v40, 0.0  ;;  %v2458_v29 = vadd.f32 %v2457_v51, %v2345_v2  ;;  %v2347_v61 = vadd.f32 %v2346_v31, %v2234_v17  ;;  %v5801_v31 = vpop.f32.mrf.mxu0  ;;  %v2252_v50 = vadd.f32 %v5637_v14, %v5753_v23 }
 0x2f1   :  { %v2348_v37 = vpop.f32.mrf.mxu1 }
 0x2f2   :  { %v2559_v63 = vmax.f32 %v2528_v35, %v2529_v18  ;;  %v2460_v57 = vadd.f32 %v2459_v0, %v2347_v61  ;;  %v2349_v6 = vadd.f32 %v2348_v37, %v2236_v19  ;;  %v2530_v53 = vmax.f32 %v2458_v29, 0.0  ;;  %v5808_v61 = vpop.f32.mrf.mxu0 }
 0x2f3   :  { %v2350_v45 = vpop.f32.mrf.mxu1 }
 0x2f4   :  { %2575 = vst [vmem:[#allocation4 + $0x8] sm:$0xff] %v2559_v63  ;;  %v2531_v11 = vmax.f32 %v2460_v57, 0.0  ;;  %v2462_v10 = vadd.f32 %v5716_v49, %v2349_v6  ;;  %v2351_v51 = vadd.f32 %v2350_v45, %v2238_v58 }
 0x2f5   :  { %v2354_v59 = vpop.f32.mrf.mxu1 }
 0x2f6   :  { %v2560_v32 = vmax.f32 %v2530_v53, %v2531_v11  ;;  %v2464_v0 = vadd.f32 %v5720_v4, %v2351_v51  ;;  %v2355_v17 = vadd.f32 %v2354_v59, %v2242_v38  ;;  %v2532_v40 = vmax.f32 %v2462_v10, 0.0  ;;  %v5816_v51 = vpop.f32.mrf.mxu0 }
 0x2f7   :  { %v2356_v24 = vpop.f32.mrf.mxu1  ;;  %v2256_v10 = vadd.f32 %v5658_v34, %v5753_v23  ;;  %v2262_v34 = vadd.f32 %v5685_v22, %v5753_v23 }
 0x2f8   :  { %2576 = vst [vmem:[#allocation4 + $0x10] sm:$0xff] %v2560_v32  ;;  %v2533_v2 = vmax.f32 %v2464_v0, 0.0  ;;  %v2468_v49 = vadd.f32 %v5724_v33, %v2355_v17  ;;  %v2357_v19 = vadd.f32 %v2356_v24, %v2244_v48 }
 0x2f9   :  { %v2358_v35 = vpop.f32.mrf.mxu1 }
 0x2fa   :  { %v2561_v18 = vmax.f32 %v2532_v40, %v2533_v2  ;;  %v2470_v4 = vadd.f32 %v5728_v56, %v2357_v19  ;;  %v2359_v29 = vadd.f32 %v2358_v35, %v2246_v46  ;;  %v2534_v63 = vmax.f32 %v2468_v49, 0.0  ;;  %v5824_v40 = vpop.f32.mrf.mxu0 }
 0x2fb   :  { %v2591_v37 = vld [vmem:[#allocation4] ss:$2 sm:$0xff]  ;;  %v2607_v58 = vld [vmem:[#allocation4 + $0x1] ss:$2 sm:$0xff]  ;;  %v2360_v33 = vpop.f32.mrf.mxu1  ;;  %v2254_v56 = vadd.f32 %v5649_v60, %v5759_v20  ;;  %v2258_v60 = vadd.f32 %v5682_v15, %v5759_v20 }
 0x2fc   :  { %2577 = vst [vmem:[#allocation4 + $0x18] sm:$0xff] %v2561_v18  ;;  %v2535_v57 = vmax.f32 %v2470_v4, 0.0  ;;  %v2472_v6 = vadd.f32 %v5734_v36, %v2359_v29  ;;  %v2361_v38 = vadd.f32 %v2360_v33, %v2248_v13  ;;  %v2622_v45 = vmax.f32 %v2591_v37, %v2607_v58  ;;  %v2503_v58 = vpop.f32.mrf.mxu0 }
 0x2fd   :  { %v2364_v9 = vpop.f32.mrf.mxu1  ;;  %v2266_v37 = vadd.f32 %v5706_v3, %v5753_v23  ;;  %v2272_v3 = vadd.f32 %v5714_v47, %v5753_v23  ;;  %v2276_v47 = vadd.f32 %v5722_v55, %v5753_v23 }
 0x2fe   :  { %v2562_v53 = vmax.f32 %v2534_v63, %v2535_v57  ;;  %v2474_v11 = vadd.f32 %v5743_v54, %v2361_v38  ;;  %v2365_v14 = vadd.f32 %v2364_v9, %v2252_v50  ;;  %2630 = vst [vmem:[#allocation5] sm:$0xff] %v2622_v45  ;;  %v2536_v48 = vmax.f32 %v2472_v6, 0.0  ;;  %v2507_v38 = vpop.f32.mrf.mxu0 }
 0x2ff   :  { %v2366_v59 = vpop.f32.mrf.mxu1 }
 0x300   :  { %2578 = vst [vmem:[#allocation4 + $0x20] sm:$0xff] %v2562_v53  ;;  %v2537_v36 = vmax.f32 %v2474_v11, 0.0  ;;  %v2478_v32 = vadd.f32 %v5747_v26, %v2365_v14  ;;  %v2367_v0 = vadd.f32 %v2366_v59, %v2254_v56 }
 0x301   :  { %v2368_v17 = vpop.f32.mrf.mxu1 }
 0x302   :  { %v2563_v46 = vmax.f32 %v2536_v48, %v2537_v36  ;;  %v2480_v54 = vadd.f32 %v5761_v5, %v2367_v0  ;;  %v2369_v24 = vadd.f32 %v2368_v17, %v2256_v10  ;;  %v2538_v19 = vmax.f32 %v2478_v32, 0.0  ;;  %v2509_v32 = vpop.f32.mrf.mxu0 }
 0x303   :  { %v2593_v2 = vld [vmem:[#allocation4 + $0x10] ss:$2 sm:$0xff]  ;;  %v2609_v49 = vld [vmem:[#allocation4 + $0x11] ss:$2 sm:$0xff]  ;;  %v2370_v35 = vpop.f32.mrf.mxu1  ;;  %v2264_v5 = vadd.f32 %v5697_v39, %v5759_v20  ;;  %v2268_v39 = vadd.f32 %v5712_v21, %v5759_v20  ;;  %v2274_v21 = vadd.f32 %v5718_v43, %v5759_v20  ;;  %v2278_v43 = vadd.f32 %v5726_v7, %v5759_v20 }
 0x304   :  { %2579 = vst [vmem:[#allocation4 + $0x28] sm:$0xff] %v2563_v46  ;;  %v2539_v26 = vmax.f32 %v2480_v54, 0.0  ;;  %v2482_v13 = vadd.f32 %v5769_v27, %v2369_v24  ;;  %v2371_v18 = vadd.f32 %v2370_v35, %v2258_v60  ;;  %v2623_v4 = vmax.f32 %v2593_v2, %v2609_v49  ;;  %v2511_v2 = vpop.f32.mrf.mxu0 }
 0x305   :  { %v2374_v15 = vpop.f32.mrf.mxu1  ;;  %v2284_v7 = vadd.f32 %v5732_v52, %v5759_v20 }
 0x306   :  { %v2564_v29 = vmax.f32 %v2538_v19, %v2539_v26  ;;  %v2484_v50 = vadd.f32 %v5778_v28, %v2371_v18  ;;  %v2375_v22 = vadd.f32 %v2374_v15, %v2262_v34  ;;  %2631 = vst [vmem:[#allocation5 + $0x8] sm:$0xff] %v2623_v4  ;;  %v2540_v33 = vmax.f32 %v2482_v13, 0.0 }
 0x307   :  { %v2376_v63 = vpop.f32.mrf.mxu1  ;;  %v2282_v26 = vadd.f32 %v5730_v42, %v5753_v23  ;;  %v2286_v42 = vadd.f32 %v5736_v1, %v5753_v23 }
 0x308   :  { %2580 = vst [vmem:[#allocation4 + $0x30] sm:$0xff] %v2564_v29  ;;  %v2541_v57 = vmax.f32 %v2484_v50, 0.0  ;;  %v2488_v27 = vadd.f32 %v5780_v25, %v2375_v22  ;;  %v2377_v6 = vadd.f32 %v2376_v63, %v2264_v5  ;;  %v2513_v50 = vpop.f32.mrf.mxu0 }
 0x309   :  { %v2378_v45 = vpop.f32.mrf.mxu1 }
 0x30a   :  { %v2565_v9 = vmax.f32 %v2540_v33, %v2541_v57  ;;  %v2490_v28 = vadd.f32 %v5786_v30, %v2377_v6  ;;  %v2379_v56 = vadd.f32 %v2378_v45, %v2266_v37  ;;  %v2542_v14 = vmax.f32 %v2488_v27, 0.0  ;;  %v2517_v45 = vpop.f32.mrf.mxu0 }
 0x30b   :  { %v2595_v53 = vld [vmem:[#allocation4 + $0x20] ss:$2 sm:$0xff]  ;;  %v2611_v11 = vld [vmem:[#allocation4 + $0x21] ss:$2 sm:$0xff]  ;;  %v2380_v10 = vpop.f32.mrf.mxu1 }
 0x30c   :  { %2581 = vst [vmem:[#allocation4 + $0x38] sm:$0xff] %v2565_v9  ;;  %v2543_v59 = vmax.f32 %v2490_v28, 0.0  ;;  %v2492_v25 = vadd.f32 %v5793_v41, %v2379_v56  ;;  %v2381_v48 = vadd.f32 %v2380_v10, %v2268_v39  ;;  %v2624_v36 = vmax.f32 %v2595_v53, %v2611_v11 }
 0x30d   :  { %v2384_v0 = vpop.f32.mrf.mxu1  ;;  %v2288_v9 = vadd.f32 %v5738_v8, %v5759_v20  ;;  %v2294_v8 = vadd.f32 %v5749_v62, %v5759_v20 }
 0x30e   :  { %v2566_v30 = vmax.f32 %v2542_v14, %v2543_v59  ;;  %v2494_v17 = vadd.f32 %v5801_v31, %v2381_v48  ;;  %v2385_v60 = vadd.f32 %v2384_v0, %v2272_v3  ;;  %2632 = vst [vmem:[#allocation5 + $0x10] sm:$0xff] %v2624_v36  ;;  %v2544_v54 = vmax.f32 %v2492_v25, 0.0  ;;  %v2519_v25 = vpop.f32.mrf.mxu0 }
 0x30f   :  { %v2386_v46 = vpop.f32.mrf.mxu1 }
 0x310   :  { %2582 = vst [vmem:[#allocation4 + $0x40] sm:$0xff] %v2566_v30  ;;  %v2545_v24 = vmax.f32 %v2494_v17, 0.0  ;;  %v2498_v41 = vadd.f32 %v5808_v61, %v2385_v60  ;;  %v2387_v34 = vadd.f32 %v2386_v46, %v2274_v21  ;;  %v2521_v46 = vpop.f32.mrf.mxu0 }
 0x311   :  { %v2388_v49 = vpop.f32.mrf.mxu1 }
 0x312   :  { %v2567_v19 = vmax.f32 %v2544_v54, %v2545_v24  ;;  %v2500_v31 = vadd.f32 %v5816_v51, %v2387_v34  ;;  %v2389_v35 = vadd.f32 %v2388_v49, %v2276_v47  ;;  %v2546_v18 = vmax.f32 %v2498_v41, 0.0 }
 0x313   :  { %v2597_v55 = vld [vmem:[#allocation4 + $0x30] ss:$2 sm:$0xff]  ;;  %v2613_v13 = vld [vmem:[#allocation4 + $0x31] ss:$2 sm:$0xff]  ;;  %v2390_v4 = vpop.f32.mrf.mxu1  ;;  %v2298_v24 = vadd.f32 %v5763_v44, %v5759_v20 }
 0x314   :  { %2583 = vst [vmem:[#allocation4 + $0x48] sm:$0xff] %v2567_v19  ;;  %v2547_v15 = vmax.f32 %v2500_v31, 0.0  ;;  %v2502_v61 = vadd.f32 %v5824_v40, %v2389_v35  ;;  %v2391_v5 = vadd.f32 %v2390_v4, %v2278_v43  ;;  %v2625_v29 = vmax.f32 %v2597_v55, %v2613_v13 }
 0x315   :  { %v2394_v22 = vpop.f32.mrf.mxu1 }
 0x316   :  { %v2568_v51 = vmax.f32 %v2546_v18, %v2547_v15  ;;  %v2504_v37 = vadd.f32 %v2503_v58, %v2391_v5  ;;  %v2395_v63 = vadd.f32 %v2394_v22, %v2282_v26  ;;  %2633 = vst [vmem:[#allocation5 + $0x18] sm:$0xff] %v2625_v29  ;;  %v2548_v57 = vmax.f32 %v2502_v61, 0.0  ;;  %v2523_v26 = vpop.f32.mrf.mxu0 }
 0x317   :  { %v2396_v33 = vpop.f32.mrf.mxu1  ;;  %v2292_v58 = vadd.f32 %v5745_v12, %v5753_v23  ;;  %v2296_v12 = vadd.f32 %v5755_v16, %v5753_v23 }
 0x318   :  { %2584 = vst [vmem:[#allocation4 + $0x50] sm:$0xff] %v2568_v51  ;;  %v2549_v27 = vmax.f32 %v2504_v37, 0.0  ;;  %v2508_v6 = vadd.f32 %v2507_v38, %v2395_v63  ;;  %v2397_v40 = vadd.f32 %v2396_v33, %v2284_v7 }
 0x319   :  { %v2398_v39 = vpop.f32.mrf.mxu1 }
 0x31a   :  { %v2569_v28 = vmax.f32 %v2548_v57, %v2549_v27  ;;  %v2510_v52 = vadd.f32 %v2509_v32, %v2397_v40  ;;  %v2399_v56 = vadd.f32 %v2398_v39, %v2286_v42  ;;  %v2550_v1 = vmax.f32 %v2508_v6, 0.0 }
 0x31b   :  { %v2599_v3 = vld [vmem:[#allocation4 + $0x40] ss:$2 sm:$0xff]  ;;  %v2615_v53 = vld [vmem:[#allocation4 + $0x41] ss:$2 sm:$0xff]  ;;  %v2400_v11 = vpop.f32.mrf.mxu1 }
 0x31c   :  { %2585 = vst [vmem:[#allocation4 + $0x58] sm:$0xff] %v2569_v28  ;;  %v2551_v14 = vmax.f32 %v2510_v52, 0.0  ;;  %v2512_v10 = vadd.f32 %v2511_v2, %v2399_v56  ;;  %v2401_v38 = vadd.f32 %v2400_v11, %v2288_v9  ;;  %v2626_v59 = vmax.f32 %v2599_v3, %v2615_v53  ;;  %v3979_v28 = vld [vmem:[%s5994_s5 + $0xb8] sm:$0xff]   ;;  %v3980_v56 = vld [vmem:[%s5994_s5 + $0xf0] sm:$0xff]   ;;  %v3983_v11 = vld [vmem:[%s5994_s5 + $0xa8] sm:$0xff]  }
 0x31d   :  { %v2404_v48 = vpop.f32.mrf.mxu1  ;;  %v2643_v22 = vld [vmem:[#allocation5 + $0x1] ss:$8 sm:$0xf]  ;;  %v2658_v7 = vld [vmem:[#allocation5 + $0x4] ss:$8 sm:$0xf] }
 0x31e   :  { %v2570_v36 = vmax.f32 %v2550_v1, %v2551_v14  ;;  %v2514_v32 = vadd.f32 %v2513_v50, %v2401_v38  ;;  %v2405_v0 = vadd.f32 %v2404_v48, %v2292_v58  ;;  %2634 = vst [vmem:[#allocation5 + $0x20] sm:$0xff] %v2626_v59  ;;  %v2552_v30 = vmax.f32 %v2512_v10, 0.0  ;;  %v2638_v51 = vld [vmem:[#allocation5] ss:$8 sm:$0xf] }
 0x31f   :  { %v2406_v21 = vpop.f32.mrf.mxu1  ;;  %v2653_v37 = vld [vmem:[#allocation5 + $0x3] ss:$8 sm:$0xf]  ;;  %v6110_v3 = vmov 0.0  }
 0x320   :  { %2586 = vst [vmem:[#allocation4 + $0x60] sm:$0xff] %v2570_v36  ;;  %v2553_v17 = vmax.f32 %v2514_v32, 0.0  ;;  %v2518_v60 = vadd.f32 %v2517_v45, %v2405_v0  ;;  %v2407_v47 = vadd.f32 %v2406_v21, %v2294_v8  ;;  %v3981_v53 = vld [vmem:[%s5994_s5 + $0xb0] sm:$0xff]   ;;  %v3982_v1 = vld [vmem:[%s5994_s5 + $0xe8] sm:$0xff]   ;;  %v3984_v14 = vld [vmem:[%s5994_s5 + $0xe0] sm:$0xff]  }
 0x321   :  { %v2408_v54 = vpop.f32.mrf.mxu1  ;;  %v3985_v10 = vld [vmem:[%s5994_s5 + $0xa0] sm:$0xff]   ;;  %v3986_v38 = vld [vmem:[%s5994_s5 + $0xd8] sm:$0xff]   ;;  %v3989_v48 = vld [vmem:[%s5994_s5 + $0x90] sm:$0xff]  }
 0x322   :  { %v2571_v41 = vmax.f32 %v2552_v30, %v2553_v17  ;;  %v2520_v62 = vadd.f32 %v2519_v25, %v2407_v47  ;;  %v2409_v34 = vadd.f32 %v2408_v54, %v2296_v12  ;;  %v2554_v43 = vmax.f32 %v2518_v60, 0.0  ;;  %v3987_v59 = vld [vmem:[%s5994_s5 + $0x98] sm:$0xff]   ;;  %v3988_v25 = vld [vmem:[%s5994_s5 + $0xd0] sm:$0xff]   ;;  %v3990_v8 = vld [vmem:[%s5994_s5 + $0xc8] sm:$0xff]  }
 0x323   :  { %v2601_v2 = vld [vmem:[#allocation4 + $0x50] ss:$2 sm:$0xff]  ;;  %v2617_v49 = vld [vmem:[#allocation4 + $0x51] ss:$2 sm:$0xff]  ;;  %v2410_v19 = vpop.f32.mrf.mxu1  ;;  %v3991_v36 = vld [vmem:[%s5994_s5 + $0x88] sm:$0xff]  }
 0x324   :  { %2587 = vst [vmem:[#allocation4 + $0x68] sm:$0xff] %v2571_v41  ;;  %v2555_v23 = vmax.f32 %v2520_v62, 0.0  ;;  %v2522_v16 = vadd.f32 %v2521_v46, %v2409_v34  ;;  %v2411_v31 = vadd.f32 %v2410_v19, %v2298_v24  ;;  %v2627_v35 = vmax.f32 %v2601_v2, %v2617_v49  ;;  %v3992_v32 = vld [vmem:[%s5994_s5 + $0xc0] sm:$0xff]   ;;  %v3994_v60 = vld [vmem:[%s5996_s7 + $0x38] sm:$0xff]   ;;  %v3995_v47 = vld [vmem:[%s5996_s7 + $0x30] sm:$0xff]  }
 0x325   :  { %v3993_v12 = vld [vmem:[%s5994_s5 + $0x80] sm:$0xff]   ;;  %v3996_v46 = vld [vmem:[%s5996_s7 + $0x28] sm:$0xff]   ;;  %v3998_v24 = vld [vmem:[%s5996_s7 + $0x18] sm:$0xff]  }
 0x326   :  { %v2572_v55 = vmax.f32 %v2554_v43, %v2555_v23  ;;  %v2524_v13 = vadd.f32 %v2523_v26, %v2411_v31  ;;  %2635 = vst [vmem:[#allocation5 + $0x28] sm:$0xff] %v2627_v35  ;;  %v2556_v18 = vmax.f32 %v2522_v16, 0.0  ;;  %v2648_v21 = vld [vmem:[#allocation5 + $0x2] ss:$8 sm:$0xf] }
 0x327   :  { %v3997_v54 = vld [vmem:[%s5996_s7 + $0x20] sm:$0xff]   ;;  %v3999_v41 = vld [vmem:[%s5996_s7 + $0x10] sm:$0xff]   ;;  %v4000_v62 = vld [vmem:[%s5996_s7 + $0x8] sm:$0xff]  }
 0x328   :  { %2588 = vst [vmem:[#allocation4 + $0x70] sm:$0xff] %v2572_v55  ;;  %v2557_v4 = vmax.f32 %v2524_v13, 0.0  ;;  %v4001_v34 = vld [vmem:[%s5996_s7] sm:$0xff]   ;;  %v4002_v2 = vld [vmem:[%s5998_s9 + $0x38] sm:$0xff]   ;;  %v4003_v49 = vld [vmem:[%s5998_s9 + $0x30] sm:$0xff]  }
 0x329   :  { %v4004_v43 = vld [vmem:[%s5998_s9 + $0x28] sm:$0xff]   ;;  %v4005_v19 = vld [vmem:[%s5998_s9 + $0x20] sm:$0xff]   ;;  %v4006_v23 = vld [vmem:[%s5998_s9 + $0x18] sm:$0xff]  }
 0x32a   :  { %v2573_v20 = vmax.f32 %v2556_v18, %v2557_v4  ;;  %v4007_v16 = vld [vmem:[%s5998_s9 + $0x10] sm:$0xff]  }
 0x32b   :  { %v2603_v44 = vld [vmem:[#allocation4 + $0x60] ss:$2 sm:$0xff]  ;;  %v2619_v15 = vld [vmem:[#allocation4 + $0x61] ss:$2 sm:$0xff] }
 0x32c   :  { %2589 = vst [vmem:[#allocation4 + $0x78] sm:$0xf] %v2573_v20  ;;  %v2628_v61 = vmax.f32 %v2603_v44, %v2619_v15  ;;  %v3520_v15 = vld [vmem:[%s5995_s6] ss:$0 sm:$0xff] }
 0x32e   :  { %2636 = vst [vmem:[#allocation5 + $0x30] sm:$0xff] %v2628_v61 }
 0x333   :  { %v2605_v5 = vld [vmem:[#allocation4 + $0x70] ss:$2 sm:$0xff]  ;;  %v2621_v29 = vld [vmem:[#allocation4 + $0x71] ss:$2 sm:$0xff] }
 0x334   :  { %v2629_v50 = vmax.f32 %v2605_v5, %v2621_v29 }
 0x336   :  { %2637 = vst [vmem:[#allocation5 + $0x38] sm:$0xff] %v2629_v50 }
 0x33d   :  { %v2644_v63 = vld [vmem:[#allocation5 + $0x1] ss:$8 sm:$0xf0]  ;;  %v2659_v42 = vld [vmem:[#allocation5 + $0x4] ss:$8 sm:$0xf0] }
 0x33e   :  { %v2645_v33 = vor.u32 %v2644_v63, %v2643_v22  ;;  %v2660_v57 = vor.u32 %v2659_v42, %v2658_v7  ;;  %v2639_v27 = vld [vmem:[#allocation5] ss:$8 sm:$0xf0]  ;;  %v2654_v6 = vld [vmem:[#allocation5 + $0x3] ss:$8 sm:$0xf0] }
 0x33f   :  { %v2640_v40 = vor.u32 %v2639_v27, %v2638_v51  ;;  %v2655_v45 = vor.u32 %v2654_v6, %v2653_v37  ;;  %v2649_v0 = vld [vmem:[#allocation5 + $0x2] ss:$8 sm:$0xf0]  ;;  %v3561_v27 = vld [vmem:[%s5997_s8] ss:$0 sm:$0xff]  ;;  %s4039_s8 = smov [#allocation6]  }
 0x340   :  { %v2646_v39 = vpack.c.bf16 %v2645_v33, %v2645_v33  ;;  %v2661_v9 = vpack.c.bf16 %v2660_v57, %v2660_v57  ;;  %v2650_v30 = vor.u32 %v2649_v0, %v2648_v21  ;;  %v4008_v33 = vld [vmem:[%s5998_s9 + $0x8] sm:$0xff]   ;;  %v4009_v57 = vld [vmem:[%s5998_s9] sm:$0xff]   ;;  %s3352_s9 = sshll.u32 %s4039_s8, 4  ;;  %s3353_s9 = int_to_ptr.vmem [resolvable:$true] %s3352_s9 }
 0x341   :  { %v2641_v52 = vpack.c.bf16 %v2640_v40, %v2640_v40  ;;  %v2656_v58 = vpack.c.bf16 %v2655_v45, %v2655_v45  ;;  %p4019_p1 = scmp.lt.s32.totalorder %s3353_s9, %s3353_s9 }
 0x342   :  { %3021 = vmatprep.mubr.bf16.mxu1 %v2646_v39  ;;  %3667 = vmatmul.mubr.bf16.vlgmr.msra.gmra.mxu0 %v2661_v9  ;;  %v2651_v17 = vpack.c.bf16 %v2650_v30, %v2650_v30 }
 0x343   :  { %3022 = vmatmul.mubr.bf16.vlgmr.msra.gmra.mxu1 %v2641_v52  ;;  %3706 = vmatprep.mubr.msk.bf16.mxu0 %vm4038_vm0, %v6110_v3 }
 0x344   :  { %3602 = vmatpush3.bf16.msra.mxu1 %v3979_v28  ;;  %3061 = vmatprep.mubr.bf16.mxu1 %v2656_v58 }
 0x345   :  { %3603 = vmatprep.subr.bf16.mxu1 %v3980_v56  ;;  %3691 = vmatpush3.bf16.msra.mxu0 %v4002_v2  ;;  %v3570_v56 = vld [vmem:[%s5999_s10] ss:$0 sm:$0xff]  ;;  %s4014_s10 = scalar_lea.vmem %s3353_s9, 128 }
 0x346   :  { %3692 = vmatprep.subr.bf16.mxu0 %v6110_v3  ;;  %p4015_p0 = scmp.ne.s32.totalorder %s3353_s9, %s4014_s10  ;;  %p4020_p2 = scmp.lt.s32.totalorder %s4014_s10, %s4014_s10 }
 0x348   :  { %3604 = vmatpush3.bf16.msra.mxu1 %v3981_v53  ;;  %p4021_p3 = por %p4020_p2, %p4019_p1 }
 0x349   :  { %3605 = vmatprep.subr.bf16.mxu1 %v3982_v1  ;;  %3693 = vmatpush3.bf16.msra.mxu0 %v4003_v49 }
 0x34a   :  { %3694 = vmatprep.subr.bf16.mxu0 %v6110_v3  ;;  %p4022_p4 = pnand %p4021_p3, %p4015_p0 }
 0x34c   :  { %3606 = vmatpush3.bf16.msra.mxu1 %v3983_v11 }
 0x34d   :  { %3607 = vmatprep.subr.bf16.mxu1 %v3984_v14  ;;  %3695 = vmatpush3.bf16.msra.mxu0 %v4004_v43 }
 0x34e   :  { %3696 = vmatprep.subr.bf16.mxu0 %v6110_v3 }
 0x350   :  { %3608 = vmatpush3.bf16.msra.mxu1 %v3985_v10 }
 0x351   :  { %3609 = vmatprep.subr.bf16.mxu1 %v3986_v38  ;;  %3697 = vmatpush3.bf16.msra.mxu0 %v4005_v19 }
 0x352   :  { %3698 = vmatprep.subr.bf16.mxu0 %v6110_v3 }
 0x354   :  { %3610 = vmatpush3.bf16.msra.mxu1 %v3987_v59 }
 0x355   :  { %3611 = vmatprep.subr.bf16.mxu1 %v3988_v25  ;;  %3699 = vmatpush3.bf16.msra.mxu0 %v4006_v23 }
 0x356   :  { %3700 = vmatprep.subr.bf16.mxu0 %v6110_v3 }
 0x358   :  { %3612 = vmatpush3.bf16.msra.mxu1 %v3989_v48 }
 0x359   :  { %3613 = vmatprep.subr.bf16.mxu1 %v3990_v8  ;;  %3701 = vmatpush3.bf16.msra.mxu0 %v4007_v16 }
 0x35a   :  { %3702 = vmatprep.subr.bf16.mxu0 %v6110_v3 }
 0x35c   :  { %3614 = vmatpush3.bf16.msra.mxu1 %v3991_v36 }
 0x35d   :  { %3615 = vmatprep.subr.bf16.mxu1 %v3992_v32  ;;  %3703 = vmatpush3.bf16.msra.mxu0 %v4008_v33 }
 0x35e   :  { %3704 = vmatprep.subr.bf16.mxu0 %v6110_v3 }
 0x360   :  { %3616 = vmatpush3.bf16.msra.mxu1 %v3993_v12 }
 0x361   :  { %3670 = vmatprep.subr.bf16.mxu1 %v6110_v3  ;;  %3705 = vmatpush3.bf16.msra.mxu0 %v4009_v57 }
 0x363   :  { %3062 = vmatmul.mubr.bf16.vlgmr.msra.gmra.mxu1 %v2651_v17 }
 0x364   :  { %3686 = vmatprep.mubr.msk.bf16.mxu1 %vm4038_vm0, %v6110_v3  ;;  %3671 = vmatpush3.bf16.msra.mxu1 %v3994_v60 }
 0x365   :  { %3672 = vmatprep.subr.bf16.mxu1 %v6110_v3 }
 0x368   :  { %3673 = vmatpush3.bf16.msra.mxu1 %v3995_v47 }
 0x369   :  { %3674 = vmatprep.subr.bf16.mxu1 %v6110_v3 }
 0x36c   :  { %3675 = vmatpush3.bf16.msra.mxu1 %v3996_v46 }
 0x36d   :  { %3676 = vmatprep.subr.bf16.mxu1 %v6110_v3 }
 0x370   :  { %3677 = vmatpush3.bf16.msra.mxu1 %v3997_v54 }
 0x371   :  { %3678 = vmatprep.subr.bf16.mxu1 %v6110_v3 }
 0x374   :  { %3679 = vmatpush3.bf16.msra.mxu1 %v3998_v24 }
 0x375   :  { %3680 = vmatprep.subr.bf16.mxu1 %v6110_v3 }
 0x378   :  { %3681 = vmatpush3.bf16.msra.mxu1 %v3999_v41 }
 0x379   :  { %3682 = vmatprep.subr.bf16.mxu1 %v6110_v3 }
 0x37c   :  { %3683 = vmatpush3.bf16.msra.mxu1 %v4000_v62 }
 0x37d   :  { %3684 = vmatprep.subr.bf16.mxu1 %v6110_v3 }
 0x380   :  { %3685 = vmatpush3.bf16.msra.mxu1 %v4001_v34 }
 0x402   :  { %v3103_v31 = vpop.f32.mrf.mxu0 }
 0x403   :  { %v3595_v35 = vpop.f32.mrf.mxu1 }
 0x404   :  { %v3668_v26 = vpop.f32.mrf.mxu0 }
 0x405   :  { %v3596_v55 = vpop.f32.mrf.mxu1 }
 0x406   :  { %v3106_v13 = vpop.f32.mrf.mxu0  ;;  %v3597_v44 = vadd.f32 %v3596_v55, %v3595_v35 }
 0x407   :  { %v3598_v18 = vpop.f32.mrf.mxu1 }
 0x408   :  { %v3669_v4 = vpop.f32.mrf.mxu0  ;;  %v3024_v29 = vadd.f32 %v3597_v44, %v3520_v15 }
 0x409   :  { %v3599_v20 = vpop.f32.mrf.mxu1 }
 0x423   :  { %v3617_v61 = vpop.f32.mrf.mxu1 }
 0x425   :  { %v3618_v5 = vpop.f32.mrf.mxu1 }
 0x426   :  { %v3619_v50 = vadd.f32 %v3618_v5, %v3617_v61 }
 0x427   :  { %v3620_v22 = vpop.f32.mrf.mxu1 }
 0x428   :  { %v3064_v7 = vadd.f32 %v3619_v50, %v3024_v29 }
 0x429   :  { %v3621_v51 = vpop.f32.mrf.mxu1 }
 0x42a   :  { %v3104_v37 = vadd.f32 %v3103_v31, %v3064_v7 }
 0x42c   :  { %v3109_v63 = vmax.f32 %v3104_v37, 0.0 }
 0x42e   :  { %v3110_v42 = vpack.c.bf16 %v3109_v63, %v3109_v63 }
 0x430   :  { %3687 = vmatmul.mubr.bf16.vlgmr.msra.gmra.mxu1 %v3110_v42 }
 0x4f0   :  { %v3216_v6 = vpop.f32.mrf.mxu1 }
 0x4f1   :  { %v3217_v40 = vadd.f32 %v3561_v27, %v3216_v6 }
 0x4f2   :  { %v3688_v45 = vpop.f32.mrf.mxu1 }
 0x4f3   :  { %v3222_v39 = vmax.f32 %v3217_v40, 0.0 }
 0x4f4   :  { %v3219_v9 = vpop.f32.mrf.mxu1 }
 0x4f5   :  { %v3223_v28 = vpack.c.bf16 %v3222_v39, %v3222_v39 }
 0x4f6   :  { %v3689_v52 = vpop.f32.mrf.mxu1 }
 0x4f7   :  { %3707 = vmatmul.mubr.bf16.vlgmr.msra.gmra.mxu0 %v3223_v28 }
 0x5b7   :  { %v3329_v58 = vpop.f32.mrf.mxu0 }
 0x5b8   :  { %v3330_v3 = vadd.f32 %v3570_v56, %v3329_v58 }
 0x5b9   :  { %v3708_v53 = vpop.f32.mrf.mxu0 }
 0x5ba   :  { %3335 = vmax.xlane.f32.xlu0 %v3330_v3 }
 0x5bb   :  { %v3332_v1 = vpop.f32.mrf.mxu0 }
 0x5bd   :  { %v3709_v11 = vpop.f32.mrf.mxu0 }
 0x643   :  { %v3336_v14 = vpop.xlane.xlu0 %3335 }
 0x644   :  { %v3337_v10 = vsub.f32 %v3330_v3, %v3336_v14 }
 0x646   :  { %v3338_v38 = vmul.f32 1.442695, %v3337_v10 }
 0x648   :  { %4010 = vpow2.f32 %v3338_v38 }
 0x655   :  { %v4011_v59 = vpop.eup %4010 }
 0x656   :  { %3340 = vadd.xlane.f32.xlu0 %v4011_v59 }
 0x6df   :  { %v3341_v25 = vpop.xlane.xlu0 %3340 }
 0x6e0   :  { %4012 = vlog2.f32 %v3341_v25 }
 0x6ed   :  { %v4013_v48 = vpop.eup %4012 }
 0x6ee   :  { %v3343_v8 = vmul.f32 0.6931472, %v4013_v48 }
 0x6f0   :  { %v3344_v36 = vsub.f32 %v3337_v10, %v3343_v8 }
 0x6f2   :  { %3345 = vst [vmem:[#allocation6] sm:$0xff] %v3344_v36 }
 0x6f3   :  { %4025 = shalt.err (!%p4022_p4)
}
 0x6f4   :  { %3355 = dma.vmem_to_hbm [thread:$0]  %s3353_s9, 128, %s6000_s11, [#allocation7]  }
 0x6f5   :  { %4034 = dma.done.wait [#allocation7], 128  }
 0x6f6   :  { %4035 = vsyncadd [#allocation7], 4294967168 }
 0x6f7   :  { %3359 = vsyncpa [#allocation7], 1 }

</bundles_post_ra>
